<compile_context>
chip_gen: v5e
topology: v5e:2x2
jax: 0.10.0
libtpu: 0.0.40
codegen_flags: <defaults>
</compile_context>

<pallas_src>
import functools
import math

import numpy as np

import jax
import jax.numpy as jnp
from jax.experimental import pallas as pl
from jax.experimental.pallas import tpu as pltpu


# --------------------------------------------------------------------------------------
# small helpers
# --------------------------------------------------------------------------------------
def _elu(y):
    # ELU(alpha=1); exp(min(y,0)) keeps the unselected branch finite.
    return jnp.where(y > 0, y, jnp.exp(jnp.minimum(y, 0.0)) - 1.0)


def _row_tile(m, cap):
    """Largest row tile that divides m, is a multiple of 8, and leaves >=2 grid steps
    (so the 'parallel' grid axis can be split across the two v7x TensorCores)."""
    cap = min(cap, m)
    if m >= 16:
        cap = min(cap, m // 2)
    for t in range(cap, 0, -1):
        if m % t == 0 and t % 8 == 0:
            return t
    return m


def _depth_tile(d):
    """Depth-chunk size for the conv5 kernel (keeps the live accumulator small)."""
    for t in (4, 2, 1):
        if d % t == 0:
            return t
    return 1


def _bn_affine(s, ss, count, gamma, beta, eps=1e-5):
    """Training-mode BatchNorm (biased variance) folded into a per-channel affine.
    NOTE: stats come from the f32 pre-rounding conv output while the affine is later
    applied to bf16-rounded activations - a tiny, benign mismatch."""
    mean = s / count
    var = jnp.maximum(ss / count - mean * mean, 0.0)       # E[x^2]-mean^2 clamp guard
    inv = jax.lax.rsqrt(var + eps)
    scale = gamma * inv
    shift = beta - mean * scale
    return scale, shift


# --------------------------------------------------------------------------------------
# Kernel 1: matmul + bias with fused BN-statistics epilogue  (ConvTranspose3d k=2,s=2)
# --------------------------------------------------------------------------------------
def _matmul_bias_stats_kernel(x_ref, w_ref, b_ref, o_ref, st_ref):
    y = jnp.dot(x_ref[...], w_ref[...], preferred_element_type=jnp.float32) + b_ref[...]
    o_ref[...] = y.astype(o_ref.dtype)
    st_ref[0] = jnp.concatenate(
        [jnp.sum(y, axis=0, keepdims=True),
         jnp.sum(y * y, axis=0, keepdims=True)], axis=0)


def pallas_matmul_bias_stats(x, w, bias_rep):
    M, K = x.shape
    N = w.shape[1]
    tm = _row_tile(M, 512)
    nt = M // tm
    return pl.pallas_call(
        _matmul_bias_stats_kernel,
        out_shape=(jax.ShapeDtypeStruct((M, N), jnp.bfloat16),
                   jax.ShapeDtypeStruct((nt, 2, N), jnp.float32)),
        grid=(nt,),
        in_specs=[pl.BlockSpec((tm, K), lambda i: (i, 0)),
                  pl.BlockSpec((K, N), lambda i: (0, 0)),       # weight stays resident
                  pl.BlockSpec((1, N), lambda i: (0, 0))],
        out_specs=(pl.BlockSpec((tm, N), lambda i: (i, 0)),
                   pl.BlockSpec((1, 2, N), lambda i: (i, 0, 0))),
        compiler_params=pltpu.CompilerParams(dimension_semantics=("parallel",)),
    )(x, w, bias_rep)


# --------------------------------------------------------------------------------------
# Kernel 2: LUConv 5x5x5 conv.
#   prologue : masked per-lane scale/shift + ELU (BN+ELU of the *previous* layer; for
#              conv #0 the mask leaves the skip-connection lanes untouched)
#   body     : per D-chunk, 5 deep-K (K = 5*W*C) MXU matmuls against host-packed banded
#              weights; kw taps + W zero padding live inside the weight bands, D/H
#              padding lives in a VMEM scratch that is filled once per batch step.
#   epilogue : bias add + per-lane sum / sum^2 (folded to per-channel BN stats on host)
# Activations are laid out as (B*D*H, W*C): channels fused with W into the lane dim.
# --------------------------------------------------------------------------------------
def _conv5_kernel(x_ref, w_ref, b_ref, sc_ref, sh_ref, msk_ref, o_ref, st_ref, pad_ref,
                  *, D, H, DT):
    Lin = x_ref.shape[1]
    Lout = o_ref.shape[1]
    c = pl.program_id(1)                                     # D-chunk index (sequential)

    @pl.when(c == 0)
    def _():
        # fused prologue: scale/shift (+ELU where mask=1) of the previous layer's output
        xf = x_ref[...].astype(jnp.float32) * sc_ref[...] + sh_ref[...]
        xv = jnp.where(msk_ref[...] > 0.5, _elu(xf), xf).astype(jnp.bfloat16)
        # zero only the D/H halo bands; the interior is fully overwritten below.
        zrow = jnp.zeros((2, H + 4, Lin), jnp.bfloat16)
        zcol = jnp.zeros((D, 2, Lin), jnp.bfloat16)
        pad_ref[0:2, :, :] = zrow
        pad_ref[2 + D:2 + D + 2, :, :] = zrow
        pad_ref[2:2 + D, 0:2, :] = zcol
        pad_ref[2:2 + D, 2 + H:2 + H + 2, :] = zcol
        pad_ref[2:2 + D, 2:2 + H, :] = xv.reshape(D, H, Lin)

    d0 = pl.multiple_of(c * DT, DT)
    acc = jnp.zeros((DT * H, Lout), jnp.float32)
    for kh in range(5):
        # one misaligned sublane slice per kh (was 25 full-size shifted slabs before);
        # the kd shift below is a free leading-axis slice of this window.
        win = pad_ref[pl.ds(d0, DT + 4), pl.ds(kh, H), :]          # (DT+4, H, Lin)
        # pack the 5 kd shifts along lanes (128-aligned) -> one K = 5*Lin matmul
        lhs = jnp.concatenate(
            [win[kd:kd + DT].reshape(DT * H, Lin) for kd in range(5)], axis=-1)
        acc = acc + jnp.dot(lhs, w_ref[kh], preferred_element_type=jnp.float32)

    y = acc + b_ref[...]
    o_ref[...] = y.astype(o_ref.dtype)
    # fused BN-statistics epilogue (per-lane partial sums; folded per-channel on host)
    st_ref[0] = jnp.concatenate(
        [jnp.sum(y, axis=0, keepdims=True),
         jnp.sum(y * y, axis=0, keepdims=True)], axis=0)


def pallas_conv5(x, wmats, bias_rep, scale_lane, shift_lane, mask_lane, *, B, D, H, W, C):
    Lin = Lout = W * C
    rows = D * H
    assert x.shape == (B * rows, Lin) and H % 8 == 0
    DT = _depth_tile(D)
    nch = D // DT
    rows_c = DT * H
    assert rows_c % 8 == 0
    sc = scale_lane.reshape(1, Lin).astype(jnp.float32)
    sh = shift_lane.reshape(1, Lin).astype(jnp.float32)
    mk = mask_lane.reshape(1, Lin).astype(jnp.float32)
    kern = functools.partial(_conv5_kernel, D=D, H=H, DT=DT)
    return pl.pallas_call(
        kern,
        out_shape=(jax.ShapeDtypeStruct((B * rows, Lout), jnp.bfloat16),
                   jax.ShapeDtypeStruct((B * nch, 2, Lout), jnp.float32)),
        grid=(B, nch),
        in_specs=[pl.BlockSpec((rows, Lin), lambda b, c: (b, 0)),        # resident per b
                  pl.BlockSpec((5, 5 * Lin, Lout), lambda b, c: (0, 0, 0)),  # resident
                  pl.BlockSpec((1, Lout), lambda b, c: (0, 0)),
                  pl.BlockSpec((1, Lin), lambda b, c: (0, 0)),
                  pl.BlockSpec((1, Lin), lambda b, c: (0, 0)),
                  pl.BlockSpec((1, Lin), lambda b, c: (0, 0))],
        out_specs=(pl.BlockSpec((rows_c, Lout), lambda b, c: (b * nch + c, 0)),
                   pl.BlockSpec((1, 2, Lout), lambda b, c: (b * nch + c, 0, 0))),
        scratch_shapes=[pltpu.VMEM((D + 4, H + 4, Lin), jnp.bfloat16)],
        # chunk axis must stay sequential: chunk 0 fills the shared pad scratch for its
        # batch element (megacore splits only the parallel b axis, so this is safe).
        compiler_params=pltpu.CompilerParams(
            dimension_semantics=("parallel", "arbitrary")),
    )(x, wmats, bias_rep, sc, sh, mk)


# --------------------------------------------------------------------------------------
# Kernel 3: final fused epilogue
#   out = ELU( ELU(BN_last(conv_last)) + xcat ),   xcat = masked-BN1-ELU(xcat_raw)
# xcat is reconstructed on the fly from the raw concat (never materialized post-ELU).
# --------------------------------------------------------------------------------------
def _bn_elu_residual_kernel(c_ref, sc_ref, sh_ref, r_ref, rsc_ref, rsh_ref, rmsk_ref,
                            o_ref):
    y = _elu(c_ref[...].astype(jnp.float32) * sc_ref[...] + sh_ref[...])
    r = r_ref[...].astype(jnp.float32) * rsc_ref[...] + rsh_ref[...]
    r = jnp.where(rmsk_ref[...] > 0.5, _elu(r), r)
    o_ref[...] = _elu(y + r).astype(o_ref.dtype)


def pallas_bn_elu_residual(c, scale_lane, shift_lane, res_raw, rsc_lane, rsh_lane,
                           rmask_lane):
    M, L = c.shape
    tm = _row_tile(M, 128)
    sc = scale_lane.reshape(1, L).astype(jnp.float32)
    sh = shift_lane.reshape(1, L).astype(jnp.float32)
    rsc = rsc_lane.reshape(1, L).astype(jnp.float32)
    rsh = rsh_lane.reshape(1, L).astype(jnp.float32)
    rmk = rmask_lane.reshape(1, L).astype(jnp.float32)
    return pl.pallas_call(
        _bn_elu_residual_kernel,
        out_shape=jax.ShapeDtypeStruct((M, L), jnp.bfloat16),   # bf16 out: half the HBM write
        grid=(M // tm,),
        in_specs=[pl.BlockSpec((tm, L), lambda i: (i, 0)),
                  pl.BlockSpec((1, L), lambda i: (0, 0)),
                  pl.BlockSpec((1, L), lambda i: (0, 0)),
                  pl.BlockSpec((tm, L), lambda i: (i, 0)),
                  pl.BlockSpec((1, L), lambda i: (0, 0)),
                  pl.BlockSpec((1, L), lambda i: (0, 0)),
                  pl.BlockSpec((1, L), lambda i: (0, 0))],
        out_specs=pl.BlockSpec((tm, L), lambda i: (i, 0)),
        compiler_params=pltpu.CompilerParams(dimension_semantics=("parallel",)),
    )(c, sc, sh, res_raw, rsc, rsh, rmk)


# --------------------------------------------------------------------------------------
# parameter construction / packing (one-time, host side)
# --------------------------------------------------------------------------------------
def _banded_conv_weight_kpacked(w5, width):
    """w5: torch-layout (Cout, Cin, 5,5,5).  Returns (5, 5*width*Cin, width*Cout):
    for each kh, the 5 kd taps are stacked along K (matching the in-kernel lane-concat
    of kd-shifted slabs); kw taps + W zero padding are folded into the lane bands."""
    cout, cin = w5.shape[0], w5.shape[1]
    lin, lout = width * cin, width * cout
    mats = np.zeros((5, 5, lin, lout), np.float32)          # [kh, kd, K, N]
    for kd in range(5):
        for kh in range(5):
            m = mats[kh, kd]
            for kw in range(5):
                blk = np.transpose(w5[:, :, kd, kh, kw])     # (Cin, Cout)
                for w in range(width):
                    w_in = w + kw - 2
                    if 0 <= w_in < width:
                        m[w_in * cin:(w_in + 1) * cin, w * cout:(w + 1) * cout] = blk
    return mats.reshape(5, 5 * lin, lout)


def init_params(key, *, in_chans, out_chans, n_convs, up_in_width):
    assert out_chans % 2 == 0 and n_convs >= 1
    ch = out_chans // 2
    W0, W = up_in_width, 2 * up_in_width
    keys = iter(jax.random.split(key, 2 + 2 * n_convs))

    def rnd(shape, scale):
        return np.asarray(jax.random.normal(next(keys), shape, jnp.float32)) * scale

    # ConvTranspose3d(in_chans, ch, k=2, s=2): torch weight layout (Cin, Ch, 2, 2, 2)
    w_up = rnd((in_chans, ch, 2, 2, 2), 1.0 / math.sqrt(in_chans * 8))
    b_up = rnd((ch,), 0.05)
    wmat_small = np.transpose(w_up, (0, 2, 3, 4, 1)).reshape(in_chans, 8 * ch)
    wmat_up = np.kron(np.eye(W0, dtype=np.float32), wmat_small)     # (W0*Cin, W0*8*ch)
    bias_up = np.tile(b_up, W0 * 8)[None, :]

    params = {
        "up_wmat": jnp.asarray(wmat_up, jnp.bfloat16),
        "up_bias": jnp.asarray(bias_up, jnp.float32),
        "bn1_g": jnp.ones((ch,), jnp.float32),                      # torch BN defaults
        "bn1_b": jnp.zeros((ch,), jnp.float32),
        "ops": [],
    }
    cc = out_chans
    for _ in range(n_convs):
        w5 = rnd((cc, cc, 5, 5, 5), math.sqrt(2.0 / (cc * 125)))
        b5 = rnd((cc,), 0.05)
        params["ops"].append({
            "wmat": jnp.asarray(_banded_conv_weight_kpacked(w5, W), jnp.bfloat16),
            "bias": jnp.asarray(np.tile(b5, W)[None, :], jnp.float32),
            "g": jnp.ones((cc,), jnp.float32),
            "b": jnp.zeros((cc,), jnp.float32),
        })
    return params


# --------------------------------------------------------------------------------------
# forward pass (UpTransition.forward)
# --------------------------------------------------------------------------------------
def up_transition_forward(x, skipx, params):
    B, Cin, D0, H0, W0 = x.shape
    _, Ch, D, H, W = skipx.shape
    Cc = 2 * Ch
    n_vox = B * D * H * W                                  # elements / channel for BN stats

    xl = jnp.transpose(x, (0, 2, 3, 4, 1)).astype(jnp.bfloat16)        # channels-last
    skipl = jnp.transpose(skipx, (0, 2, 3, 4, 1)).astype(jnp.bfloat16)

    # --- up_conv: ConvTranspose3d(k=2,s=2) as one lane-fused matmul (+bias, +stats) ---
    x2d = xl.reshape(B * D0 * H0, W0 * Cin)
    u_cols, u_st = pallas_matmul_bias_stats(x2d, params["up_wmat"], params["up_bias"])
    s = u_st[:, 0, :].sum(0).reshape(W0 * 8, Ch).sum(0)
    ss = u_st[:, 1, :].sum(0).reshape(W0 * 8, Ch).sum(0)
    sc1, sh1 = _bn_affine(s, ss, n_vox, params["bn1_g"], params["bn1_b"])
    # scatter the per-voxel 2x2x2 blocks (tiny XLA transpose on bf16).
    # TODO(synk): could be folded into the consumer's BlockSpec/column order.
    u_raw = (u_cols.reshape(B, D0, H0, W0, 2, 2, 2, Ch)
                   .transpose(0, 1, 4, 2, 5, 3, 6, 7)
                   .reshape(B, D, H, W, Ch))

    # --- xcat_raw = cat([up_raw, do2(skipx)], channel);  Dropout3d = identity.
    #     BN1+ELU of the up path is applied lazily as a masked prologue inside conv#0
    #     and inside the final residual kernel (no standalone ELU pass / HBM round-trip).
    xcat_raw = jnp.concatenate([u_raw, skipl], axis=-1).reshape(B * D * H, W * Cc)

    ones_c = jnp.ones((Ch,), jnp.float32)
    zeros_c = jnp.zeros((Ch,), jnp.float32)
    sc0_lane = jnp.tile(jnp.concatenate([sc1, ones_c]), W)     # up lanes: BN1, skip: id
    sh0_lane = jnp.tile(jnp.concatenate([sh1, zeros_c]), W)
    mk0_lane = jnp.tile(jnp.concatenate([ones_c, zeros_c]), W)  # ELU only on up lanes

    # --- self.ops: nConvs x LUConv.  BN+ELU of layer i-1 is fused into layer i's conv
    #     prologue; BN statistics come out of each conv's fused epilogue. ---
    cur = xcat_raw
    sc_lane, sh_lane, mk_lane = sc0_lane, sh0_lane, mk0_lane
    for layer in params["ops"]:
        cur, st = pallas_conv5(cur, layer["wmat"], layer["bias"],
                               sc_lane, sh_lane, mk_lane,
                               B=B, D=D, H=H, W=W, C=Cc)
        s = st[:, 0, :].sum(0).reshape(W, Cc).sum(0)
        ss = st[:, 1, :].sum(0).reshape(W, Cc).sum(0)
        sc_c, sh_c = _bn_affine(s, ss, n_vox, layer["g"], layer["b"])
        sc_lane, sh_lane = jnp.tile(sc_c, W), jnp.tile(sh_c, W)
        mk_lane = jnp.ones((W * Cc,), jnp.float32)             # full-lane ELU thereafter

    # --- out = ELU( ELU(BN(conv_last)) + xcat );  xcat rebuilt from xcat_raw in-kernel ---
    out = pallas_bn_elu_residual(cur, sc_lane, sh_lane,
                                 xcat_raw, sc0_lane, sh0_lane, mk0_lane)
    out = out.reshape(B, D, H, W, Cc).transpose(0, 4, 1, 2, 3)          # NCDHW, bf16
    return out


# --------------------------------------------------------------------------------------
# main
# --------------------------------------------------------------------------------------
if __name__ == "__main__":
    IN_CHANS, OUT_CHANS, N_CONVS = 4, 8, 2          # UpTransition(4, 8, 2, elu=True)
    B, D0, H0, W0 = 2, 8, 8, 8                      # x is upsampled 2x -> 16^3

    key = jax.random.PRNGKey(0)
    kp, kx, ks = jax.random.split(key, 3)
    params = init_params(kp, in_chans=IN_CHANS, out_chans=OUT_CHANS,
                         n_convs=N_CONVS, up_in_width=W0)
    x = jax.random.normal(kx, (B, IN_CHANS, D0, H0, W0), jnp.float32)
    skipx = jax.random.normal(ks, (B, OUT_CHANS // 2, 2 * D0, 2 * H0, 2 * W0), jnp.float32)

    fwd = jax.jit(up_transition_forward)
    out = fwd(x, skipx, params)
    jax.block_until_ready(out)

    assert out.shape == (B, OUT_CHANS, 2 * D0, 2 * H0, 2 * W0)
    assert bool(jnp.all(jnp.isfinite(out.astype(jnp.float32))))
    print("KERNEL_OK")
</pallas_src>

<mosaic_0001>
module attributes {stable_mosaic.version = 11 : i64} {
  func.func @_matmul_bias_stats_kernel(%arg0: i32, %arg1: memref<64x32xbf16, #tpu.memory_space<vmem>>, %arg2: memref<32x256xbf16, #tpu.memory_space<vmem>>, %arg3: memref<1x256xf32, #tpu.memory_space<vmem>>, %arg4: memref<64x256xbf16, #tpu.memory_space<vmem>>, %arg5: memref<1x2x256xf32, #tpu.memory_space<vmem>>) attributes {dimension_semantics = [#tpu.dimension_semantics<parallel>], iteration_bounds = array<i64: 2>, scalar_prefetch = 0 : i64, scratch_operands = 0 : i64, tpu.core_type = #tpu.core_type<tc>, window_params = [{transform_indices = @transform_0, window_bounds = array<i64: 64, 32>}, {pipeline_mode = #tpu.pipeline_mode<synchronous>, transform_indices = @transform_1, window_bounds = array<i64: 32, 256>}, {pipeline_mode = #tpu.pipeline_mode<synchronous>, transform_indices = @transform_2, window_bounds = array<i64: 1, 256>}, {transform_indices = @transform_3, window_bounds = array<i64: 64, 256>}, {transform_indices = @transform_4, window_bounds = array<i64: 1, 2, 256>}]} {
    %c0 = arith.constant 0 : index
    %c0_0 = arith.constant 0 : index
    %0 = vector.load %arg1[%c0, %c0_0] : memref<64x32xbf16, #tpu.memory_space<vmem>>, vector<64x32xbf16>
    %c0_1 = arith.constant 0 : index
    %c0_2 = arith.constant 0 : index
    %1 = vector.load %arg2[%c0_1, %c0_2] : memref<32x256xbf16, #tpu.memory_space<vmem>>, vector<32x256xbf16>
    %cst = arith.constant dense<0.000000e+00> : vector<64x256xf32>
    %2 = tpu.matmul %0, %1, %cst {dimension_numbers = #tpu.dot_dimension_numbers<[1], [0], [0], [1], [0, 0, 1, 1], [], []>} : vector<64x32xbf16>, vector<32x256xbf16>, vector<64x256xf32> -> vector<64x256xf32>
    %c0_3 = arith.constant 0 : index
    %c0_4 = arith.constant 0 : index
    %3 = vector.load %arg3[%c0_3, %c0_4] : memref<1x256xf32, #tpu.memory_space<vmem>>, vector<1x256xf32>
    %4 = vector.broadcast %3 : vector<1x256xf32> to vector<64x256xf32>
    %5 = arith.addf %2, %4 : vector<64x256xf32>
    %6 = arith.truncf %5 : vector<64x256xf32> to vector<64x256xbf16>
    %c0_5 = arith.constant 0 : index
    %c0_6 = arith.constant 0 : index
    %7 = vector.load %arg4[%c0_5, %c0_6] : memref<64x256xbf16, #tpu.memory_space<vmem>>, vector<64x256xbf16>
    tpu.vector_store %arg4[%c0_5, %c0_6], %6 {strides = array<i32>} : memref<64x256xbf16, #tpu.memory_space<vmem>>, vector<64x256xbf16>,
    %cst_7 = arith.constant dense<0.000000e+00> : vector<256xf32>
    %8 = vector.multi_reduction <add>, %5, %cst_7 [0] : vector<64x256xf32> to vector<256xf32>
    %9 = vector.shape_cast %8 : vector<256xf32> to vector<1x256xf32>
    %10 = arith.mulf %5, %5 : vector<64x256xf32>
    %cst_8 = arith.constant dense<0.000000e+00> : vector<256xf32>
    %11 = vector.multi_reduction <add>, %10, %cst_8 [0] : vector<64x256xf32> to vector<256xf32>
    %12 = vector.shape_cast %11 : vector<256xf32> to vector<1x256xf32>
    %13 = tpu.concatenate %9, %12 in 0 : vector<1x256xf32>, vector<1x256xf32> -> vector<2x256xf32>
    %c0_9 = arith.constant 0 : index
    %c0_10 = arith.constant 0 : index
    %c0_11 = arith.constant 0 : index
    %14 = vector.load %arg5[%c0_9, %c0_10, %c0_11] : memref<1x2x256xf32, #tpu.memory_space<vmem>>, vector<1x2x256xf32>
    %15 = vector.shape_cast %14 : vector<1x2x256xf32> to vector<2x256xf32>
    %16 = vector.shape_cast %13 : vector<2x256xf32> to vector<1x2x256xf32>
    tpu.vector_store %arg5[%c0_9, %c0_10, %c0_11], %16 {strides = array<i32>} : memref<1x2x256xf32, #tpu.memory_space<vmem>>, vector<1x2x256xf32>,
    return
  }
  func.func @transform_0(%arg0: i32) -> (i32, i32) {
    %c0_i32 = arith.constant 0 : i32
    %c0_i32_0 = arith.constant 0 : i32
    return %arg0, %c0_i32 : i32, i32
  }
  func.func @transform_1(%arg0: i32) -> (i32, i32) {
    %c0_i32 = arith.constant 0 : i32
    %c0_i32_0 = arith.constant 0 : i32
    %c0_i32_1 = arith.constant 0 : i32
    return %c0_i32, %c0_i32_0 : i32, i32
  }
  func.func @transform_2(%arg0: i32) -> (i32, i32) {
    %c0_i32 = arith.constant 0 : i32
    %c0_i32_0 = arith.constant 0 : i32
    %c0_i32_1 = arith.constant 0 : i32
    return %c0_i32, %c0_i32_0 : i32, i32
  }
  func.func @transform_3(%arg0: i32) -> (i32, i32) {
    %c0_i32 = arith.constant 0 : i32
    %c0_i32_0 = arith.constant 0 : i32
    return %arg0, %c0_i32 : i32, i32
  }
  func.func @transform_4(%arg0: i32) -> (i32, i32, i32) {
    %c0_i32 = arith.constant 0 : i32
    %c0_i32_0 = arith.constant 0 : i32
    %c0_i32_1 = arith.constant 0 : i32
    return %arg0, %c0_i32, %c0_i32_0 : i32, i32, i32
  }
}

module attributes {stable_mosaic.version = 11 : i64} {
  func.func @_conv5_kernel(%arg0: i32, %arg1: i32, %arg2: memref<256x128xbf16, #tpu.memory_space<vmem>>, %arg3: memref<5x640x128xbf16, #tpu.memory_space<vmem>>, %arg4: memref<1x128xf32, #tpu.memory_space<vmem>>, %arg5: memref<1x128xf32, #tpu.memory_space<vmem>>, %arg6: memref<1x128xf32, #tpu.memory_space<vmem>>, %arg7: memref<1x128xf32, #tpu.memory_space<vmem>>, %arg8: memref<64x128xbf16, #tpu.memory_space<vmem>>, %arg9: memref<1x2x128xf32, #tpu.memory_space<vmem>>, %arg10: memref<20x20x128xbf16, #tpu.memory_space<vmem>>) attributes {dimension_semantics = [#tpu.dimension_semantics<parallel>, #tpu.dimension_semantics<arbitrary>], iteration_bounds = array<i64: 2, 4>, scalar_prefetch = 0 : i64, scratch_operands = 1 : i64, tpu.core_type = #tpu.core_type<tc>, window_params = [{transform_indices = @transform_0, window_bounds = array<i64: 256, 128>}, {pipeline_mode = #tpu.pipeline_mode<synchronous>, transform_indices = @transform_1, window_bounds = array<i64: 5, 640, 128>}, {pipeline_mode = #tpu.pipeline_mode<synchronous>, transform_indices = @transform_2, window_bounds = array<i64: 1, 128>}, {pipeline_mode = #tpu.pipeline_mode<synchronous>, transform_indices = @transform_3, window_bounds = array<i64: 1, 128>}, {pipeline_mode = #tpu.pipeline_mode<synchronous>, transform_indices = @transform_4, window_bounds = array<i64: 1, 128>}, {pipeline_mode = #tpu.pipeline_mode<synchronous>, transform_indices = @transform_5, window_bounds = array<i64: 1, 128>}, {transform_indices = @transform_6, window_bounds = array<i64: 64, 128>}, {transform_indices = @transform_7, window_bounds = array<i64: 1, 2, 128>}]} {
    %c0_i32 = arith.constant 0 : i32
    %0 = arith.cmpi eq, %arg1, %c0_i32 : i32
    %1 = arith.extui %0 : i1 to i32
    %c0_i32_0 = arith.constant 0 : i32
    %2 = arith.cmpi ne, %1, %c0_i32_0 : i32
    scf.if %2 {
      %c0_35 = arith.constant 0 : index
      %c0_36 = arith.constant 0 : index
      %105 = vector.load %arg2[%c0_35, %c0_36] : memref<256x128xbf16, #tpu.memory_space<vmem>>, vector<256x128xbf16>
      %106 = arith.extf %105 : vector<256x128xbf16> to vector<256x128xf32>
      %c0_37 = arith.constant 0 : index
      %c0_38 = arith.constant 0 : index
      %107 = vector.load %arg5[%c0_37, %c0_38] : memref<1x128xf32, #tpu.memory_space<vmem>>, vector<1x128xf32>
      %108 = vector.broadcast %107 : vector<1x128xf32> to vector<256x128xf32>
      %109 = arith.mulf %106, %108 : vector<256x128xf32>
      %c0_39 = arith.constant 0 : index
      %c0_40 = arith.constant 0 : index
      %110 = vector.load %arg6[%c0_39, %c0_40] : memref<1x128xf32, #tpu.memory_space<vmem>>, vector<1x128xf32>
      %111 = vector.broadcast %110 : vector<1x128xf32> to vector<256x128xf32>
      %112 = arith.addf %109, %111 : vector<256x128xf32>
      %c0_41 = arith.constant 0 : index
      %c0_42 = arith.constant 0 : index
      %113 = vector.load %arg7[%c0_41, %c0_42] : memref<1x128xf32, #tpu.memory_space<vmem>>, vector<1x128xf32>
      %cst_43 = arith.constant 5.000000e-01 : f32
      %114 = vector.broadcast %cst_43 : f32 to vector<1x128xf32>
      %115 = arith.cmpf ogt, %113, %114 : vector<1x128xf32>
      %cst_44 = arith.constant 0.000000e+00 : f32
      %116 = vector.broadcast %cst_44 : f32 to vector<256x128xf32>
      %117 = arith.cmpf ogt, %112, %116 : vector<256x128xf32>
      %cst_45 = arith.constant 0.000000e+00 : f32
      %118 = vector.broadcast %cst_45 : f32 to vector<256x128xf32>
      %119 = arith.minimumf %112, %118 : vector<256x128xf32>
      %120 = math.exp %119 : vector<256x128xf32>
      %cst_46 = arith.constant 1.000000e+00 : f32
      %121 = vector.broadcast %cst_46 : f32 to vector<256x128xf32>
      %122 = arith.subf %120, %121 : vector<256x128xf32>
      %123 = arith.select %117, %112, %122 : vector<256x128xi1>, vector<256x128xf32>
      %124 = vector.shape_cast %115 : vector<1x128xi1> to vector<1x128xi1>
      %125 = vector.broadcast %124 : vector<1x128xi1> to vector<256x128xi1>
      %126 = arith.select %125, %123, %112 : vector<256x128xi1>, vector<256x128xf32>
      %127 = arith.truncf %126 : vector<256x128xf32> to vector<256x128xbf16>
      %cst_47 = arith.constant 0.000000e+00 : bf16
      %128 = vector.broadcast %cst_47 : bf16 to vector<2x20x128xbf16>
      %cst_48 = arith.constant 0.000000e+00 : bf16
      %129 = vector.broadcast %cst_48 : bf16 to vector<16x2x128xbf16>
      %c0_49 = arith.constant 0 : index
      %c0_50 = arith.constant 0 : index
      %c0_51 = arith.constant 0 : index
      %130 = vector.load %arg10[%c0_49, %c0_50, %c0_51] : memref<20x20x128xbf16, #tpu.memory_space<vmem>>, vector<2x20x128xbf16>
      tpu.vector_store %arg10[%c0_49, %c0_50, %c0_51], %128 {strides = array<i32>} : memref<20x20x128xbf16, #tpu.memory_space<vmem>>, vector<2x20x128xbf16>,
      %c18 = arith.constant 18 : index
      %c0_52 = arith.constant 0 : index
      %c0_53 = arith.constant 0 : index
      %131 = vector.load %arg10[%c18, %c0_52, %c0_53] : memref<20x20x128xbf16, #tpu.memory_space<vmem>>, vector<2x20x128xbf16>
      tpu.vector_store %arg10[%c18, %c0_52, %c0_53], %128 {strides = array<i32>} : memref<20x20x128xbf16, #tpu.memory_space<vmem>>, vector<2x20x128xbf16>,
      %c2_54 = arith.constant 2 : index
      %c0_55 = arith.constant 0 : index
      %c0_56 = arith.constant 0 : index
      %132 = vector.load %arg10[%c2_54, %c0_55, %c0_56] : memref<20x20x128xbf16, #tpu.memory_space<vmem>>, vector<16x2x128xbf16>
      tpu.vector_store %arg10[%c2_54, %c0_55, %c0_56], %129 {strides = array<i32>} : memref<20x20x128xbf16, #tpu.memory_space<vmem>>, vector<16x2x128xbf16>,
      %c2_57 = arith.constant 2 : index
      %c18_58 = arith.constant 18 : index
      %c0_59 = arith.constant 0 : index
      %133 = vector.load %arg10[%c2_57, %c18_58, %c0_59] : memref<20x20x128xbf16, #tpu.memory_space<vmem>>, vector<16x2x128xbf16>
      tpu.vector_store %arg10[%c2_57, %c18_58, %c0_59], %129 {strides = array<i32>} : memref<20x20x128xbf16, #tpu.memory_space<vmem>>, vector<16x2x128xbf16>,
      %134 = vector.shape_cast %127 : vector<256x128xbf16> to vector<16x16x128xbf16>
      %c2_60 = arith.constant 2 : index
      %c2_61 = arith.constant 2 : index
      %c0_62 = arith.constant 0 : index
      %135 = vector.load %arg10[%c2_60, %c2_61, %c0_62] : memref<20x20x128xbf16, #tpu.memory_space<vmem>>, vector<16x16x128xbf16>
      tpu.vector_store %arg10[%c2_60, %c2_61, %c0_62], %134 {strides = array<i32>} : memref<20x20x128xbf16, #tpu.memory_space<vmem>>, vector<16x16x128xbf16>,
    } else {
    }
    %c4_i32 = arith.constant 4 : i32
    %3 = arith.muli %arg1, %c4_i32 : i32
    %4 = tpu.assume_multiple %3, 4 : i32
    %cst = arith.constant 0.000000e+00 : f32
    %5 = vector.broadcast %cst : f32 to vector<64x128xf32>
    %6 = arith.index_cast %4 : i32 to index
    %c0 = arith.constant 0 : index
    %c0_1 = arith.constant 0 : index
    %7 = vector.load %arg10[%6, %c0, %c0_1] : memref<20x20x128xbf16, #tpu.memory_space<vmem>>, vector<8x16x128xbf16>
    %8 = vector.extract_strided_slice %7 {offsets = [0, 0, 0], sizes = [4, 16, 128], strides = [1, 1, 1]} : vector<8x16x128xbf16> to vector<4x16x128xbf16>
    %9 = vector.shape_cast %8 : vector<4x16x128xbf16> to vector<64x128xbf16>
    %10 = vector.extract_strided_slice %7 {offsets = [1, 0, 0], sizes = [4, 16, 128], strides = [1, 1, 1]} : vector<8x16x128xbf16> to vector<4x16x128xbf16>
    %11 = vector.shape_cast %10 : vector<4x16x128xbf16> to vector<64x128xbf16>
    %12 = vector.extract_strided_slice %7 {offsets = [2, 0, 0], sizes = [4, 16, 128], strides = [1, 1, 1]} : vector<8x16x128xbf16> to vector<4x16x128xbf16>
    %13 = vector.shape_cast %12 : vector<4x16x128xbf16> to vector<64x128xbf16>
    %14 = vector.extract_strided_slice %7 {offsets = [3, 0, 0], sizes = [4, 16, 128], strides = [1, 1, 1]} : vector<8x16x128xbf16> to vector<4x16x128xbf16>
    %15 = vector.shape_cast %14 : vector<4x16x128xbf16> to vector<64x128xbf16>
    %16 = vector.extract_strided_slice %7 {offsets = [4, 0, 0], sizes = [4, 16, 128], strides = [1, 1, 1]} : vector<8x16x128xbf16> to vector<4x16x128xbf16>
    %17 = vector.shape_cast %16 : vector<4x16x128xbf16> to vector<64x128xbf16>
    %18 = tpu.concatenate %9, %11, %13, %15, %17 in 1 : vector<64x128xbf16>, vector<64x128xbf16>, vector<64x128xbf16>, vector<64x128xbf16>, vector<64x128xbf16> -> vector<64x640xbf16>
    %c0_2 = arith.constant 0 : index
    %c0_3 = arith.constant 0 : index
    %c0_4 = arith.constant 0 : index
    %19 = vector.load %arg3[%c0_2, %c0_3, %c0_4] : memref<5x640x128xbf16, #tpu.memory_space<vmem>>, vector<1x640x128xbf16>
    %20 = vector.shape_cast %19 : vector<1x640x128xbf16> to vector<640x128xbf16>
    %cst_5 = arith.constant dense<0.000000e+00> : vector<64x128xf32>
    %21 = tpu.matmul %18, %20, %cst_5 {dimension_numbers = #tpu.dot_dimension_numbers<[1], [0], [0], [1], [0, 0, 1, 1], [], []>} : vector<64x640xbf16>, vector<640x128xbf16>, vector<64x128xf32> -> vector<64x128xf32>
    %22 = arith.addf %5, %21 : vector<64x128xf32>
    %23 = arith.index_cast %4 : i32 to index
    %c1 = arith.constant 1 : index
    %c0_6 = arith.constant 0 : index
    %24 = vector.load %arg10[%23, %c1, %c0_6] : memref<20x20x128xbf16, #tpu.memory_space<vmem>>, vector<8x16x128xbf16>
    %25 = vector.extract_strided_slice %24 {offsets = [0, 0, 0], sizes = [4, 16, 128], strides = [1, 1, 1]} : vector<8x16x128xbf16> to vector<4x16x128xbf16>
    %26 = vector.shape_cast %25 : vector<4x16x128xbf16> to vector<64x128xbf16>
    %27 = vector.extract_strided_slice %24 {offsets = [1, 0, 0], sizes = [4, 16, 128], strides = [1, 1, 1]} : vector<8x16x128xbf16> to vector<4x16x128xbf16>
    %28 = vector.shape_cast %27 : vector<4x16x128xbf16> to vector<64x128xbf16>
    %29 = vector.extract_strided_slice %24 {offsets = [2, 0, 0], sizes = [4, 16, 128], strides = [1, 1, 1]} : vector<8x16x128xbf16> to vector<4x16x128xbf16>
    %30 = vector.shape_cast %29 : vector<4x16x128xbf16> to vector<64x128xbf16>
    %31 = vector.extract_strided_slice %24 {offsets = [3, 0, 0], sizes = [4, 16, 128], strides = [1, 1, 1]} : vector<8x16x128xbf16> to vector<4x16x128xbf16>
    %32 = vector.shape_cast %31 : vector<4x16x128xbf16> to vector<64x128xbf16>
    %33 = vector.extract_strided_slice %24 {offsets = [4, 0, 0], sizes = [4, 16, 128], strides = [1, 1, 1]} : vector<8x16x128xbf16> to vector<4x16x128xbf16>
    %34 = vector.shape_cast %33 : vector<4x16x128xbf16> to vector<64x128xbf16>
    %35 = tpu.concatenate %26, %28, %30, %32, %34 in 1 : vector<64x128xbf16>, vector<64x128xbf16>, vector<64x128xbf16>, vector<64x128xbf16>, vector<64x128xbf16> -> vector<64x640xbf16>
    %c1_7 = arith.constant 1 : index
    %c0_8 = arith.constant 0 : index
    %c0_9 = arith.constant 0 : index
    %36 = vector.load %arg3[%c1_7, %c0_8, %c0_9] : memref<5x640x128xbf16, #tpu.memory_space<vmem>>, vector<1x640x128xbf16>
    %37 = vector.shape_cast %36 : vector<1x640x128xbf16> to vector<640x128xbf16>
    %cst_10 = arith.constant dense<0.000000e+00> : vector<64x128xf32>
    %38 = tpu.matmul %35, %37, %cst_10 {dimension_numbers = #tpu.dot_dimension_numbers<[1], [0], [0], [1], [0, 0, 1, 1], [], []>} : vector<64x640xbf16>, vector<640x128xbf16>, vector<64x128xf32> -> vector<64x128xf32>
    %39 = arith.addf %22, %38 : vector<64x128xf32>
    %40 = arith.index_cast %4 : i32 to index
    %c2 = arith.constant 2 : index
    %c0_11 = arith.constant 0 : index
    %41 = vector.load %arg10[%40, %c2, %c0_11] : memref<20x20x128xbf16, #tpu.memory_space<vmem>>, vector<8x16x128xbf16>
    %42 = vector.extract_strided_slice %41 {offsets = [0, 0, 0], sizes = [4, 16, 128], strides = [1, 1, 1]} : vector<8x16x128xbf16> to vector<4x16x128xbf16>
    %43 = vector.shape_cast %42 : vector<4x16x128xbf16> to vector<64x128xbf16>
    %44 = vector.extract_strided_slice %41 {offsets = [1, 0, 0], sizes = [4, 16, 128], strides = [1, 1, 1]} : vector<8x16x128xbf16> to vector<4x16x128xbf16>
    %45 = vector.shape_cast %44 : vector<4x16x128xbf16> to vector<64x128xbf16>
    %46 = vector.extract_strided_slice %41 {offsets = [2, 0, 0], sizes = [4, 16, 128], strides = [1, 1, 1]} : vector<8x16x128xbf16> to vector<4x16x128xbf16>
    %47 = vector.shape_cast %46 : vector<4x16x128xbf16> to vector<64x128xbf16>
    %48 = vector.extract_strided_slice %41 {offsets = [3, 0, 0], sizes = [4, 16, 128], strides = [1, 1, 1]} : vector<8x16x128xbf16> to vector<4x16x128xbf16>
    %49 = vector.shape_cast %48 : vector<4x16x128xbf16> to vector<64x128xbf16>
    %50 = vector.extract_strided_slice %41 {offsets = [4, 0, 0], sizes = [4, 16, 128], strides = [1, 1, 1]} : vector<8x16x128xbf16> to vector<4x16x128xbf16>
    %51 = vector.shape_cast %50 : vector<4x16x128xbf16> to vector<64x128xbf16>
    %52 = tpu.concatenate %43, %45, %47, %49, %51 in 1 : vector<64x128xbf16>, vector<64x128xbf16>, vector<64x128xbf16>, vector<64x128xbf16>, vector<64x128xbf16> -> vector<64x640xbf16>
    %c2_12 = arith.constant 2 : index
    %c0_13 = arith.constant 0 : index
    %c0_14 = arith.constant 0 : index
    %53 = vector.load %arg3[%c2_12, %c0_13, %c0_14] : memref<5x640x128xbf16, #tpu.memory_space<vmem>>, vector<1x640x128xbf16>
    %54 = vector.shape_cast %53 : vector<1x640x128xbf16> to vector<640x128xbf16>
    %cst_15 = arith.constant dense<0.000000e+00> : vector<64x128xf32>
    %55 = tpu.matmul %52, %54, %cst_15 {dimension_numbers = #tpu.dot_dimension_numbers<[1], [0], [0], [1], [0, 0, 1, 1], [], []>} : vector<64x640xbf16>, vector<640x128xbf16>, vector<64x128xf32> -> vector<64x128xf32>
    %56 = arith.addf %39, %55 : vector<64x128xf32>
    %57 = arith.index_cast %4 : i32 to index
    %c3 = arith.constant 3 : index
    %c0_16 = arith.constant 0 : index
    %58 = vector.load %arg10[%57, %c3, %c0_16] : memref<20x20x128xbf16, #tpu.memory_space<vmem>>, vector<8x16x128xbf16>
    %59 = vector.extract_strided_slice %58 {offsets = [0, 0, 0], sizes = [4, 16, 128], strides = [1, 1, 1]} : vector<8x16x128xbf16> to vector<4x16x128xbf16>
    %60 = vector.shape_cast %59 : vector<4x16x128xbf16> to vector<64x128xbf16>
    %61 = vector.extract_strided_slice %58 {offsets = [1, 0, 0], sizes = [4, 16, 128], strides = [1, 1, 1]} : vector<8x16x128xbf16> to vector<4x16x128xbf16>
    %62 = vector.shape_cast %61 : vector<4x16x128xbf16> to vector<64x128xbf16>
    %63 = vector.extract_strided_slice %58 {offsets = [2, 0, 0], sizes = [4, 16, 128], strides = [1, 1, 1]} : vector<8x16x128xbf16> to vector<4x16x128xbf16>
    %64 = vector.shape_cast %63 : vector<4x16x128xbf16> to vector<64x128xbf16>
    %65 = vector.extract_strided_slice %58 {offsets = [3, 0, 0], sizes = [4, 16, 128], strides = [1, 1, 1]} : vector<8x16x128xbf16> to vector<4x16x128xbf16>
    %66 = vector.shape_cast %65 : vector<4x16x128xbf16> to vector<64x128xbf16>
    %67 = vector.extract_strided_slice %58 {offsets = [4, 0, 0], sizes = [4, 16, 128], strides = [1, 1, 1]} : vector<8x16x128xbf16> to vector<4x16x128xbf16>
    %68 = vector.shape_cast %67 : vector<4x16x128xbf16> to vector<64x128xbf16>
    %69 = tpu.concatenate %60, %62, %64, %66, %68 in 1 : vector<64x128xbf16>, vector<64x128xbf16>, vector<64x128xbf16>, vector<64x128xbf16>, vector<64x128xbf16> -> vector<64x640xbf16>
    %c3_17 = arith.constant 3 : index
    %c0_18 = arith.constant 0 : index
    %c0_19 = arith.constant 0 : index
    %70 = vector.load %arg3[%c3_17, %c0_18, %c0_19] : memref<5x640x128xbf16, #tpu.memory_space<vmem>>, vector<1x640x128xbf16>
    %71 = vector.shape_cast %70 : vector<1x640x128xbf16> to vector<640x128xbf16>
    %cst_20 = arith.constant dense<0.000000e+00> : vector<64x128xf32>
    %72 = tpu.matmul %69, %71, %cst_20 {dimension_numbers = #tpu.dot_dimension_numbers<[1], [0], [0], [1], [0, 0, 1, 1], [], []>} : vector<64x640xbf16>, vector<640x128xbf16>, vector<64x128xf32> -> vector<64x128xf32>
    %73 = arith.addf %56, %72 : vector<64x128xf32>
    %74 = arith.index_cast %4 : i32 to index
    %c4 = arith.constant 4 : index
    %c0_21 = arith.constant 0 : index
    %75 = vector.load %arg10[%74, %c4, %c0_21] : memref<20x20x128xbf16, #tpu.memory_space<vmem>>, vector<8x16x128xbf16>
    %76 = vector.extract_strided_slice %75 {offsets = [0, 0, 0], sizes = [4, 16, 128], strides = [1, 1, 1]} : vector<8x16x128xbf16> to vector<4x16x128xbf16>
    %77 = vector.shape_cast %76 : vector<4x16x128xbf16> to vector<64x128xbf16>
    %78 = vector.extract_strided_slice %75 {offsets = [1, 0, 0], sizes = [4, 16, 128], strides = [1, 1, 1]} : vector<8x16x128xbf16> to vector<4x16x128xbf16>
    %79 = vector.shape_cast %78 : vector<4x16x128xbf16> to vector<64x128xbf16>
    %80 = vector.extract_strided_slice %75 {offsets = [2, 0, 0], sizes = [4, 16, 128], strides = [1, 1, 1]} : vector<8x16x128xbf16> to vector<4x16x128xbf16>
    %81 = vector.shape_cast %80 : vector<4x16x128xbf16> to vector<64x128xbf16>
    %82 = vector.extract_strided_slice %75 {offsets = [3, 0, 0], sizes = [4, 16, 128], strides = [1, 1, 1]} : vector<8x16x128xbf16> to vector<4x16x128xbf16>
    %83 = vector.shape_cast %82 : vector<4x16x128xbf16> to vector<64x128xbf16>
    %84 = vector.extract_strided_slice %75 {offsets = [4, 0, 0], sizes = [4, 16, 128], strides = [1, 1, 1]} : vector<8x16x128xbf16> to vector<4x16x128xbf16>
    %85 = vector.shape_cast %84 : vector<4x16x128xbf16> to vector<64x128xbf16>
    %86 = tpu.concatenate %77, %79, %81, %83, %85 in 1 : vector<64x128xbf16>, vector<64x128xbf16>, vector<64x128xbf16>, vector<64x128xbf16>, vector<64x128xbf16> -> vector<64x640xbf16>
    %c4_22 = arith.constant 4 : index
    %c0_23 = arith.constant 0 : index
    %c0_24 = arith.constant 0 : index
    %87 = vector.load %arg3[%c4_22, %c0_23, %c0_24] : memref<5x640x128xbf16, #tpu.memory_space<vmem>>, vector<1x640x128xbf16>
    %88 = vector.shape_cast %87 : vector<1x640x128xbf16> to vector<640x128xbf16>
    %cst_25 = arith.constant dense<0.000000e+00> : vector<64x128xf32>
    %89 = tpu.matmul %86, %88, %cst_25 {dimension_numbers = #tpu.dot_dimension_numbers<[1], [0], [0], [1], [0, 0, 1, 1], [], []>} : vector<64x640xbf16>, vector<640x128xbf16>, vector<64x128xf32> -> vector<64x128xf32>
    %90 = arith.addf %73, %89 : vector<64x128xf32>
    %c0_26 = arith.constant 0 : index
    %c0_27 = arith.constant 0 : index
    %91 = vector.load %arg4[%c0_26, %c0_27] : memref<1x128xf32, #tpu.memory_space<vmem>>, vector<1x128xf32>
    %92 = vector.broadcast %91 : vector<1x128xf32> to vector<64x128xf32>
    %93 = arith.addf %90, %92 : vector<64x128xf32>
    %94 = arith.truncf %93 : vector<64x128xf32> to vector<64x128xbf16>
    %c0_28 = arith.constant 0 : index
    %c0_29 = arith.constant 0 : index
    %95 = vector.load %arg8[%c0_28, %c0_29] : memref<64x128xbf16, #tpu.memory_space<vmem>>, vector<64x128xbf16>
    tpu.vector_store %arg8[%c0_28, %c0_29], %94 {strides = array<i32>} : memref<64x128xbf16, #tpu.memory_space<vmem>>, vector<64x128xbf16>,
    %cst_30 = arith.constant dense<0.000000e+00> : vector<128xf32>
    %96 = vector.multi_reduction <add>, %93, %cst_30 [0] : vector<64x128xf32> to vector<128xf32>
    %97 = vector.shape_cast %96 : vector<128xf32> to vector<1x128xf32>
    %98 = arith.mulf %93, %93 : vector<64x128xf32>
    %cst_31 = arith.constant dense<0.000000e+00> : vector<128xf32>
    %99 = vector.multi_reduction <add>, %98, %cst_31 [0] : vector<64x128xf32> to vector<128xf32>
    %100 = vector.shape_cast %99 : vector<128xf32> to vector<1x128xf32>
    %101 = tpu.concatenate %97, %100 in 0 : vector<1x128xf32>, vector<1x128xf32> -> vector<2x128xf32>
    %c0_32 = arith.constant 0 : index
    %c0_33 = arith.constant 0 : index
    %c0_34 = arith.constant 0 : index
    %102 = vector.load %arg9[%c0_32, %c0_33, %c0_34] : memref<1x2x128xf32, #tpu.memory_space<vmem>>, vector<1x2x128xf32>
    %103 = vector.shape_cast %102 : vector<1x2x128xf32> to vector<2x128xf32>
    %104 = vector.shape_cast %101 : vector<2x128xf32> to vector<1x2x128xf32>
    tpu.vector_store %arg9[%c0_32, %c0_33, %c0_34], %104 {strides = array<i32>} : memref<1x2x128xf32, #tpu.memory_space<vmem>>, vector<1x2x128xf32>,
    return
  }
  func.func @transform_0(%arg0: i32, %arg1: i32) -> (i32, i32) {
    %c0_i32 = arith.constant 0 : i32
    %c0_i32_0 = arith.constant 0 : i32
    return %arg0, %c0_i32 : i32, i32
  }
  func.func @transform_1(%arg0: i32, %arg1: i32) -> (i32, i32, i32) {
    %c0_i32 = arith.constant 0 : i32
    %c0_i32_0 = arith.constant 0 : i32
    %c0_i32_1 = arith.constant 0 : i32
    %c0_i32_2 = arith.constant 0 : i32
    return %c0_i32, %c0_i32_0, %c0_i32_1 : i32, i32, i32
  }
  func.func @transform_2(%arg0: i32, %arg1: i32) -> (i32, i32) {
    %c0_i32 = arith.constant 0 : i32
    %c0_i32_0 = arith.constant 0 : i32
    %c0_i32_1 = arith.constant 0 : i32
    return %c0_i32, %c0_i32_0 : i32, i32
  }
  func.func @transform_3(%arg0: i32, %arg1: i32) -> (i32, i32) {
    %c0_i32 = arith.constant 0 : i32
    %c0_i32_0 = arith.constant 0 : i32
    %c0_i32_1 = arith.constant 0 : i32
    return %c0_i32, %c0_i32_0 : i32, i32
  }
  func.func @transform_4(%arg0: i32, %arg1: i32) -> (i32, i32) {
    %c0_i32 = arith.constant 0 : i32
    %c0_i32_0 = arith.constant 0 : i32
    %c0_i32_1 = arith.constant 0 : i32
    return %c0_i32, %c0_i32_0 : i32, i32
  }
  func.func @transform_5(%arg0: i32, %arg1: i32) -> (i32, i32) {
    %c0_i32 = arith.constant 0 : i32
    %c0_i32_0 = arith.constant 0 : i32
    %c0_i32_1 = arith.constant 0 : i32
    return %c0_i32, %c0_i32_0 : i32, i32
  }
  func.func @transform_6(%arg0: i32, %arg1: i32) -> (i32, i32) {
    %c4_i32 = arith.constant 4 : i32
    %0 = arith.muli %arg0, %c4_i32 : i32
    %1 = arith.addi %0, %arg1 : i32
    %c0_i32 = arith.constant 0 : i32
    %c0_i32_0 = arith.constant 0 : i32
    return %1, %c0_i32 : i32, i32
  }
  func.func @transform_7(%arg0: i32, %arg1: i32) -> (i32, i32, i32) {
    %c4_i32 = arith.constant 4 : i32
    %0 = arith.muli %arg0, %c4_i32 : i32
    %1 = arith.addi %0, %arg1 : i32
    %c0_i32 = arith.constant 0 : i32
    %c0_i32_0 = arith.constant 0 : i32
    %c0_i32_1 = arith.constant 0 : i32
    return %1, %c0_i32, %c0_i32_0 : i32, i32, i32
  }
}

module attributes {stable_mosaic.version = 11 : i64} {
  func.func @_bn_elu_residual_kernel(%arg0: i32, %arg1: memref<128x128xbf16, #tpu.memory_space<vmem>>, %arg2: memref<1x128xf32, #tpu.memory_space<vmem>>, %arg3: memref<1x128xf32, #tpu.memory_space<vmem>>, %arg4: memref<128x128xbf16, #tpu.memory_space<vmem>>, %arg5: memref<1x128xf32, #tpu.memory_space<vmem>>, %arg6: memref<1x128xf32, #tpu.memory_space<vmem>>, %arg7: memref<1x128xf32, #tpu.memory_space<vmem>>, %arg8: memref<128x128xbf16, #tpu.memory_space<vmem>>) attributes {dimension_semantics = [#tpu.dimension_semantics<parallel>], iteration_bounds = array<i64: 4>, scalar_prefetch = 0 : i64, scratch_operands = 0 : i64, tpu.core_type = #tpu.core_type<tc>, window_params = [{transform_indices = @transform_0, window_bounds = array<i64: 128, 128>}, {pipeline_mode = #tpu.pipeline_mode<synchronous>, transform_indices = @transform_1, window_bounds = array<i64: 1, 128>}, {pipeline_mode = #tpu.pipeline_mode<synchronous>, transform_indices = @transform_2, window_bounds = array<i64: 1, 128>}, {transform_indices = @transform_3, window_bounds = array<i64: 128, 128>}, {pipeline_mode = #tpu.pipeline_mode<synchronous>, transform_indices = @transform_4, window_bounds = array<i64: 1, 128>}, {pipeline_mode = #tpu.pipeline_mode<synchronous>, transform_indices = @transform_5, window_bounds = array<i64: 1, 128>}, {pipeline_mode = #tpu.pipeline_mode<synchronous>, transform_indices = @transform_6, window_bounds = array<i64: 1, 128>}, {transform_indices = @transform_7, window_bounds = array<i64: 128, 128>}]} {
    %c0 = arith.constant 0 : index
    %c0_0 = arith.constant 0 : index
    %0 = vector.load %arg1[%c0, %c0_0] : memref<128x128xbf16, #tpu.memory_space<vmem>>, vector<128x128xbf16>
    %1 = arith.extf %0 : vector<128x128xbf16> to vector<128x128xf32>
    %c0_1 = arith.constant 0 : index
    %c0_2 = arith.constant 0 : index
    %2 = vector.load %arg2[%c0_1, %c0_2] : memref<1x128xf32, #tpu.memory_space<vmem>>, vector<1x128xf32>
    %3 = vector.broadcast %2 : vector<1x128xf32> to vector<128x128xf32>
    %4 = arith.mulf %1, %3 : vector<128x128xf32>
    %c0_3 = arith.constant 0 : index
    %c0_4 = arith.constant 0 : index
    %5 = vector.load %arg3[%c0_3, %c0_4] : memref<1x128xf32, #tpu.memory_space<vmem>>, vector<1x128xf32>
    %6 = vector.broadcast %5 : vector<1x128xf32> to vector<128x128xf32>
    %7 = arith.addf %4, %6 : vector<128x128xf32>
    %cst = arith.constant 0.000000e+00 : f32
    %8 = vector.broadcast %cst : f32 to vector<128x128xf32>
    %9 = arith.cmpf ogt, %7, %8 : vector<128x128xf32>
    %cst_5 = arith.constant 0.000000e+00 : f32
    %10 = vector.broadcast %cst_5 : f32 to vector<128x128xf32>
    %11 = arith.minimumf %7, %10 : vector<128x128xf32>
    %12 = math.exp %11 : vector<128x128xf32>
    %cst_6 = arith.constant 1.000000e+00 : f32
    %13 = vector.broadcast %cst_6 : f32 to vector<128x128xf32>
    %14 = arith.subf %12, %13 : vector<128x128xf32>
    %15 = arith.select %9, %7, %14 : vector<128x128xi1>, vector<128x128xf32>
    %c0_7 = arith.constant 0 : index
    %c0_8 = arith.constant 0 : index
    %16 = vector.load %arg4[%c0_7, %c0_8] : memref<128x128xbf16, #tpu.memory_space<vmem>>, vector<128x128xbf16>
    %17 = arith.extf %16 : vector<128x128xbf16> to vector<128x128xf32>
    %c0_9 = arith.constant 0 : index
    %c0_10 = arith.constant 0 : index
    %18 = vector.load %arg5[%c0_9, %c0_10] : memref<1x128xf32, #tpu.memory_space<vmem>>, vector<1x128xf32>
    %19 = vector.broadcast %18 : vector<1x128xf32> to vector<128x128xf32>
    %20 = arith.mulf %17, %19 : vector<128x128xf32>
    %c0_11 = arith.constant 0 : index
    %c0_12 = arith.constant 0 : index
    %21 = vector.load %arg6[%c0_11, %c0_12] : memref<1x128xf32, #tpu.memory_space<vmem>>, vector<1x128xf32>
    %22 = vector.broadcast %21 : vector<1x128xf32> to vector<128x128xf32>
    %23 = arith.addf %20, %22 : vector<128x128xf32>
    %c0_13 = arith.constant 0 : index
    %c0_14 = arith.constant 0 : index
    %24 = vector.load %arg7[%c0_13, %c0_14] : memref<1x128xf32, #tpu.memory_space<vmem>>, vector<1x128xf32>
    %cst_15 = arith.constant 5.000000e-01 : f32
    %25 = vector.broadcast %cst_15 : f32 to vector<1x128xf32>
    %26 = arith.cmpf ogt, %24, %25 : vector<1x128xf32>
    %cst_16 = arith.constant 0.000000e+00 : f32
    %27 = vector.broadcast %cst_16 : f32 to vector<128x128xf32>
    %28 = arith.cmpf ogt, %23, %27 : vector<128x128xf32>
    %cst_17 = arith.constant 0.000000e+00 : f32
    %29 = vector.broadcast %cst_17 : f32 to vector<128x128xf32>
    %30 = arith.minimumf %23, %29 : vector<128x128xf32>
    %31 = math.exp %30 : vector<128x128xf32>
    %cst_18 = arith.constant 1.000000e+00 : f32
    %32 = vector.broadcast %cst_18 : f32 to vector<128x128xf32>
    %33 = arith.subf %31, %32 : vector<128x128xf32>
    %34 = arith.select %28, %23, %33 : vector<128x128xi1>, vector<128x128xf32>
    %35 = vector.shape_cast %26 : vector<1x128xi1> to vector<1x128xi1>
    %36 = vector.broadcast %35 : vector<1x128xi1> to vector<128x128xi1>
    %37 = arith.select %36, %34, %23 : vector<128x128xi1>, vector<128x128xf32>
    %38 = arith.addf %15, %37 : vector<128x128xf32>
    %cst_19 = arith.constant 0.000000e+00 : f32
    %39 = vector.broadcast %cst_19 : f32 to vector<128x128xf32>
    %40 = arith.cmpf ogt, %38, %39 : vector<128x128xf32>
    %cst_20 = arith.constant 0.000000e+00 : f32
    %41 = vector.broadcast %cst_20 : f32 to vector<128x128xf32>
    %42 = arith.minimumf %38, %41 : vector<128x128xf32>
    %43 = math.exp %42 : vector<128x128xf32>
    %cst_21 = arith.constant 1.000000e+00 : f32
    %44 = vector.broadcast %cst_21 : f32 to vector<128x128xf32>
    %45 = arith.subf %43, %44 : vector<128x128xf32>
    %46 = arith.select %40, %38, %45 : vector<128x128xi1>, vector<128x128xf32>
    %47 = arith.truncf %46 : vector<128x128xf32> to vector<128x128xbf16>
    %c0_22 = arith.constant 0 : index
    %c0_23 = arith.constant 0 : index
    %48 = vector.load %arg8[%c0_22, %c0_23] : memref<128x128xbf16, #tpu.memory_space<vmem>>, vector<128x128xbf16>
    tpu.vector_store %arg8[%c0_22, %c0_23], %47 {strides = array<i32>} : memref<128x128xbf16, #tpu.memory_space<vmem>>, vector<128x128xbf16>,
    return
  }
  func.func @transform_0(%arg0: i32) -> (i32, i32) {
    %c0_i32 = arith.constant 0 : i32
    %c0_i32_0 = arith.constant 0 : i32
    return %arg0, %c0_i32 : i32, i32
  }
  func.func @transform_1(%arg0: i32) -> (i32, i32) {
    %c0_i32 = arith.constant 0 : i32
    %c0_i32_0 = arith.constant 0 : i32
    %c0_i32_1 = arith.constant 0 : i32
    return %c0_i32, %c0_i32_0 : i32, i32
  }
  func.func @transform_2(%arg0: i32) -> (i32, i32) {
    %c0_i32 = arith.constant 0 : i32
    %c0_i32_0 = arith.constant 0 : i32
    %c0_i32_1 = arith.constant 0 : i32
    return %c0_i32, %c0_i32_0 : i32, i32
  }
  func.func @transform_3(%arg0: i32) -> (i32, i32) {
    %c0_i32 = arith.constant 0 : i32
    %c0_i32_0 = arith.constant 0 : i32
    return %arg0, %c0_i32 : i32, i32
  }
  func.func @transform_4(%arg0: i32) -> (i32, i32) {
    %c0_i32 = arith.constant 0 : i32
    %c0_i32_0 = arith.constant 0 : i32
    %c0_i32_1 = arith.constant 0 : i32
    return %c0_i32, %c0_i32_0 : i32, i32
  }
  func.func @transform_5(%arg0: i32) -> (i32, i32) {
    %c0_i32 = arith.constant 0 : i32
    %c0_i32_0 = arith.constant 0 : i32
    %c0_i32_1 = arith.constant 0 : i32
    return %c0_i32, %c0_i32_0 : i32, i32
  }
  func.func @transform_6(%arg0: i32) -> (i32, i32) {
    %c0_i32 = arith.constant 0 : i32
    %c0_i32_0 = arith.constant 0 : i32
    %c0_i32_1 = arith.constant 0 : i32
    return %c0_i32, %c0_i32_0 : i32, i32
  }
  func.func @transform_7(%arg0: i32) -> (i32, i32) {
    %c0_i32 = arith.constant 0 : i32
    %c0_i32_0 = arith.constant 0 : i32
    return %arg0, %c0_i32 : i32, i32
  }
}

</mosaic_0001>

<bundles_post_ra>
// kernel: tile.40
= control target key start
LH: loop header
LB: loop body
LE: loop exit
PB: predicated region body
PF: predicated region fallthrough
CT: control target
= control target key end

     0   :  { %s28_s0 = inlined_call_operand.vmem [shape: f32[8], index: 0, kind: input, shape index: {}]   ;;  %s29_s1 = inlined_call_operand.vmem [shape: f32[16,8], index: 1, kind: output, shape index: {}]  }
   0x1   :  { %v4_v0 = vld [vmem:[%s28_s0] ss:$0 sm:$0xff] }
   0x2   :  { %5 = vst [vmem:[%s29_s1] sm:$0xff] %v4_v0 }
   0x3   :  { %8 = vst [vmem:[%s29_s1 + $0x8] sm:$0xff] %v4_v0 }

// kernel: tile.48
= control target key start
LH: loop header
LB: loop body
LE: loop exit
PB: predicated region body
PF: predicated region fallthrough
CT: control target
= control target key end

     0   :  { %s131_s10 = smov 120   ;;  %s132_s11 = smov 104   ;;  %vm3_vm0 = vcmask 64512   ;;  %vm9_vm1 = vcmask 1048512   ;;  %vm15_vm2 = vcmask 982912   ;;  %vm21_vm3 = vcmask 917312   ;;  %s207_s0 = inlined_call_operand.vmem [shape: f32[16,8], index: 0, kind: input, shape index: {}]   ;;  %s208_s1 = inlined_call_operand.vmem [shape: f32[1,128], index: 1, kind: output, shape index: {}]  }
   0x1   :  { %v101_v0 = vld [vmem:[%s207_s0 + $0xf] sm:$0x1]   ;;  %v103_v1 = vld [vmem:[%s207_s0 + $0xd] sm:$0x1]   ;;  %v105_v2 = vld [vmem:[%s207_s0 + $0xb] sm:$0x1]  }
   0x2   :  { %7 = vrot.lane.b32.xlu0 %v101_v0, %s131_s10  ;;  %19 = vrot.lane.b32.xlu1 %v103_v1, %s132_s11  ;;  %s133_s14 = smov 88   ;;  %v102_v3 = vld [vmem:[%s207_s0 + $0xe] sm:$0x1]   ;;  %v104_v4 = vld [vmem:[%s207_s0 + $0xc] sm:$0x1]   ;;  %s134_s19 = smov 112  }
   0x3   :  { %31 = vrot.lane.b32.xlu2 %v105_v2, %s133_s14  ;;  %s135_s20 = smov 96   ;;  %v106_v5 = vld [vmem:[%s207_s0 + $0xa] sm:$0x1]   ;;  %s136_s23 = smov 80   ;;  %v107_v6 = vld [vmem:[%s207_s0 + $0x9] sm:$0x1]  }
   0x4   :  { %v108_v7 = vld [vmem:[%s207_s0 + $0x8] sm:$0x1]   ;;  %s137_s28 = smov 72   ;;  %s138_s29 = smov 64   ;;  %v109_v8 = vld [vmem:[%s207_s0 + $0x7] sm:$0x1]  }
   0x5   :  { %s139_s3 = smov 56   ;;  %v110_v9 = vld [vmem:[%s207_s0 + $0x6] sm:$0x1]   ;;  %v111_v10 = vld [vmem:[%s207_s0 + $0x5] sm:$0x1]   ;;  %s140_s8 = smov 48  }
   0x6   :  { %s141_s9 = smov 40   ;;  %v112_v11 = vld [vmem:[%s207_s0 + $0x4] sm:$0x1]   ;;  %s142_s12 = smov 32   ;;  %v113_v12 = vld [vmem:[%s207_s0 + $0x3] sm:$0x1]  }
   0x7   :  { %v114_v13 = vld [vmem:[%s207_s0 + $0x2] sm:$0x1]   ;;  %s143_s17 = smov 24   ;;  %s144_s18 = smov 16   ;;  %v115_v14 = vld [vmem:[%s207_s0 + $0x1] sm:$0x1]  }
   0x8   :  { %s145_s21 = smov 8   ;;  %v2_v15 = vld [vmem:[%s207_s0] sm:$0x1]   ;;  %vm27_vm4 = vcmask 851712   ;;  %vm33_vm5 = vcmask 786112   ;;  %vm39_vm6 = vcmask 720512  }
   0x9   :  { %4 = vst.msk [vmem:[#allocation0] sm:$0x1] %vm3_vm0, %v2_v15   ;;  %vm45_vm7 = vcmask 654912   ;;  %vm51_vm8 = vcmask 589312   ;;  %vm57_vm9 = vcmask 523712   ;;  %vm63_vm10 = vcmask 458112  }
   0xa   :  { %13 = vrot.lane.b32.xlu0 %v102_v3, %s134_s19  ;;  %25 = vrot.lane.b32.xlu1 %v104_v4, %s135_s20  ;;  %vm69_vm11 = vcmask 392512   ;;  %vm75_vm12 = vcmask 326912   ;;  %vm81_vm13 = vcmask 261312   ;;  %vm87_vm14 = vcmask 195712  }
   0xb   :  { %37 = vrot.lane.b32.xlu2 %v106_v5, %s136_s23  ;;  %vm93_vm15 = vcmask 130112  }
  0x12   :  { %43 = vrot.lane.b32.xlu0 %v107_v6, %s137_s28  ;;  %49 = vrot.lane.b32.xlu1 %v108_v7, %s138_s29 }
  0x13   :  { %55 = vrot.lane.b32.xlu2 %v109_v8, %s139_s3 }
  0x1a   :  { %61 = vrot.lane.b32.xlu0 %v110_v9, %s140_s8  ;;  %67 = vrot.lane.b32.xlu1 %v111_v10, %s141_s9 }
  0x1b   :  { %73 = vrot.lane.b32.xlu2 %v112_v11, %s142_s12 }
  0x22   :  { %79 = vrot.lane.b32.xlu0 %v113_v12, %s143_s17  ;;  %85 = vrot.lane.b32.xlu1 %v114_v13, %s144_s18 }
  0x23   :  { %91 = vrot.lane.b32.xlu2 %v115_v14, %s145_s21 }
  0x5d   :  { %v32_v16 = vpop.permute.xlu2 %31  }
  0x65   :  { %v38_v17 = vpop.permute.xlu2 %37  }
  0x6d   :  { %v56_v18 = vpop.permute.xlu2 %55  }
  0x74   :  { %v8_v19 = vpop.permute.xlu0 %7   ;;  %v20_v20 = vpop.permute.xlu1 %19  }
  0x75   :  { %10 = vst.msk [vmem:[#allocation0] sm:$0x1] %vm9_vm1, %v8_v19   ;;  %v74_v21 = vpop.permute.xlu2 %73  }
  0x7c   :  { %v14_v22 = vpop.permute.xlu0 %13   ;;  %v26_v23 = vpop.permute.xlu1 %25  }
  0x7d   :  { %16 = vst.msk [vmem:[#allocation0] sm:$0x1] %vm15_vm2, %v14_v22   ;;  %v92_v24 = vpop.permute.xlu2 %91  }
  0x7e   :  { %22 = vst.msk [vmem:[#allocation0] sm:$0x1] %vm21_vm3, %v20_v20  }
  0x7f   :  { %28 = vst.msk [vmem:[#allocation0] sm:$0x1] %vm27_vm4, %v26_v23  }
  0x80   :  { %34 = vst.msk [vmem:[#allocation0] sm:$0x1] %vm33_vm5, %v32_v16  }
  0x81   :  { %40 = vst.msk [vmem:[#allocation0] sm:$0x1] %vm39_vm6, %v38_v17  }
  0x84   :  { %v44_v25 = vpop.permute.xlu0 %43   ;;  %v50_v26 = vpop.permute.xlu1 %49  }
  0x85   :  { %46 = vst.msk [vmem:[#allocation0] sm:$0x1] %vm45_vm7, %v44_v25  }
  0x86   :  { %52 = vst.msk [vmem:[#allocation0] sm:$0x1] %vm51_vm8, %v50_v26  }
  0x87   :  { %58 = vst.msk [vmem:[#allocation0] sm:$0x1] %vm57_vm9, %v56_v18  }
  0x8c   :  { %v62_v27 = vpop.permute.xlu0 %61   ;;  %v68_v28 = vpop.permute.xlu1 %67  }
  0x8d   :  { %64 = vst.msk [vmem:[#allocation0] sm:$0x1] %vm63_vm10, %v62_v27  }
  0x8e   :  { %70 = vst.msk [vmem:[#allocation0] sm:$0x1] %vm69_vm11, %v68_v28  }
  0x8f   :  { %76 = vst.msk [vmem:[#allocation0] sm:$0x1] %vm75_vm12, %v74_v21  }
  0x94   :  { %v80_v29 = vpop.permute.xlu0 %79   ;;  %v86_v30 = vpop.permute.xlu1 %85  }
  0x95   :  { %82 = vst.msk [vmem:[#allocation0] sm:$0x1] %vm81_vm13, %v80_v29  }
  0x96   :  { %88 = vst.msk [vmem:[#allocation0] sm:$0x1] %vm87_vm14, %v86_v30  }
  0x97   :  { %94 = vst.msk [vmem:[#allocation0] sm:$0x1] %vm93_vm15, %v92_v24  }
  0x9e   :  { %v97_v31 = vld [vmem:[#allocation0] sm:$0x1] }
  0x9f   :  { %100 = vst [vmem:[%s208_s1] sm:$0x1] %v97_v31 }

// kernel: up_transition_forward.4
= control target key start
LH: loop header
LB: loop body
LE: loop exit
PB: predicated region body
PF: predicated region fallthrough
CT: control target
= control target key end

     0   :  { %10 = vsyncpa [#allocation3], 0  ;;  %s877_s0 = inlined_call_operand.vmem [shape: bf16[128,32], index: 0, kind: input, shape index: {}]   ;;  %s878_s1 = inlined_call_operand.hbm [shape: bf16[32,256], index: 1, kind: input, shape index: {}]   ;;  %s879_s2 = inlined_call_operand.hbm [shape: f32[1,256], index: 2, kind: input, shape index: {}]   ;;  %s880_s3 = inlined_call_operand.vmem [shape: bf16[128,256], index: 3, kind: output, shape index: {0}]   ;;  %s881_s4 = inlined_call_operand.vmem [shape: f32[2,2,256], index: 4, kind: output, shape index: {1}]  }
   0x1   :  { %11 = vsyncpa [#allocation5], 0  ;;  %s793_s15 = smov 0  }
   0x2 LB: > { %s153_s18 = sshll.u32 %s878_s1, 4  ;;  %s802_s19 = sadd.s32 4294967295, %s762_s15   ;;  %s762_s15 = sphi %s793_s15, %s17_s15   ;;  %s154_s18 = int_to_ptr.hbm [resolvable:$true] %s153_s18 }
   0x3   : > { %p587_p0 = scmp.ge.s32.totalorder %s762_s15, 1  ;;  %p142_p1 = scmp.lt.s32.totalorder %s762_s15, 3 }
   0x4   : > { %p672_p2 = scmp.eq.s32.totalorder %s802_s19, 0  ;;  %s764_s21 = smov [#allocation2]  }
   0x5   : > { %p807_p3 = pnand %p587_p0, %p142_p1  ;;  %s155_s22 = sshll.u32 %s764_s21, 4  ;;  %s156_s22 = int_to_ptr.vmem [resolvable:$true] %s155_s22 }
   0x6   : > { %s168_s25 = sshll.u32 %s879_s2, 4  ;;  %s765_s26 = smov [#allocation4]   ;;  %s169_s25 = int_to_ptr.hbm [resolvable:$true] %s168_s25 }
   0x7   : > { %p665_p4 = pneg %p807_p3  ;;  %s170_s27 = sshll.u32 %s765_s26, 4  ;;  %s171_s27 = int_to_ptr.vmem [resolvable:$true] %s170_s27 }
   0x8   : > { %s766_s28 = smov 128   ;;  %s767_s29 = smov 8  }
   0x9   : > { %p666_p5 = pnand %p672_p2, %p665_p4  ;;  %192 = sbr.rel (%p807_p3) target bundleno = 210 (0xd2), region = 32 }
   0xb   : > { %668 = dma.hbm_to_vmem [thread:$0]  (!%p666_p5), %s154_s18, 512, %s156_s22, [#allocation3], %s766_s28, %s766_s28, %s767_s29  }
   0xc   : > { %671 = dma.hbm_to_vmem [thread:$0]  (!%p666_p5), %s169_s25, 32, %s171_s27, [#allocation5]  }
   0xe   : > { %753 = dma.done.wait (%p672_p2), [#allocation3], 512  }
   0xf   : > { %755 = vsyncadd (%p672_p2), [#allocation3], 4294966784 }
  0x10   : > { %757 = dma.done.wait (%p672_p2), [#allocation5], 32  }
  0x11   : > { %759 = vsyncadd (%p672_p2), [#allocation5], 4294967264  ;;  %s594_s30 = sshll.u32 %s802_s19, 3  ;;  %v627_v0 = vld [vmem:[#allocation2 + $0x10] sm:$0xf]  ;;  %vm307_vm0 = vcmask 261120  }
  0x12   : > { %p231_p6 = scmp.lt.s32.totalorder %s594_s30, 15  ;;  %v652_v1 = vld [vmem:[#allocation2 + $0x14] sm:$0xf0]  ;;  %v651_v2 = vld [vmem:[#allocation2 + $0x14] sm:$0xf]  ;;  %p243_p7 = scmp.lt.s32.totalorder %s802_s19, 1 }
  0x13   : > { %v628_v3 = vor.u32 %v652_v1, %v627_v0  ;;  %v629_v4 = vld [vmem:[#allocation2 + $0x18] sm:$0xf0]  ;;  %v619_v5 = vld [vmem:[#allocation2] sm:$0xf]  ;;  %v650_v6 = vld [vmem:[#allocation2 + $0x4] sm:$0xf0] }
  0x14   : > { %s884_s30 = smov (!%p231_p6, %s594_s30), 15  ;;  %v632_v7 = vor.u32 %v651_v2, %v629_v4  ;;  %v649_v8 = vld [vmem:[#allocation2 + $0x4] sm:$0xf]  ;;  %v621_v9 = vld [vmem:[#allocation2 + $0x8] sm:$0xf0]  ;;  %v620_v10 = vor.u32 %v650_v6, %v619_v5  ;;  %s886_s19 = smov (!%p243_p7, %s802_s19), 1 }
  0x15   : > { %s595_s5 = sshll.u32 %s884_s30, 2  ;;  %326 = vmatpush.bf16.msra.mxu0 %v628_v3  ;;  %653 = vmatpush.bf16.msra.mxu2 %v628_v3  ;;  %v624_v11 = vor.u32 %v649_v8, %v621_v9  ;;  %v261_v16 = vld [vmem:[#allocation4] sm:$0x3]  ;;  %s643_s9 = sshll.u32 %s884_s30, 3  ;;  %vm462_vm1 = vcmask 1040384   ;;  %vm468_vm2 = vcmask 1041408  }
  0x16   : > { %s234_s8 = scalar_lea.vmem %s877_s0, %s595_s5  ;;  %355 = vmatpush.bf16.msra.mxu1 %v632_v7  ;;  %655 = vmatpush.bf16.msra.mxu3 %v632_v7  ;;  %v835_v17 = vperm.slane %v261_v16, 0  ;;  %v837_v18 = vperm.slane %v261_v16, 1  ;;  %s845_s12 = scalar_lea.vmem %s880_s3, %s643_s9 }
  0x17   : > { %v645_v12 = vld [vmem:[%s234_s8] sm:$0xff]  ;;  %v647_v13 = vld [vmem:[%s234_s8 + $0x10] sm:$0xff]  ;;  %v646_v14 = vld [vmem:[%s234_s8 + $0x8] sm:$0xff]  ;;  %s644_s13 = sshll.u32 %s886_s19, 2 }
  0x18   : > { %v648_v15 = vld [vmem:[%s234_s8 + $0x18] sm:$0xff]  ;;  %s247_s17 = scalar_lea.vmem %s881_s4, %s644_s13 }
  0x19   : > { %327 = vmatpush.bf16.msra.mxu0 %v620_v10  ;;  %654 = vmatpush.bf16.msra.mxu2 %v620_v10 }
  0x1a   : > { %356 = vmatpush.bf16.msra.mxu1 %v624_v11  ;;  %656 = vmatpush.bf16.msra.mxu3 %v624_v11 }
  0x1c   : > { %633 = vmatmul.msk.bf16.vlgmr.msra.gmra.mxu0 %vm307_vm0, %v645_v12  ;;  %635 = vmatmul.msk.bf16.vlgmr.msra.gmra.mxu2 %vm307_vm0, %v647_v13 }
  0x1d   : > { %637 = vmatmul.msk.bf16.vlgmr.msra.gmra.mxu1 %vm307_vm0, %v645_v12  ;;  %639 = vmatmul.msk.bf16.vlgmr.msra.gmra.mxu3 %vm307_vm0, %v647_v13 }
  0x2c   : > { %634 = vmatmul.msk.bf16.gmra.mxu0 %vm307_vm0, %v646_v14  ;;  %636 = vmatmul.msk.bf16.gmra.mxu2 %vm307_vm0, %v648_v15 }
  0x2d   : > { %638 = vmatmul.msk.bf16.gmra.mxu1 %vm307_vm0, %v646_v14  ;;  %640 = vmatmul.msk.bf16.gmra.mxu3 %vm307_vm0, %v648_v15 }
  0x99   : > { %v329_v19 = vpop.f32.mrf.mxu0 }
  0x9a   : > { %v330_v20 = vadd.f32 %v329_v19, %v835_v17  ;;  %v358_v21 = vpop.f32.mrf.mxu1 }
  0x9b   : > { %v359_v22 = vadd.f32 %v358_v21, %v837_v18 }
  0x9c   : > { %v420_v47 = vmul.f32 %v330_v20, %v330_v20 }
  0x9d   : > { %v378_v23 = vpack.c.bf16 %v359_v22, %v330_v20  ;;  %v421_v52 = vmul.f32 %v359_v22, %v359_v22 }
  0x9f   : > { %386 = vst [vmem:[%s845_s12] sm:$0xff] %v378_v23  ;;  %v339_v24 = vpop.f32.mrf.mxu2 }
  0xa0   : > { %v340_v25 = vadd.f32 %v339_v24, %v835_v17  ;;  %v368_v26 = vpop.f32.mrf.mxu3 }
  0xa1   : > { %v369_v27 = vadd.f32 %v368_v26, %v837_v18  ;;  %v331_v28 = vpop.f32.mrf.mxu0 }
  0xa2   : > { %v332_v29 = vadd.f32 %v331_v28, %v835_v17  ;;  %v360_v30 = vpop.f32.mrf.mxu1  ;;  %v428_v8 = vmul.f32 %v340_v25, %v340_v25 }
  0xa3   : > { %v382_v31 = vpack.c.bf16 %v369_v27, %v340_v25  ;;  %v361_v32 = vadd.f32 %v360_v30, %v837_v18  ;;  %v429_v11 = vmul.f32 %v369_v27, %v369_v27 }
  0xa4   : > { %v422_v44 = vmul.f32 %v332_v29, %v332_v29  ;;  %v394_v48 = vadd.f32 %v332_v29, %v330_v20 }
  0xa5   : > { %390 = vst [vmem:[%s845_s12 + $0x20] sm:$0xff] %v382_v31  ;;  %v379_v33 = vpack.c.bf16 %v361_v32, %v332_v29  ;;  %v423_v45 = vmul.f32 %v361_v32, %v361_v32  ;;  %v407_v53 = vadd.f32 %v361_v32, %v359_v22 }
  0xa6   : > { %v436_v57 = vadd.f32 %v422_v44, %v420_v47 }
  0xa7   : > { %387 = vst [vmem:[%s845_s12 + $0x8] sm:$0xff] %v379_v33  ;;  %v341_v34 = vpop.f32.mrf.mxu2  ;;  %v449_v61 = vadd.f32 %v423_v45, %v421_v52 }
  0xa8   : > { %v342_v35 = vadd.f32 %v341_v34, %v835_v17  ;;  %v370_v36 = vpop.f32.mrf.mxu3 }
  0xa9   : > { %v371_v37 = vadd.f32 %v370_v36, %v837_v18  ;;  %v334_v38 = vpop.f32.mrf.mxu0 }
  0xaa   : > { %v335_v39 = vadd.f32 %v334_v38, %v835_v17  ;;  %v363_v40 = vpop.f32.mrf.mxu1  ;;  %v430_v15 = vmul.f32 %v342_v35, %v342_v35 }
  0xab   : > { %v383_v41 = vpack.c.bf16 %v371_v37, %v342_v35  ;;  %v364_v42 = vadd.f32 %v363_v40, %v837_v18  ;;  %v431_v22 = vmul.f32 %v371_v37, %v371_v37 }
  0xac   : > { %v424_v49 = vmul.f32 %v335_v39, %v335_v39  ;;  %v395_v58 = vadd.f32 %v394_v48, %v335_v39 }
  0xad   : > { %391 = vst [vmem:[%s845_s12 + $0x28] sm:$0xff] %v383_v41  ;;  %v380_v43 = vpack.c.bf16 %v364_v42, %v335_v39  ;;  %v425_v54 = vmul.f32 %v364_v42, %v364_v42  ;;  %v408_v62 = vadd.f32 %v407_v53, %v364_v42 }
  0xae   : > { %v437_v1 = vadd.f32 %v436_v57, %v424_v49 }
  0xaf   : > { %388 = vst [vmem:[%s845_s12 + $0x10] sm:$0xff] %v380_v43  ;;  %v344_v46 = vpop.f32.mrf.mxu2  ;;  %v450_v4 = vadd.f32 %v449_v61, %v425_v54 }
  0xb0   : > { %v345_v50 = vadd.f32 %v344_v46, %v835_v17  ;;  %v373_v51 = vpop.f32.mrf.mxu3 }
  0xb1   : > { %v374_v55 = vadd.f32 %v373_v51, %v837_v18  ;;  %v336_v56 = vpop.f32.mrf.mxu0 }
  0xb2   : > { %v337_v59 = vadd.f32 %v336_v56, %v835_v17  ;;  %v365_v60 = vpop.f32.mrf.mxu1  ;;  %v432_v28 = vmul.f32 %v345_v50, %v345_v50 }
  0xb3   : > { %v384_v63 = vpack.c.bf16 %v374_v55, %v345_v50  ;;  %v366_v0 = vadd.f32 %v365_v60, %v837_v18  ;;  %v433_v30 = vmul.f32 %v374_v55, %v374_v55 }
  0xb4   : > { %v396_v2 = vadd.f32 %v395_v58, %v337_v59  ;;  %v426_v3 = vmul.f32 %v337_v59, %v337_v59 }
  0xb5   : > { %392 = vst [vmem:[%s845_s12 + $0x30] sm:$0xff] %v384_v63  ;;  %v381_v5 = vpack.c.bf16 %v366_v0, %v337_v59  ;;  %v409_v6 = vadd.f32 %v408_v62, %v366_v0  ;;  %v427_v7 = vmul.f32 %v366_v0, %v366_v0 }
  0xb6   : > { %v397_v9 = vadd.f32 %v396_v2, %v340_v25  ;;  %v438_v10 = vadd.f32 %v437_v1, %v426_v3 }
  0xb7   : > { %389 = vst [vmem:[%s845_s12 + $0x18] sm:$0xff] %v381_v5  ;;  %v410_v12 = vadd.f32 %v409_v6, %v369_v27  ;;  %v451_v13 = vadd.f32 %v450_v4, %v427_v7  ;;  %v346_v14 = vpop.f32.mrf.mxu2 }
  0xb8   : > { %v439_v16 = vadd.f32 %v438_v10, %v428_v8  ;;  %v347_v19 = vadd.f32 %v346_v14, %v835_v17  ;;  %v398_v20 = vadd.f32 %v397_v9, %v342_v35  ;;  %v375_v21 = vpop.f32.mrf.mxu3 }
  0xb9   : > { %v452_v23 = vadd.f32 %v451_v13, %v429_v11  ;;  %v376_v24 = vadd.f32 %v375_v21, %v837_v18  ;;  %v411_v26 = vadd.f32 %v410_v12, %v371_v37 }
  0xba   : > { %v399_v25 = vadd.f32 %v398_v20, %v345_v50  ;;  %v440_v29 = vadd.f32 %v439_v16, %v430_v15  ;;  %v434_v34 = vmul.f32 %v347_v19, %v347_v19 }
  0xbb   : > { %v385_v31 = vpack.c.bf16 %v376_v24, %v347_v19  ;;  %v412_v27 = vadd.f32 %v411_v26, %v374_v55  ;;  %v453_v32 = vadd.f32 %v452_v23, %v431_v22  ;;  %v435_v35 = vmul.f32 %v376_v24, %v376_v24 }
  0xbc   : > { %v400_v33 = vadd.f32 %v399_v25, %v347_v19  ;;  %v441_v36 = vadd.f32 %v440_v29, %v432_v28 }
  0xbd   : > { %393 = vst [vmem:[%s845_s12 + $0x38] sm:$0xff] %v385_v31  ;;  %v413_v17 = vadd.f32 %v412_v27, %v376_v24  ;;  %v454_v38 = vadd.f32 %v453_v32, %v433_v30 }
  0xbe   : > { %v401_v39 = vrot.slane %v400_v33, 4  ;;  %v442_v40 = vadd.f32 %v441_v36, %v434_v34 }
  0xbf   : > { %v414_v41 = vrot.slane %v413_v17, 4  ;;  %v455_v18 = vadd.f32 %v454_v38, %v435_v35 }
  0xc0   : > { %v402_v37 = vadd.f32 %v401_v39, %v400_v33  ;;  %v443_v42 = vrot.slane %v442_v40, 4 }
  0xc1   : > { %v415_v43 = vadd.f32 %v414_v41, %v413_v17  ;;  %v456_v44 = vrot.slane %v455_v18, 4 }
  0xc2   : > { %v403_v45 = vrot.slane %v402_v37, 2  ;;  %v444_v46 = vadd.f32 %v443_v42, %v442_v40 }
  0xc3   : > { %v416_v47 = vrot.slane %v415_v43, 2  ;;  %v457_v48 = vadd.f32 %v456_v44, %v455_v18 }
  0xc4   : > { %v445_v49 = vrot.slane %v444_v46, 2  ;;  %v404_v50 = vadd.f32 %v403_v45, %v402_v37 }
  0xc5   : > { %v417_v51 = vadd.f32 %v416_v47, %v415_v43  ;;  %v458_v52 = vrot.slane %v457_v48, 2 }
  0xc6   : > { %v446_v53 = vadd.f32 %v445_v49, %v444_v46  ;;  %v405_v57 = vrot.slane %v404_v50, 1 }
  0xc7   : > { %v418_v54 = vrot.slane %v417_v51, 1  ;;  %v459_v55 = vadd.f32 %v458_v52, %v457_v48 }
  0xc8   : > { %v447_v56 = vrot.slane %v446_v53, 1  ;;  %v406_v62 = vadd.f32 %v405_v57, %v404_v50 }
  0xc9   : > { %v460_v58 = vrot.slane %v459_v55, 1  ;;  %v419_v60 = vadd.f32 %v418_v54, %v417_v51 }
  0xca   : > { %v448_v59 = vadd.f32 %v447_v56, %v446_v53 }
  0xcb   : > { %v461_v61 = vadd.f32 %v460_v58, %v459_v55 }
  0xcc   : > { %v463_v1 = vsel %vm462_vm1, %v406_v62, %v448_v59 }
  0xcd   : > { %v464_v63 = vsel %vm462_vm1, %v419_v60, %v461_v61 }
  0xce   : > { %v467_v0 = vrot.slane %v464_v63, 6 }
  0xd0   : > { %v469_v2 = vsel %vm468_vm2, %v463_v1, %v467_v0 }
  0xd1   : > { %471 = vst [vmem:[%s247_s17] sm:$0xf] %v469_v2 }
  0xd2 PF: > { %s17_s15 = sadd.s32 1, %s762_s15  }
  0xd3   : > { %p14_p8 = scmp.ge.s32.totalorder %s17_s15, 4  }
  0xd5   :  { %16 = sbr.rel (!%p14_p8) target bundleno = 2 (0x2), region = 83 }
  0xda   :  { %512 = vsyncpa [#allocation3], 1 }
  0xdb   :  { %514 = vsyncpa [#allocation3 + $0x1], 1 }
  0xdc   :  { %515 = vsyncpa [#allocation5], 1 }

// kernel: up_transition_forward.7
= control target key start
LH: loop header
LB: loop body
LE: loop exit
PB: predicated region body
PF: predicated region fallthrough
CT: control target
= control target key end

     0   :  { %s1217_s24 = smov 0   ;;  %s1684_s0 = inlined_call_operand.vmem [shape: bf16[512,128], index: 0, kind: input, shape index: {}]   ;;  %s1685_s1 = inlined_call_operand.vmem [shape: f32[1,128], index: 1, kind: input, shape index: {}]   ;;  %s1686_s2 = inlined_call_operand.vmem [shape: f32[1,128], index: 2, kind: input, shape index: {}]   ;;  %s1687_s3 = inlined_call_operand.vmem [shape: bf16[512,128], index: 3, kind: input, shape index: {}]   ;;  %s1688_s4 = inlined_call_operand.vmem [shape: f32[1,128], index: 4, kind: input, shape index: {}]   ;;  %s1689_s5 = inlined_call_operand.vmem [shape: f32[1,128], index: 5, kind: input, shape index: {}]   ;;  %s1690_s6 = inlined_call_operand.vmem [shape: f32[1,128], index: 6, kind: input, shape index: {}]   ;;  %s1691_s7 = inlined_call_operand.vmem [shape: bf16[512,128], index: 7, kind: output, shape index: {}]  }
   0x1 LB: > { %s873_s25 = sadd.s32 4294967295, %s1174_s24   ;;  %p877_p0 = scmp.ge.s32.totalorder %s1174_s24, 1  ;;  %s1174_s24 = sphi %s1217_s24, %s17_s24  }
   0x2   : > { %p249_p1 = scmp.lt.s32.totalorder %s1174_s24, 5 }
   0x4   : > { %p250_p2 = pnand %p877_p0, %p249_p1 }
   0x5   : > { %s878_s26 = sshll.u32 (!%p250_p2), %s873_s25, 4 }
   0x6   : > { %253 = sbr.rel (%p250_p2) target bundleno = 140 (0x8c), region = 48  ;;  %p287_p3 = scmp.lt.s32.totalorder (!%p250_p2), %s878_s26, 63 }
   0xb   : > { %s1695_s26 = smov (!%p287_p3, %s878_s26), 63  ;;  %v544_v0 = vld [vmem:[%s1690_s6] sm:$0x1]  ;;  %v1176_v13 = vmov 0  }
   0xc   : > { %s1228_s29 = sshll.u32 %s1695_s26, 2  ;;  %v1245_v1 = vld [vmem:[%s1685_s1] ss:$0 sm:$0xff]  ;;  %vm545_vm0 = vcmp.gt.f32.partialorder %v544_v0, 0.5 }
   0xd   : > { %s1234_s9 = scalar_lea.vmem %s1684_s0, %s1228_s29  ;;  %s1240_s12 = scalar_lea.vmem %s1687_s3, %s1228_s29  ;;  %v1250_v2 = vld [vmem:[%s1688_s4] ss:$0 sm:$0xff]  ;;  %v642_v14 = vsel %vm545_vm0, 1, %v1176_v13 }
   0xe   : > { %v935_v3 = vld [vmem:[%s1234_s9] sm:$0xff]   ;;  %v1038_v5 = vld [vmem:[%s1234_s9 + $0x8] sm:$0xff]   ;;  %v643_v38 = vperm.slane %v642_v14, 0  ;;  %v1039_v41 = vld [vmem:[%s1234_s9 + $0x10] sm:$0xff]   ;;  %s1434_s23 = scalar_lea.vmem %s1691_s7, %s1228_s29 }
   0xf   : > { %v967_v4 = vld [vmem:[%s1240_s12] sm:$0xff]   ;;  %v936_v6 = vunpack.c.l.bf16 %v935_v3  ;;  %v937_v7 = vunpack.c.h.bf16 %v935_v3  ;;  %v1045_v12 = vld [vmem:[%s1240_s12 + $0x8] sm:$0xff]   ;;  %v940_v15 = vunpack.c.l.bf16 %v1038_v5  ;;  %v941_v16 = vunpack.c.h.bf16 %v1038_v5  ;;  %v1046_v48 = vld [vmem:[%s1240_s12 + $0x10] sm:$0xff]  }
  0x10   : > { %v1258_v8 = vld [vmem:[%s1686_s2] ss:$0 sm:$0xff]  ;;  %v968_v9 = vunpack.c.l.bf16 %v967_v4  ;;  %v969_v10 = vunpack.c.h.bf16 %v967_v4  ;;  %v972_v17 = vunpack.c.l.bf16 %v1045_v12  ;;  %v973_v24 = vunpack.c.h.bf16 %v1045_v12  ;;  %v1316_v55 = vld [vmem:[%s1234_s9 + $0x18] sm:$0xff]  }
  0x11   : > { %v1263_v11 = vld [vmem:[%s1689_s5] ss:$0 sm:$0xff]  ;;  %v340_v18 = vmul.f32 %v1245_v1, %v936_v6  ;;  %v341_v19 = vmul.f32 %v1245_v1, %v937_v7  ;;  %v342_v22 = vmul.f32 %v1245_v1, %v940_v15  ;;  %v343_v23 = vmul.f32 %v1245_v1, %v941_v16 }
  0x12   : > { %v508_v20 = vmul.f32 %v1250_v2, %v968_v9  ;;  %v509_v21 = vmul.f32 %v1250_v2, %v969_v10  ;;  %v510_v25 = vmul.f32 %v1250_v2, %v972_v17  ;;  %v511_v34 = vmul.f32 %v1250_v2, %v973_v24 }
  0x13   : > { %v1274_v26 = vadd.f32 %v1258_v8, %v340_v18  ;;  %v1277_v27 = vadd.f32 %v1258_v8, %v341_v19  ;;  %v1286_v30 = vadd.f32 %v1258_v8, %v342_v22  ;;  %v1289_v31 = vadd.f32 %v1258_v8, %v343_v23 }
  0x14   : > { %v1280_v28 = vadd.f32 %v1263_v11, %v508_v20  ;;  %v1283_v29 = vadd.f32 %v1263_v11, %v509_v21  ;;  %v1295_v35 = vadd.f32 %v1263_v11, %v510_v25  ;;  %v1305_v46 = vadd.f32 %v1263_v11, %v511_v34 }
  0x15   : > { %v392_v32 = vmin.f32 %v1274_v26, 0.0  ;;  %v393_v33 = vmin.f32 %v1277_v27, 0.0  ;;  %vm376_vm1 = vcmp.gt.f32.partialorder %v1274_v26, 0.0  ;;  %v394_v44 = vmin.f32 %v1286_v30, 0.0 }
  0x16   : > { %v562_v36 = vmin.f32 %v1280_v28, 0.0  ;;  %v563_v37 = vmin.f32 %v1283_v29, 0.0  ;;  %v395_v45 = vmin.f32 %v1289_v31, 0.0  ;;  %vm377_vm2 = vcmp.gt.f32.partialorder %v1277_v27, 0.0 }
  0x17   : > { %v408_v39 = vmul.f32 1.442695, %v392_v32  ;;  %v410_v40 = vmul.f32 1.442695, %v393_v33  ;;  %v564_v47 = vmin.f32 %v1295_v35, 0.0  ;;  %vm1309_vm3 = vcmp.eq.s32.totalorder %v643_v38, 1 }
  0x18   : > { %v578_v42 = vmul.f32 1.442695, %v562_v36  ;;  %v580_v43 = vmul.f32 1.442695, %v563_v37  ;;  %v412_v50 = vmul.f32 1.442695, %v394_v44  ;;  %v944_v52 = vunpack.c.l.bf16 %v1039_v41 }
  0x19   : > { %1072 = vpow2.f32 %v408_v39  ;;  %v414_v51 = vmul.f32 1.442695, %v395_v45  ;;  %vm546_vm4 = vcmp.gt.f32.partialorder %v1280_v28, 0.0  ;;  %v565_v53 = vmin.f32 %v1305_v46, 0.0 }
  0x1a   : > { %1074 = vpow2.f32 %v410_v40  ;;  %v582_v54 = vmul.f32 1.442695, %v564_v47  ;;  %v945_v56 = vunpack.c.h.bf16 %v1039_v41  ;;  %v344_v57 = vmul.f32 %v1245_v1, %v944_v52 }
  0x1b   : > { %1076 = vpow2.f32 %v578_v42  ;;  %v976_v58 = vunpack.c.l.bf16 %v1046_v48  ;;  %vm547_vm5 = vcmp.gt.f32.partialorder %v1283_v29, 0.0  ;;  %v584_v59 = vmul.f32 1.442695, %v565_v53 }
  0x1c   : > { %1078 = vpow2.f32 %v580_v43  ;;  %v977_v60 = vunpack.c.h.bf16 %v1046_v48  ;;  %v345_v61 = vmul.f32 %v1245_v1, %v945_v56  ;;  %v1322_v62 = vadd.f32 %v1258_v8, %v344_v57 }
  0x1d   : > { %1080 = vpow2.f32 %v412_v50  ;;  %v948_v63 = vunpack.c.l.bf16 %v1316_v55  ;;  %vm378_vm6 = vcmp.gt.f32.partialorder %v1286_v30, 0.0  ;;  %vm379_vm7 = vcmp.gt.f32.partialorder %v1289_v31, 0.0 }
  0x1e   : > { %1082 = vpow2.f32 %v414_v51  ;;  %v512_v3 = vmul.f32 %v1250_v2, %v976_v58  ;;  %vm548_vm8 = vcmp.gt.f32.partialorder %v1295_v35, 0.0  ;;  %v1330_v6 = vadd.f32 %v1258_v8, %v345_v61  ;;  %v1047_v61 = vld [vmem:[%s1240_s12 + $0x18] sm:$0xff]  }
  0x1f   : > { %v1073_v0 = vpop.eup %1072  ;;  %1084 = vpow2.f32 %v582_v54  ;;  %vm549_vm9 = vcmp.gt.f32.partialorder %v1305_v46, 0.0  ;;  %v396_v10 = vmin.f32 %v1322_v62, 0.0  ;;  %v513_v12 = vmul.f32 %v1250_v2, %v977_v60 }
  0x20   : > { %v1075_v4 = vpop.eup %1074  ;;  %v884_v5 = vadd.f32 -1.0, %v1073_v0  ;;  %1086 = vpow2.f32 %v584_v59  ;;  %v397_v15 = vmin.f32 %v1330_v6, 0.0  ;;  %v949_v16 = vunpack.c.h.bf16 %v1316_v55 }
  0x21   : > { %v1077_v7 = vpop.eup %1076  ;;  %v885_v9 = vadd.f32 -1.0, %v1075_v4  ;;  %v346_v17 = vmul.f32 %v1245_v1, %v948_v63  ;;  %v416_v21 = vmul.f32 1.442695, %v396_v10  ;;  %v1342_v22 = vadd.f32 %v1263_v11, %v512_v3 }
  0x22   : > { %v1079_v13 = vpop.eup %1078  ;;  %v900_v14 = vadd.f32 -1.0, %v1077_v7  ;;  %v456_v19 = vsel %vm376_vm1, %v1274_v26, %v884_v5  ;;  %v418_v33 = vmul.f32 1.442695, %v397_v15  ;;  %v1362_v41 = vadd.f32 %v1263_v11, %v513_v12  ;;  %v1041_v12 = vld [vmem:[%s1234_s9 + $0x20] sm:$0xff]  }
  0x23   : > { %v1081_v18 = vpop.eup %1080  ;;  %v901_v20 = vadd.f32 -1.0, %v1079_v13  ;;  %v457_v24 = vsel %vm377_vm2, %v1277_v27, %v885_v9  ;;  %1088 = vpow2.f32 %v416_v21  ;;  %v566_v47 = vmin.f32 %v1342_v22, 0.0 }
  0x24   : > { %v1083_v23 = vpop.eup %1082  ;;  %v626_v25 = vsel %vm546_vm4, %v1280_v28, %v900_v14  ;;  %v886_v32 = vadd.f32 -1.0, %v1081_v18  ;;  %1090 = vpow2.f32 %v418_v33  ;;  %vm380_vm10 = vcmp.gt.f32.partialorder %v1322_v62, 0.0 }
  0x25   : > { %v1085_v34 = vpop.eup %1084  ;;  %v627_v26 = vsel %vm547_vm5, %v1283_v29, %v901_v20  ;;  %v645_v36 = vsel %vm1309_vm3, %v626_v25, %v1280_v28  ;;  %v887_v37 = vadd.f32 -1.0, %v1083_v23  ;;  %v567_v53 = vmin.f32 %v1362_v41, 0.0 }
  0x26   : > { %v1087_v38 = vpop.eup %1086  ;;  %v646_v27 = vsel %vm1309_vm3, %v627_v26, %v1283_v29  ;;  %v1359_v39 = vadd.f32 %v645_v36, %v456_v19  ;;  %v902_v40 = vadd.f32 -1.0, %v1085_v34  ;;  %v458_v43 = vsel %vm378_vm6, %v1286_v30, %v886_v32 }
  0x27   : > { %v1364_v42 = vadd.f32 %v646_v27, %v457_v24  ;;  %v903_v28 = vadd.f32 -1.0, %v1087_v38  ;;  %v459_v29 = vsel %vm379_vm7, %v1289_v31, %v887_v37  ;;  %v586_v57 = vmul.f32 1.442695, %v566_v47 }
  0x28   : > { %v693_v44 = vmin.f32 %v1359_v39, 0.0  ;;  %v628_v45 = vsel %vm548_vm8, %v1295_v35, %v902_v40  ;;  %v347_v58 = vmul.f32 %v1245_v1, %v949_v16  ;;  %vm381_vm11 = vcmp.gt.f32.partialorder %v1330_v6, 0.0 }
  0x29   : > { %v694_v48 = vmin.f32 %v1364_v42, 0.0  ;;  %v629_v30 = vsel %vm549_vm9, %v1305_v46, %v903_v28  ;;  %v647_v50 = vsel %vm1309_vm3, %v628_v45, %v1295_v35  ;;  %v1089_v54 = vpop.eup %1088  ;;  %vm550_vm12 = vcmp.gt.f32.partialorder %v1342_v22, 0.0 }
  0x2a   : > { %v709_v51 = vmul.f32 1.442695, %v693_v44  ;;  %v648_v31 = vsel %vm1309_vm3, %v629_v30, %v1305_v46  ;;  %v1388_v52 = vadd.f32 %v647_v50, %v458_v43  ;;  %v1091_v46 = vpop.eup %1090  ;;  %vm551_vm13 = vcmp.gt.f32.partialorder %v1362_v41, 0.0 }
  0x2b   : > { %v711_v55 = vmul.f32 1.442695, %v694_v48  ;;  %v1391_v56 = vadd.f32 %v648_v31, %v459_v29  ;;  %v588_v60 = vmul.f32 1.442695, %v567_v53  ;;  %vm677_vm14 = vcmp.gt.f32.partialorder %v1359_v39, 0.0  ;;  %v1048_v53 = vld [vmem:[%s1240_s12 + $0x20] sm:$0xff]  }
  0x2c   : > { %1092 = vpow2.f32 %v709_v51  ;;  %v695_v35 = vmin.f32 %v1388_v52, 0.0  ;;  %v888_v0 = vadd.f32 -1.0, %v1089_v54  ;;  %v1402_v4 = vadd.f32 %v1258_v8, %v346_v17 }
  0x2d   : > { %1094 = vpow2.f32 %v711_v55  ;;  %v696_v59 = vmin.f32 %v1391_v56, 0.0  ;;  %v1405_v5 = vadd.f32 %v1258_v8, %v347_v58  ;;  %v889_v7 = vadd.f32 -1.0, %v1091_v46 }
  0x2e   : > { %v713_v63 = vmul.f32 1.442695, %v695_v35  ;;  %1096 = vpow2.f32 %v586_v57  ;;  %v980_v9 = vunpack.c.l.bf16 %v1047_v61  ;;  %v981_v10 = vunpack.c.h.bf16 %v1047_v61 }
  0x2f   : > { %v715_v3 = vmul.f32 1.442695, %v696_v59  ;;  %1098 = vpow2.f32 %v588_v60  ;;  %vm678_vm15 = vcmp.gt.f32.partialorder %v1364_v42, 0.0  ;;  %vm679_vm0 = vcmp.gt.f32.partialorder %v1388_v52, 0.0 }
  0x30   : > { %1100 = vpow2.f32 %v713_v63  ;;  %v398_v13 = vmin.f32 %v1402_v4, 0.0  ;;  %vm680_vm1 = vcmp.gt.f32.partialorder %v1391_v56, 0.0  ;;  %v399_v15 = vmin.f32 %v1405_v5, 0.0 }
  0x31   : > { %1102 = vpow2.f32 %v715_v3  ;;  %v514_v16 = vmul.f32 %v1250_v2, %v980_v9  ;;  %v515_v17 = vmul.f32 %v1250_v2, %v981_v10  ;;  %v460_v20 = vsel %vm380_vm10, %v1322_v62, %v888_v0  ;;  %v1042_v9 = vld [vmem:[%s1234_s9 + $0x28] sm:$0xff]  }
  0x32   : > { %v1093_v14 = vpop.eup %1092  ;;  %v420_v21 = vmul.f32 1.442695, %v398_v13  ;;  %v952_v23 = vunpack.c.l.bf16 %v1041_v12  ;;  %v461_v32 = vsel %vm381_vm11, %v1330_v6, %v889_v7  ;;  %v422_v33 = vmul.f32 1.442695, %v399_v15 }
  0x33   : > { %v1095_v18 = vpop.eup %1094  ;;  %v916_v19 = vadd.f32 -1.0, %v1093_v14  ;;  %v1422_v34 = vadd.f32 %v1263_v11, %v514_v16  ;;  %v1428_v62 = vadd.f32 %v1263_v11, %v515_v17  ;;  %vm382_vm2 = vcmp.gt.f32.partialorder %v1402_v4, 0.0 }
  0x34   : > { %v1097_v24 = vpop.eup %1096  ;;  %v917_v25 = vadd.f32 -1.0, %v1095_v18  ;;  %1104 = vpow2.f32 %v420_v21  ;;  %v348_v29 = vmul.f32 %v1245_v1, %v952_v23  ;;  %vm383_vm4 = vcmp.gt.f32.partialorder %v1405_v5, 0.0 }
  0x35   : > { %v1099_v26 = vpop.eup %1098  ;;  %v757_v36 = vsel %vm677_vm14, %v1359_v39, %v916_v19  ;;  %v904_v37 = vadd.f32 -1.0, %v1097_v24  ;;  %1106 = vpow2.f32 %v422_v33  ;;  %v953_v39 = vunpack.c.h.bf16 %v1041_v12  ;;  %v1049_v24 = vld [vmem:[%s1240_s12 + $0x28] sm:$0xff]  }
  0x36   : > { %v1101_v38 = vpop.eup %1100  ;;  %v758_v6 = vsel %vm678_vm15, %v1364_v42, %v917_v25  ;;  %v905_v27 = vadd.f32 -1.0, %v1099_v26  ;;  %v568_v48 = vmin.f32 %v1422_v34, 0.0  ;;  %v569_v31 = vmin.f32 %v1428_v62, 0.0 }
  0x37   : > { %v1103_v40 = vpop.eup %1102  ;;  %v1001_v43 = vpack.c.bf16 %v758_v6, %v757_v36  ;;  %v918_v28 = vadd.f32 -1.0, %v1101_v38  ;;  %v630_v44 = vsel %vm550_vm12, %v1342_v22, %v904_v37  ;;  %v349_v57 = vmul.f32 %v1245_v1, %v953_v39 }
  0x38   : > { %v919_v45 = vadd.f32 -1.0, %v1103_v40  ;;  %v631_v47 = vsel %vm551_vm13, %v1362_v41, %v905_v27  ;;  %v649_v42 = vsel %vm1309_vm3, %v630_v44, %v1342_v22  ;;  %v590_v55 = vmul.f32 1.442695, %v568_v48 }
  0x39   : > { %1002 = vst [vmem:[%s1434_s23] sm:$0xff] %v1001_v43   ;;  %v759_v30 = vsel %vm679_vm0, %v1388_v52, %v918_v28  ;;  %v650_v50 = vsel %vm1309_vm3, %v631_v47, %v1362_v41  ;;  %v1457_v51 = vadd.f32 %v649_v42, %v460_v20  ;;  %v592_v41 = vmul.f32 1.442695, %v569_v31 }
  0x3a   : > { %v760_v22 = vsel %vm680_vm1, %v1391_v56, %v919_v45  ;;  %v1464_v54 = vadd.f32 %v650_v50, %v461_v32  ;;  %v1105_v52 = vpop.eup %1104  ;;  %1108 = vpow2.f32 %v590_v55  ;;  %v984_v56 = vunpack.c.l.bf16 %v1048_v53 }
  0x3b   : > { %v1006_v58 = vpack.c.bf16 %v760_v22, %v759_v30  ;;  %v697_v35 = vmin.f32 %v1457_v51, 0.0  ;;  %v1107_v46 = vpop.eup %1106  ;;  %vm552_vm5 = vcmp.gt.f32.partialorder %v1422_v34, 0.0  ;;  %1110 = vpow2.f32 %v592_v41 }
  0x3c   : > { %v698_v59 = vmin.f32 %v1464_v54, 0.0  ;;  %v1474_v61 = vadd.f32 %v1258_v8, %v348_v29  ;;  %v890_v0 = vadd.f32 -1.0, %v1105_v52  ;;  %v1477_v3 = vadd.f32 %v1258_v8, %v349_v57 }
  0x3d   : > { %1052 = vst [vmem:[%s1434_s23 + $0x8] sm:$0xff] %v1006_v58   ;;  %v717_v60 = vmul.f32 1.442695, %v697_v35  ;;  %v985_v7 = vunpack.c.h.bf16 %v1048_v53  ;;  %v891_v10 = vadd.f32 -1.0, %v1107_v46  ;;  %vm553_vm6 = vcmp.gt.f32.partialorder %v1428_v62, 0.0 }
  0x3e   : > { %v719_v63 = vmul.f32 1.442695, %v698_v59  ;;  %v400_v12 = vmin.f32 %v1474_v61, 0.0  ;;  %vm681_vm7 = vcmp.gt.f32.partialorder %v1457_v51, 0.0  ;;  %v401_v13 = vmin.f32 %v1477_v3, 0.0 }
  0x3f   : > { %1112 = vpow2.f32 %v717_v60  ;;  %v516_v14 = vmul.f32 %v1250_v2, %v984_v56  ;;  %v517_v16 = vmul.f32 %v1250_v2, %v985_v7  ;;  %v956_v17 = vunpack.c.l.bf16 %v1042_v9  ;;  %v1043_v56 = vld [vmem:[%s1234_s9 + $0x30] sm:$0xff]  }
  0x40   : > { %1114 = vpow2.f32 %v719_v63  ;;  %v424_v15 = vmul.f32 1.442695, %v400_v12  ;;  %v957_v18 = vunpack.c.h.bf16 %v1042_v9  ;;  %v1109_v19 = vpop.eup %1108  ;;  %vm682_vm8 = vcmp.gt.f32.partialorder %v1464_v54, 0.0 }
  0x41   : > { %v462_v20 = vsel %vm382_vm2, %v1402_v4, %v890_v0  ;;  %v426_v21 = vmul.f32 1.442695, %v401_v13  ;;  %v1491_v23 = vadd.f32 %v1263_v11, %v516_v14  ;;  %v1111_v25 = vpop.eup %1110  ;;  %v463_v32 = vsel %vm383_vm4, %v1405_v5, %v891_v10 }
  0x42   : > { %v906_v33 = vadd.f32 -1.0, %v1109_v19  ;;  %1116 = vpow2.f32 %v424_v15  ;;  %v1498_v26 = vadd.f32 %v1263_v11, %v517_v16  ;;  %v907_v36 = vadd.f32 -1.0, %v1111_v25 }
  0x43   : > { %1118 = vpow2.f32 %v426_v21  ;;  %v570_v37 = vmin.f32 %v1491_v23, 0.0  ;;  %v350_v4 = vmul.f32 %v1245_v1, %v956_v17  ;;  %v351_v5 = vmul.f32 %v1245_v1, %v957_v18 }
  0x44   : > { %v632_v6 = vsel %vm552_vm5, %v1422_v34, %v906_v33  ;;  %v571_v27 = vmin.f32 %v1498_v26, 0.0  ;;  %v988_v39 = vunpack.c.l.bf16 %v1049_v24  ;;  %v633_v28 = vsel %vm553_vm6, %v1428_v62, %v907_v36 }
  0x45   : > { %v1113_v38 = vpop.eup %1112  ;;  %v651_v44 = vsel %vm1309_vm3, %v632_v6, %v1422_v34  ;;  %v594_v29 = vmul.f32 1.442695, %v570_v37  ;;  %v652_v47 = vsel %vm1309_vm3, %v633_v28, %v1428_v62  ;;  %v1524_v31 = vadd.f32 %v1258_v8, %v350_v4 }
  0x46   : > { %v1115_v40 = vpop.eup %1114  ;;  %v920_v43 = vadd.f32 -1.0, %v1113_v38  ;;  %v1516_v42 = vadd.f32 %v651_v44, %v462_v20  ;;  %v596_v48 = vmul.f32 1.442695, %v571_v27  ;;  %v1521_v50 = vadd.f32 %v652_v47, %v463_v32 }
  0x47   : > { %v921_v45 = vadd.f32 -1.0, %v1115_v40  ;;  %1120 = vpow2.f32 %v594_v29  ;;  %vm384_vm9 = vcmp.gt.f32.partialorder %v1474_v61, 0.0  ;;  %v989_v52 = vunpack.c.h.bf16 %v1049_v24 }
  0x48   : > { %v761_v30 = vsel %vm681_vm7, %v1457_v51, %v920_v43  ;;  %v1117_v34 = vpop.eup %1116  ;;  %v699_v62 = vmin.f32 %v1516_v42, 0.0  ;;  %1122 = vpow2.f32 %v596_v48  ;;  %v700_v55 = vmin.f32 %v1521_v50, 0.0  ;;  %v1050_v48 = vld [vmem:[%s1240_s12 + $0x30] sm:$0xff]  }
  0x49   : > { %v762_v53 = vsel %vm682_vm8, %v1464_v54, %v921_v45  ;;  %v1119_v22 = vpop.eup %1118  ;;  %v892_v57 = vadd.f32 -1.0, %v1117_v34  ;;  %vm385_vm10 = vcmp.gt.f32.partialorder %v1477_v3, 0.0  ;;  %vm554_vm11 = vcmp.gt.f32.partialorder %v1491_v23, 0.0 }
  0x4a   : > { %v1011_v51 = vpack.c.bf16 %v762_v53, %v761_v30  ;;  %v721_v58 = vmul.f32 1.442695, %v699_v62  ;;  %v1535_v35 = vadd.f32 %v1258_v8, %v351_v5  ;;  %v723_v54 = vmul.f32 1.442695, %v700_v55 }
  0x4b   : > { %v893_v41 = vadd.f32 -1.0, %v1119_v22  ;;  %v402_v46 = vmin.f32 %v1524_v31, 0.0  ;;  %v518_v59 = vmul.f32 %v1250_v2, %v988_v39  ;;  %v464_v60 = vsel %vm384_vm9, %v1474_v61, %v892_v57 }
  0x4c   : > { %1053 = vst [vmem:[%s1434_s23 + $0x10] sm:$0xff] %v1011_v51   ;;  %1124 = vpow2.f32 %v721_v58  ;;  %vm555_vm12 = vcmp.gt.f32.partialorder %v1498_v26, 0.0  ;;  %v403_v63 = vmin.f32 %v1535_v35, 0.0  ;;  %v519_v9 = vmul.f32 %v1250_v2, %v989_v52 }
  0x4d   : > { %v1121_v0 = vpop.eup %1120  ;;  %1126 = vpow2.f32 %v723_v54  ;;  %v428_v7 = vmul.f32 1.442695, %v402_v46  ;;  %v1548_v10 = vadd.f32 %v1263_v11, %v518_v59  ;;  %v960_v15 = vunpack.c.l.bf16 %v1043_v56 }
  0x4e   : > { %v1123_v12 = vpop.eup %1122  ;;  %v908_v13 = vadd.f32 -1.0, %v1121_v0  ;;  %v430_v14 = vmul.f32 1.442695, %v403_v63  ;;  %v961_v16 = vunpack.c.h.bf16 %v1043_v56  ;;  %v465_v61 = vsel %vm385_vm10, %v1477_v3, %v893_v41 }
  0x4f   : > { %v909_v17 = vadd.f32 -1.0, %v1123_v12  ;;  %1128 = vpow2.f32 %v428_v7  ;;  %v1554_v18 = vadd.f32 %v1263_v11, %v519_v9  ;;  %v572_v20 = vmin.f32 %v1548_v10, 0.0 }
  0x50   : > { %v634_v19 = vsel %vm554_vm11, %v1491_v23, %v908_v13  ;;  %1130 = vpow2.f32 %v430_v14  ;;  %v352_v21 = vmul.f32 %v1245_v1, %v960_v15  ;;  %vm683_vm13 = vcmp.gt.f32.partialorder %v1516_v42, 0.0 }
  0x51   : > { %v635_v3 = vsel %vm555_vm12, %v1498_v26, %v909_v17  ;;  %v653_v24 = vsel %vm1309_vm3, %v634_v19, %v1491_v23  ;;  %v573_v25 = vmin.f32 %v1554_v18, 0.0  ;;  %v598_v37 = vmul.f32 1.442695, %v572_v20 }
  0x52   : > { %v1125_v32 = vpop.eup %1124  ;;  %v654_v33 = vsel %vm1309_vm3, %v635_v3, %v1498_v26  ;;  %v1572_v36 = vadd.f32 %v653_v24, %v464_v60  ;;  %v353_v4 = vmul.f32 %v1245_v1, %v961_v16  ;;  %vm684_vm14 = vcmp.gt.f32.partialorder %v1521_v50, 0.0 }
  0x53   : > { %v1127_v38 = vpop.eup %1126  ;;  %v922_v6 = vadd.f32 -1.0, %v1125_v32  ;;  %v1576_v27 = vadd.f32 %v654_v33, %v465_v61  ;;  %v600_v23 = vmul.f32 1.442695, %v573_v25  ;;  %1132 = vpow2.f32 %v598_v37  ;;  %v1051_v25 = vld [vmem:[%s1240_s12 + $0x38] sm:$0xff]  }
  0x54   : > { %v923_v5 = vadd.f32 -1.0, %v1127_v38  ;;  %v701_v39 = vmin.f32 %v1572_v36, 0.0  ;;  %v1580_v26 = vadd.f32 %v1258_v8, %v352_v21  ;;  %vm386_vm15 = vcmp.gt.f32.partialorder %v1524_v31, 0.0 }
  0x55   : > { %v1129_v40 = vpop.eup %1128  ;;  %v763_v43 = vsel %vm683_vm13, %v1516_v42, %v922_v6  ;;  %v702_v28 = vmin.f32 %v1576_v27, 0.0  ;;  %1134 = vpow2.f32 %v600_v23  ;;  %v1589_v47 = vadd.f32 %v1258_v8, %v353_v4  ;;  %v1044_v42 = vld [vmem:[%s1234_s9 + $0x38] sm:$0xff]  }
  0x56   : > { %v1131_v44 = vpop.eup %1130  ;;  %v764_v29 = vsel %vm684_vm14, %v1521_v50, %v923_v5  ;;  %v725_v45 = vmul.f32 1.442695, %v701_v39  ;;  %vm387_vm0 = vcmp.gt.f32.partialorder %v1535_v35, 0.0  ;;  %vm556_vm1 = vcmp.gt.f32.partialorder %v1548_v10, 0.0 }
  0x57   : > { %v1016_v30 = vpack.c.bf16 %v764_v29, %v763_v43  ;;  %v727_v34 = vmul.f32 1.442695, %v702_v28  ;;  %v894_v53 = vadd.f32 -1.0, %v1129_v40  ;;  %vm557_vm2 = vcmp.gt.f32.partialorder %v1554_v18, 0.0 }
  0x58   : > { %1136 = vpow2.f32 %v725_v45  ;;  %v404_v50 = vmin.f32 %v1580_v26, 0.0  ;;  %v895_v62 = vadd.f32 -1.0, %v1131_v44  ;;  %v405_v22 = vmin.f32 %v1589_v47, 0.0 }
  0x59   : > { %1054 = vst [vmem:[%s1434_s23 + $0x18] sm:$0xff] %v1016_v30   ;;  %1138 = vpow2.f32 %v727_v34  ;;  %v992_v51 = vunpack.c.l.bf16 %v1050_v48  ;;  %v1133_v55 = vpop.eup %1132  ;;  %vm685_vm4 = vcmp.gt.f32.partialorder %v1572_v36, 0.0  ;;  %v993_v52 = vunpack.c.h.bf16 %v1050_v48 }
  0x5a   : > { %v432_v57 = vmul.f32 1.442695, %v404_v50  ;;  %v964_v58 = vunpack.c.l.bf16 %v1044_v42  ;;  %vm686_vm5 = vcmp.gt.f32.partialorder %v1576_v27, 0.0  ;;  %v910_v41 = vadd.f32 -1.0, %v1133_v55 }
  0x5b   : > { %v1135_v54 = vpop.eup %1134  ;;  %v434_v46 = vmul.f32 1.442695, %v405_v22  ;;  %v520_v59 = vmul.f32 %v1250_v2, %v992_v51  ;;  %v466_v56 = vsel %vm386_vm15, %v1524_v31, %v894_v53  ;;  %v521_v63 = vmul.f32 %v1250_v2, %v993_v52 }
  0x5c   : > { %v911_v60 = vadd.f32 -1.0, %v1135_v54  ;;  %v965_v0 = vunpack.c.h.bf16 %v1044_v42  ;;  %v467_v7 = vsel %vm387_vm0, %v1535_v35, %v895_v62  ;;  %v636_v9 = vsel %vm556_vm1, %v1548_v10, %v910_v41 }
  0x5d   : > { %v1613_v12 = vadd.f32 %v1263_v11, %v520_v59  ;;  %v354_v13 = vmul.f32 %v1245_v1, %v964_v58  ;;  %v655_v15 = vsel %vm1309_vm3, %v636_v9, %v1548_v10  ;;  %1140 = vpow2.f32 %v432_v57 }
  0x5e   : > { %v1137_v14 = vpop.eup %1136  ;;  %v637_v31 = vsel %vm557_vm2, %v1554_v18, %v911_v60  ;;  %v1623_v35 = vadd.f32 %v1263_v11, %v521_v63  ;;  %v671_v19 = vadd.f32 %v655_v15, %v466_v56  ;;  %1142 = vpow2.f32 %v434_v46 }
  0x5f   : > { %v1139_v16 = vpop.eup %1138  ;;  %v924_v61 = vadd.f32 -1.0, %v1137_v14  ;;  %v656_v17 = vsel %vm1309_vm3, %v637_v31, %v1554_v18  ;;  %v574_v3 = vmin.f32 %v1613_v12, 0.0  ;;  %v355_v24 = vmul.f32 %v1245_v1, %v965_v0 }
  0x60   : > { %v925_v20 = vadd.f32 -1.0, %v1139_v16  ;;  %v672_v21 = vadd.f32 %v656_v17, %v467_v7  ;;  %v703_v32 = vmin.f32 %v671_v19, 0.0  ;;  %v575_v33 = vmin.f32 %v1623_v35, 0.0 }
  0x61   : > { %v765_v10 = vsel %vm685_vm4, %v1572_v36, %v924_v61  ;;  %v1636_v37 = vadd.f32 %v1258_v8, %v354_v13  ;;  %v602_v38 = vmul.f32 1.442695, %v574_v3  ;;  %v996_v5 = vunpack.c.l.bf16 %v1051_v25 }
  0x62   : > { %v766_v18 = vsel %vm686_vm5, %v1576_v27, %v925_v20  ;;  %v704_v4 = vmin.f32 %v672_v21, 0.0  ;;  %v729_v1 = vmul.f32 1.442695, %v703_v32  ;;  %v604_v23 = vmul.f32 1.442695, %v575_v33 }
  0x63   : > { %v1021_v6 = vpack.c.bf16 %v766_v18, %v765_v10  ;;  %v1141_v39 = vpop.eup %1140  ;;  %1144 = vpow2.f32 %v602_v38  ;;  %v1642_v36 = vadd.f32 %v1258_v8, %v355_v24  ;;  %v406_v28 = vmin.f32 %v1636_v37, 0.0 }
  0x64   : > { %v731_v40 = vmul.f32 1.442695, %v704_v4  ;;  %v1143_v43 = vpop.eup %1142  ;;  %1146 = vpow2.f32 %v729_v1  ;;  %v997_v29 = vunpack.c.h.bf16 %v1051_v25  ;;  %v522_v45 = vmul.f32 %v1250_v2, %v996_v5 }
  0x65   : > { %1055 = vst [vmem:[%s1434_s23 + $0x20] sm:$0xff] %v1021_v6   ;;  %v407_v27 = vmin.f32 %v1642_v36, 0.0  ;;  %v436_v44 = vmul.f32 1.442695, %v406_v28  ;;  %v896_v48 = vadd.f32 -1.0, %v1141_v39  ;;  %vm388_vm6 = vcmp.gt.f32.partialorder %v1580_v26, 0.0 }
  0x66   : > { %1148 = vpow2.f32 %v731_v40  ;;  %v523_v8 = vmul.f32 %v1250_v2, %v997_v29  ;;  %v542_v34 = vadd.f32 %v1263_v11, %v522_v45  ;;  %vm687_vm7 = vcmp.gt.f32.partialorder %v671_v19, 0.0 }
  0x67   : > { %1150 = vpow2.f32 %v604_v23  ;;  %v438_v30 = vmul.f32 1.442695, %v407_v27  ;;  %vm389_vm8 = vcmp.gt.f32.partialorder %v1589_v47, 0.0  ;;  %v897_v53 = vadd.f32 -1.0, %v1143_v43 }
  0x68   : > { %vm558_vm9 = vcmp.gt.f32.partialorder %v1613_v12, 0.0  ;;  %1152 = vpow2.f32 %v436_v44  ;;  %v543_v22 = vadd.f32 %v1263_v11, %v523_v8  ;;  %v576_v51 = vmin.f32 %v542_v34, 0.0 }
  0x69   : > { %v1145_v42 = vpop.eup %1144  ;;  %vm688_vm10 = vcmp.gt.f32.partialorder %v672_v21, 0.0  ;;  %v468_v2 = vsel %vm388_vm6, %v1580_v26, %v896_v48  ;;  %vm559_vm11 = vcmp.gt.f32.partialorder %v1623_v35, 0.0  ;;  %1154 = vpow2.f32 %v438_v30 }
  0x6a   : > { %v1147_v50 = vpop.eup %1146  ;;  %v912_v62 = vadd.f32 -1.0, %v1145_v42  ;;  %v577_v41 = vmin.f32 %v543_v22, 0.0  ;;  %v606_v56 = vmul.f32 1.442695, %v576_v51  ;;  %v469_v26 = vsel %vm389_vm8, %v1589_v47, %v897_v53 }
  0x6b   : > { %v926_v57 = vadd.f32 -1.0, %v1147_v50  ;;  %vm390_vm12 = vcmp.gt.f32.partialorder %v1636_v37, 0.0  ;;  %vm560_vm13 = vcmp.gt.f32.partialorder %v542_v34, 0.0  ;;  %vm391_vm14 = vcmp.gt.f32.partialorder %v1642_v36, 0.0 }
  0x6c   : > { %v1149_v55 = vpop.eup %1148  ;;  %v638_v54 = vsel %vm558_vm9, %v1613_v12, %v912_v62  ;;  %v608_v0 = vmul.f32 1.442695, %v577_v41  ;;  %1156 = vpow2.f32 %v606_v56  ;;  %vm561_vm15 = vcmp.gt.f32.partialorder %v543_v22, 0.0 }
  0x6d   : > { %v1151_v52 = vpop.eup %1150  ;;  %v927_v58 = vadd.f32 -1.0, %v1149_v55  ;;  %v767_v46 = vsel %vm687_vm7, %v671_v19, %v926_v57  ;;  %v657_v59 = vsel %vm1309_vm3, %v638_v54, %v1613_v12 }
  0x6e   : > { %v913_v11 = vadd.f32 -1.0, %v1151_v52  ;;  %v673_v63 = vadd.f32 %v657_v59, %v468_v2  ;;  %v1153_v13 = vpop.eup %1152  ;;  %1158 = vpow2.f32 %v608_v0 }
  0x6f   : > { %v768_v60 = vsel %vm688_vm10, %v672_v21, %v927_v58  ;;  %v1155_v15 = vpop.eup %1154  ;;  %v898_v17 = vadd.f32 -1.0, %v1153_v13 }
  0x70   : > { %v1026_v7 = vpack.c.bf16 %v768_v60, %v767_v46  ;;  %v639_v9 = vsel %vm559_vm11, %v1623_v35, %v913_v11  ;;  %v705_v31 = vmin.f32 %v673_v63, 0.0  ;;  %v899_v20 = vadd.f32 -1.0, %v1155_v15 }
  0x71   : > { %v658_v14 = vsel %vm1309_vm3, %v639_v9, %v1623_v35  ;;  %v470_v35 = vsel %vm390_vm12, %v1636_v37, %v898_v17  ;;  %vm689_vm0 = vcmp.gt.f32.partialorder %v673_v63, 0.0 }
  0x72   : > { %1056 = vst [vmem:[%s1434_s23 + $0x28] sm:$0xff] %v1026_v7   ;;  %v674_v12 = vadd.f32 %v658_v14, %v469_v26  ;;  %v733_v16 = vmul.f32 1.442695, %v705_v31  ;;  %v1157_v47 = vpop.eup %1156  ;;  %v471_v10 = vsel %vm391_vm14, %v1642_v36, %v899_v20 }
  0x73   : > { %v914_v21 = vadd.f32 -1.0, %v1157_v47 }
  0x74   : > { %v706_v61 = vmin.f32 %v674_v12, 0.0  ;;  %1160 = vpow2.f32 %v733_v16  ;;  %v1159_v3 = vpop.eup %1158  ;;  %vm690_vm1 = vcmp.gt.f32.partialorder %v674_v12, 0.0 }
  0x75   : > { %v915_v24 = vadd.f32 -1.0, %v1159_v3  ;;  %v640_v25 = vsel %vm560_vm13, %v542_v34, %v914_v21 }
  0x76   : > { %v735_v19 = vmul.f32 1.442695, %v706_v61  ;;  %v659_v32 = vsel %vm1309_vm3, %v640_v25, %v542_v34 }
  0x77   : > { %v641_v18 = vsel %vm561_vm15, %v543_v22, %v915_v24  ;;  %v675_v4 = vadd.f32 %v659_v32, %v470_v35 }
  0x78   : > { %1162 = vpow2.f32 %v735_v19  ;;  %v660_v6 = vsel %vm1309_vm3, %v641_v18, %v543_v22 }
  0x79   : > { %v676_v1 = vadd.f32 %v660_v6, %v471_v10  ;;  %v707_v23 = vmin.f32 %v675_v4, 0.0  ;;  %vm691_vm2 = vcmp.gt.f32.partialorder %v675_v4, 0.0 }
  0x7a   : > { %v1161_v33 = vpop.eup %1160 }
  0x7b   : > { %v928_v38 = vadd.f32 -1.0, %v1161_v33  ;;  %v708_v40 = vmin.f32 %v676_v1, 0.0  ;;  %v737_v36 = vmul.f32 1.442695, %v707_v23  ;;  %vm692_vm3 = vcmp.gt.f32.partialorder %v676_v1, 0.0 }
  0x7d   : > { %v769_v39 = vsel %vm689_vm0, %v673_v63, %v928_v38  ;;  %1164 = vpow2.f32 %v737_v36  ;;  %v739_v28 = vmul.f32 1.442695, %v708_v40 }
  0x7e   : > { %v1163_v37 = vpop.eup %1162 }
  0x7f   : > { %v929_v5 = vadd.f32 -1.0, %v1163_v37  ;;  %1166 = vpow2.f32 %v739_v28 }
  0x81   : > { %v770_v43 = vsel %vm690_vm1, %v674_v12, %v929_v5 }
  0x82   : > { %v1031_v27 = vpack.c.bf16 %v770_v43, %v769_v39 }
  0x83   : > { %v1165_v44 = vpop.eup %1164 }
  0x84   : > { %1057 = vst [vmem:[%s1434_s23 + $0x30] sm:$0xff] %v1031_v27   ;;  %v930_v29 = vadd.f32 -1.0, %v1165_v44 }
  0x85   : > { %v1167_v49 = vpop.eup %1166 }
  0x86   : > { %v931_v45 = vadd.f32 -1.0, %v1167_v49  ;;  %v771_v48 = vsel %vm691_vm2, %v675_v4, %v930_v29 }
  0x88   : > { %v772_v30 = vsel %vm692_vm3, %v676_v1, %v931_v45 }
  0x89   : > { %v1036_v8 = vpack.c.bf16 %v772_v30, %v771_v48 }
  0x8b   : > { %1058 = vst [vmem:[%s1434_s23 + $0x38] sm:$0xff] %v1036_v8  }
  0x8c PF: > { %s17_s24 = sadd.s32 1, %s1174_s24  }
  0x8d   : > { %p14_p4 = scmp.ge.s32.totalorder %s17_s24, 6  }
  0x8f   :  { %16 = sbr.rel (!%p14_p4) target bundleno = 1 (0x1), region = 81 }

// kernel: up_transition_forward.5
= control target key start
LH: loop header
LB: loop body
LE: loop exit
PB: predicated region body
PF: predicated region fallthrough
CT: control target
= control target key end

     0   :  { %s6022_s24 = smov 0   ;;  %s6024_s25 = smov 0   ;;  %s8130_s0 = inlined_call_operand.vmem [shape: bf16[512,128], index: 0, kind: input, shape index: {}]   ;;  %s8131_s1 = inlined_call_operand.vmem [shape: bf16[5,640,128], index: 1, kind: input, shape index: {}]   ;;  %s8132_s2 = inlined_call_operand.vmem [shape: f32[1,128], index: 2, kind: input, shape index: {}]   ;;  %s8133_s3 = inlined_call_operand.vmem [shape: f32[1,128], index: 3, kind: input, shape index: {}]   ;;  %s8134_s4 = inlined_call_operand.vmem [shape: f32[1,128], index: 4, kind: input, shape index: {}]   ;;  %s8135_s5 = inlined_call_operand.vmem [shape: f32[1,128], index: 5, kind: input, shape index: {}]   ;;  %s8136_s6 = inlined_call_operand.vmem [shape: bf16[512,128], index: 6, kind: output, shape index: {0}]   ;;  %s8137_s7 = inlined_call_operand.vmem [shape: f32[8,2,128], index: 7, kind: output, shape index: {1}]  }
   0x1   :  { %s6026_s26 = smov 0   ;;  %s6028_s27 = smov 0  }
   0x2   :  { %s6030_s28 = smov 0  }
   0x3 LB: > { %s27_s29 = sadd.s32 1, %s5971_s26  ;;  %s30_s30 = sadd.s32 1, %s5975_s27  ;;  %s5979_s28 = sphi %s6030_s28, %s18_s28   ;;  %s5975_s27 = sphi %s6028_s27, %s8165_s27   ;;  %s5971_s26 = sphi %s6026_s26, %s8164_s26   ;;  %s5967_s25 = sphi %s6024_s25, %s8163_s25   ;;  %s5963_s24 = sphi %s6022_s24, %s8162_s24  }
   0x4   : > { %p28_p0 = scmp.ge.s32.totalorder %s27_s29, 4  ;;  %p4283_p1 = scmp.ge.s32.totalorder %s5979_s28, 1 }
   0x5   : > { %p261_p2 = scmp.lt.s32.totalorder %s5979_s28, 9 }
   0x6   : > { %s8167_s29 = smov (%p28_p0, %s27_s29), 0  ;;  %s8169_s30 = smov (!%p28_p0, %s30_s30), %s5975_s27 }
   0x7   : > { %p262_p3 = pnand %p4283_p1, %p261_p2  ;;  %p32_p4 = scmp.ge.s32.totalorder %s8169_s30, 2 }
   0x8   : > { %s4284_s8 = sshll.u32 (!%p262_p3), %s5967_s25, 5  ;;  %s4286_s9 = sshll.u32 (!%p262_p3), %s5967_s25, 2 }
   0x9   : > { %s8171_s30 = smov (%p32_p4, %s8169_s30), 0  ;;  %265 = sbr.rel (%p262_p3) target bundleno = 742 (0x2e6), region = 44 }
   0xa   : > { %p302_p5 = scmp.lt.s32.totalorder (!%p262_p3), %s4284_s8, 63  ;;  %s308_s10 = sadd.s32 (!%p262_p3), %s5963_s24, %s4286_s9 }
   0xb   : > { %s4287_s11 = sshll.u32 (!%p262_p3), %s308_s10, 3  ;;  %p319_p7 = scmp.lt.s32.totalorder (!%p262_p3), %s308_s10, 7 }
   0xc   : > { %p310_p6 = scmp.lt.s32.totalorder (!%p262_p3), %s4287_s11, 63  ;;  %p4291_p8 = scmp.ne.s32.totalorder (!%p262_p3), %s5963_s24, 0 }
   0xe   : > { %s8173_s8 = smov (!%p302_p5, %s4284_s8), 63  ;;  %s8175_s11 = smov (!%p310_p6, %s4287_s11), 63 }
   0xf   : > { %s4285_s12 = sshll.u32 %s8173_s8, 2  ;;  %s8177_s10 = smov (!%p319_p7, %s308_s10), 7 }
  0x10   : > { %s6058_s15 = scalar_lea.vmem %s8130_s0, %s4285_s12  ;;  %s4288_s16 = sshll.u32 %s8175_s11, 2 }
  0x11   : > { %s6063_s19 = scalar_lea.vmem %s8136_s6, %s4288_s16  ;;  %s4290_s20 = sshll.u32 %s8177_s10, 1 }
  0x12   : > { %s6068_s23 = scalar_lea.vmem %s8137_s7, %s4290_s20  ;;  %329 = sbr.rel (%p4291_p8) target bundleno = 146 (0x92), region = 48 }
  0x17   : > { %v5707_v0 = vld [vmem:[%s6058_s15] sm:$0xff]   ;;  %v5981_v2 = vmov 0   ;;  %v5790_v7 = vld [vmem:[%s6058_s15 + $0x8] sm:$0xff]   ;;  %v5791_v8 = vld [vmem:[%s6058_s15 + $0x10] sm:$0xff]   ;;  %vm805_vm6 = vcmask 1040384   ;;  %vm806_vm7 = vcmask 1044484  }
  0x18   : > { %v6075_v1 = vld [vmem:[%s8133_s3] ss:$0 sm:$0xff]  ;;  %727 = vst [vmem:[#allocation2] sm:$0xf] %v5981_v2  ;;  %v5708_v3 = vunpack.c.l.bf16 %v5707_v0  ;;  %v5709_v4 = vunpack.c.h.bf16 %v5707_v0  ;;  %v5712_v11 = vunpack.c.l.bf16 %v5790_v7  ;;  %v5792_v12 = vld [vmem:[%s6058_s15 + $0x18] sm:$0xff]   ;;  %v5713_v13 = vunpack.c.h.bf16 %v5790_v7  ;;  %v6156_v55 = vld [vmem:[%s6058_s15 + $0x28] sm:$0xff]  }
  0x19   : > { %v6081_v5 = vld [vmem:[%s8134_s4] ss:$0 sm:$0xff]  ;;  %728 = vst [vmem:[#allocation2 + $0x4] sm:$0xf] %v5981_v2  ;;  %v5716_v14 = vunpack.c.l.bf16 %v5791_v8  ;;  %v5717_v15 = vunpack.c.h.bf16 %v5791_v8  ;;  %v5720_v22 = vunpack.c.l.bf16 %v5792_v12  ;;  %v5721_v34 = vunpack.c.h.bf16 %v5792_v12  ;;  %vm6234_vm12 = vmor %vm805_vm6, %vm806_vm7 }
  0x1a   : > { %v466_v6 = vld [vmem:[%s8135_s5] sm:$0x1]  ;;  %729 = vst [vmem:[#allocation2 + $0x8] sm:$0x3] %v5981_v2  ;;  %v398_v9 = vmul.f32 %v6075_v1, %v5708_v3  ;;  %v399_v10 = vmul.f32 %v6075_v1, %v5709_v4  ;;  %v400_v18 = vmul.f32 %v6075_v1, %v5712_v11  ;;  %v401_v19 = vmul.f32 %v6075_v1, %v5713_v13 }
  0x1b   : > { %730 = vst [vmem:[#allocation2 + $0xc] sm:$0xf] %v5981_v2  ;;  %vm467_vm0 = vcmp.gt.f32.partialorder %v466_v6, 0.5  ;;  %v402_v20 = vmul.f32 %v6075_v1, %v5716_v14  ;;  %v403_v21 = vmul.f32 %v6075_v1, %v5717_v15  ;;  %v404_v31 = vmul.f32 %v6075_v1, %v5720_v22  ;;  %v5793_v32 = vld [vmem:[%s6058_s15 + $0x20] sm:$0xff]  }
  0x1c   : > { %731 = vst [vmem:[#allocation2 + $0x10] sm:$0xf] %v5981_v2  ;;  %v6096_v16 = vadd.f32 %v6081_v5, %v398_v9  ;;  %v6099_v17 = vadd.f32 %v6081_v5, %v399_v10  ;;  %v660_v24 = vsel %vm467_vm0, 1, %v5981_v2  ;;  %v6112_v26 = vadd.f32 %v6081_v5, %v400_v18 }
  0x1d   : > { %732 = vst [vmem:[#allocation2 + $0x14] sm:$0x3] %v5981_v2  ;;  %v6115_v27 = vadd.f32 %v6081_v5, %v401_v19  ;;  %v6118_v28 = vadd.f32 %v6081_v5, %v402_v20  ;;  %v6122_v30 = vadd.f32 %v6081_v5, %v403_v21  ;;  %v661_v35 = vperm.slane %v660_v24, 0 }
  0x1e   : > { %734 = vst [vmem:[#allocation2 + $0xd8] sm:$0xf] %v5981_v2  ;;  %v500_v23 = vmin.f32 %v6096_v16, 0.0  ;;  %v501_v25 = vmin.f32 %v6099_v17, 0.0  ;;  %v502_v36 = vmin.f32 %v6112_v26, 0.0  ;;  %v5724_v39 = vunpack.c.l.bf16 %v5793_v32 }
  0x1f   : > { %735 = vst [vmem:[#allocation2 + $0xdc] sm:$0xf] %v5981_v2  ;;  %v503_v37 = vmin.f32 %v6115_v27, 0.0  ;;  %v504_v38 = vmin.f32 %v6118_v28, 0.0  ;;  %vm468_vm1 = vcmp.gt.f32.partialorder %v6096_v16, 0.0  ;;  %v505_v41 = vmin.f32 %v6122_v30, 0.0 }
  0x20   : > { %736 = vst [vmem:[#allocation2 + $0xe0] sm:$0x3] %v5981_v2  ;;  %v532_v29 = vmul.f32 1.442695, %v500_v23  ;;  %v534_v33 = vmul.f32 1.442695, %v501_v25  ;;  %v6136_v42 = vadd.f32 %v6081_v5, %v404_v31  ;;  %v405_v45 = vmul.f32 %v6075_v1, %v5721_v34 }
  0x21   : > { %737 = vst [vmem:[#allocation2 + $0xe4] sm:$0xf] %v5981_v2  ;;  %v536_v40 = vmul.f32 1.442695, %v502_v36  ;;  %v538_v43 = vmul.f32 1.442695, %v503_v37  ;;  %v5725_v46 = vunpack.c.h.bf16 %v5793_v32  ;;  %v406_v51 = vmul.f32 %v6075_v1, %v5724_v39 }
  0x22   : > { %738 = vst [vmem:[#allocation2 + $0xe8] sm:$0xf] %v5981_v2  ;;  %5867 = vpow2.f32 %v532_v29  ;;  %v540_v44 = vmul.f32 1.442695, %v504_v38  ;;  %vm6141_vm2 = vcmp.eq.s32.totalorder %v661_v35, 1  ;;  %v506_v49 = vmin.f32 %v6136_v42, 0.0 }
  0x23   : > { %739 = vst [vmem:[#allocation2 + $0xec] sm:$0x3] %v5981_v2  ;;  %5869 = vpow2.f32 %v534_v33  ;;  %v542_v48 = vmul.f32 1.442695, %v505_v41  ;;  %vm469_vm3 = vcmp.gt.f32.partialorder %v6099_v17, 0.0  ;;  %v6149_v50 = vadd.f32 %v6081_v5, %v405_v45 }
  0x24   : > { %741 = vst [vmem:[#allocation2 + $0x18] sm:$0x1] %v5981_v2  ;;  %5871 = vpow2.f32 %v536_v40  ;;  %vm470_vm4 = vcmp.gt.f32.partialorder %v6112_v26, 0.0  ;;  %v544_v53 = vmul.f32 1.442695, %v506_v49  ;;  %v407_v54 = vmul.f32 %v6075_v1, %v5725_v46 }
  0x25   : > { %742 = vst [vmem:[#allocation2 + $0x24] sm:$0x1] %v5981_v2  ;;  %5873 = vpow2.f32 %v538_v43  ;;  %vm471_vm5 = vcmp.gt.f32.partialorder %v6115_v27, 0.0  ;;  %v507_v58 = vmin.f32 %v6149_v50, 0.0  ;;  %vm472_vm8 = vcmp.gt.f32.partialorder %v6118_v28, 0.0 }
  0x26   : > { %743 = vst [vmem:[#allocation2 + $0x30] sm:$0x1] %v5981_v2  ;;  %5875 = vpow2.f32 %v540_v44  ;;  %vm473_vm9 = vcmp.gt.f32.partialorder %v6122_v30, 0.0  ;;  %v6165_v60 = vadd.f32 %v6081_v5, %v406_v51  ;;  %vm474_vm10 = vcmp.gt.f32.partialorder %v6136_v42, 0.0 }
  0x27   : > { %744 = vst [vmem:[#allocation2 + $0x3c] sm:$0x1] %v5981_v2  ;;  %5877 = vpow2.f32 %v542_v48  ;;  %v546_v62 = vmul.f32 1.442695, %v507_v58  ;;  %v5728_v63 = vunpack.c.l.bf16 %v6156_v55  ;;  %v6182_v7 = vadd.f32 %v6081_v5, %v407_v54  ;;  %v5796_v58 = vld [vmem:[%s6058_s15 + $0x38] sm:$0xff]  }
  0x28   : > { %v5868_v52 = vpop.eup %5867  ;;  %745 = vst [vmem:[#allocation2 + $0x48] sm:$0x1] %v5981_v2  ;;  %5879 = vpow2.f32 %v544_v53  ;;  %v508_v6 = vmin.f32 %v6165_v60, 0.0  ;;  %vm475_vm11 = vcmp.gt.f32.partialorder %v6149_v50, 0.0  ;;  %v5729_v15 = vunpack.c.h.bf16 %v6156_v55  ;;  %v5795_v53 = vld [vmem:[%s6058_s15 + $0x30] sm:$0xff]  }
  0x29   : > { %v5870_v56 = vpop.eup %5869  ;;  %746 = vst [vmem:[#allocation2 + $0x54] sm:$0x1] %v5981_v2  ;;  %v4292_v57 = vadd.f32 -1.0, %v5868_v52  ;;  %5881 = vpow2.f32 %v546_v62  ;;  %v408_v20 = vmul.f32 %v6075_v1, %v5728_v63  ;;  %v509_v33 = vmin.f32 %v6182_v7, 0.0 }
  0x2a   : > { %747 = vst [vmem:[#allocation2 + $0x60] sm:$0x1] %v5981_v2  ;;  %v4293_v59 = vadd.f32 -1.0, %v5870_v56  ;;  %v5872_v0 = vpop.eup %5871  ;;  %v409_v40 = vmul.f32 %v6075_v1, %v5729_v15  ;;  %vm476_vm13 = vcmp.gt.f32.partialorder %v6165_v60, 0.0  ;;  %vm477_vm14 = vcmp.gt.f32.partialorder %v6182_v7, 0.0 }
  0x2b   : > { %748 = vst [vmem:[#allocation2 + $0x6c] sm:$0x1] %v5981_v2  ;;  %v628_v61 = vsel %vm468_vm1, %v6096_v16, %v4292_v57  ;;  %v5874_v8 = vpop.eup %5873  ;;  %v4294_v11 = vadd.f32 -1.0, %v5872_v0  ;;  %v5732_v0 = vunpack.c.l.bf16 %v5795_v53 }
  0x2c   : > { %749 = vst [vmem:[#allocation2 + $0x78] sm:$0x1] %v5981_v2  ;;  %v663_v3 = vsel %vm6141_vm2, %v628_v61, %v6096_v16  ;;  %v629_v4 = vsel %vm469_vm3, %v6099_v17, %v4293_v59  ;;  %v5876_v12 = vpop.eup %5875  ;;  %v4295_v14 = vadd.f32 -1.0, %v5874_v8  ;;  %v5736_v8 = vunpack.c.l.bf16 %v5796_v58 }
  0x2d   : > { %750 = vst [vmem:[#allocation2 + $0x84] sm:$0x1] %v5981_v2  ;;  %v695_v9 = vpack.c.bf16 %v663_v3, %v663_v3  ;;  %v664_v10 = vsel %vm6141_vm2, %v629_v4, %v6099_v17  ;;  %v5878_v16 = vpop.eup %5877  ;;  %v630_v18 = vsel %vm470_vm4, %v6112_v26, %v4294_v11  ;;  %v4296_v19 = vadd.f32 -1.0, %v5876_v12 }
  0x2e   : > { %751 = vst [vmem:[#allocation2 + $0x90] sm:$0x1] %v5981_v2  ;;  %v696_v13 = vpack.c.bf16 %v664_v10, %v664_v10  ;;  %v548_v17 = vmul.f32 1.442695, %v508_v6  ;;  %v665_v22 = vsel %vm6141_vm2, %v630_v18, %v6112_v26  ;;  %v631_v23 = vsel %vm471_vm5, %v6115_v27, %v4295_v14  ;;  %v5880_v25 = vpop.eup %5879 }
  0x2f   : > { %752 = vst [vmem:[#allocation2 + $0x9c] sm:$0x1] %v5981_v2  ;;  %v6197_v21 = vrot.slane %v695_v9, 7  ;;  %v4297_v24 = vadd.f32 -1.0, %v5878_v16  ;;  %v697_v29 = vpack.c.bf16 %v665_v22, %v665_v22  ;;  %v666_v31 = vsel %vm6141_vm2, %v631_v23, %v6115_v27  ;;  %v5882_v27 = vpop.eup %5881 }
  0x30   : > { %753 = vst [vmem:[#allocation2 + $0xa8] sm:$0x1] %v5981_v2  ;;  %v632_v32 = vsel %vm472_vm8, %v6118_v28, %v4296_v19  ;;  %v6214_v26 = vrot.slane %v696_v13, 7  ;;  %v698_v34 = vpack.c.bf16 %v666_v31, %v666_v31  ;;  %v4298_v43 = vadd.f32 -1.0, %v5880_v25 }
  0x31   : > { %754 = vst [vmem:[#allocation2 + $0xb4] sm:$0x1] %v5981_v2  ;;  %v667_v35 = vsel %vm6141_vm2, %v632_v32, %v6118_v28  ;;  %v633_v36 = vsel %vm473_vm9, %v6122_v30, %v4297_v24  ;;  %v6223_v37 = vrot.slane %v697_v29, 7  ;;  %v809_v28 = vrot.slane %v6197_v21, 4 }
  0x32   : > { %755 = vst [vmem:[#allocation2 + $0xc0] sm:$0x1] %v5981_v2  ;;  %v699_v38 = vpack.c.bf16 %v667_v35, %v667_v35  ;;  %v668_v39 = vsel %vm6141_vm2, %v633_v36, %v6122_v30  ;;  %v4299_v44 = vadd.f32 -1.0, %v5882_v27  ;;  %5883 = vpow2.f32 %v548_v17 }
  0x33   : > { %756 = vst [vmem:[#allocation2 + $0xcc] sm:$0x1] %v5981_v2  ;;  %v700_v41 = vpack.c.bf16 %v668_v39, %v668_v39  ;;  %v550_v30 = vmul.f32 1.442695, %v509_v33  ;;  %v812_v48 = vrot.slane %v6214_v26, 4  ;;  %v6243_v49 = vrot.slane %v698_v34, 7 }
  0x34   : > { %757 = vst [vmem:[#allocation2 + $0x20] sm:$0x2] %v5981_v2  ;;  %v6238_v46 = vrot.slane %v699_v38, 7  ;;  %v634_v51 = vsel %vm474_vm10, %v6136_v42, %v4298_v43  ;;  %v635_v52 = vsel %vm475_vm11, %v6149_v50, %v4299_v44  ;;  %v814_v54 = vrot.slane %v6223_v37, 4 }
  0x35   : > { %758 = vst [vmem:[#allocation2 + $0x2c] sm:$0x2] %v5981_v2  ;;  %v6255_v55 = vrot.slane %v700_v41, 7  ;;  %v669_v56 = vsel %vm6141_vm2, %v634_v51, %v6136_v42  ;;  %v670_v57 = vsel %vm6141_vm2, %v635_v52, %v6149_v50  ;;  %v6268_v59 = vsel %vm6234_vm12, %v809_v28, %v6214_v26 }
  0x36   : > { %759 = vst [vmem:[#allocation2 + $0x38] sm:$0x2] %v5981_v2  ;;  %v701_v61 = vpack.c.bf16 %v669_v56, %v669_v56  ;;  %v702_v62 = vpack.c.bf16 %v670_v57, %v670_v57  ;;  %5885 = vpow2.f32 %v550_v30  ;;  %v819_v63 = vrot.slane %v6238_v46, 4 }
  0x37   : > { %760 = vst [vmem:[#allocation2 + $0x44] sm:$0x2] %v5981_v2  ;;  %v6273_v42 = vadd.f32 %v6081_v5, %v408_v20  ;;  %v6276_v50 = vadd.f32 %v6081_v5, %v409_v40  ;;  %v817_v3 = vrot.slane %v6243_v49, 4  ;;  %v5733_v6 = vunpack.c.h.bf16 %v5795_v53  ;;  %v5797_v40 = vld [vmem:[%s6058_s15 + $0x40] sm:$0xff]  }
  0x38   : > { %761 = vst [vmem:[#allocation2 + $0x50] sm:$0x2] %v5981_v2  ;;  %v6280_v4 = vrot.slane %v701_v61, 7  ;;  %v5884_v9 = vpop.eup %5883  ;;  %v6286_v10 = vsel %vm6234_vm12, %v814_v54, %v6243_v49  ;;  %v822_v11 = vrot.slane %v6255_v55, 4  ;;  %v6293_v15 = vrot.slane %v702_v62, 7 }
  0x39   : > { %762 = vst [vmem:[#allocation2 + $0x5c] sm:$0x2] %v5981_v2  ;;  %v510_v12 = vmin.f32 %v6273_v42, 0.0  ;;  %v511_v13 = vmin.f32 %v6276_v50, 0.0  ;;  %v4300_v16 = vadd.f32 -1.0, %v5884_v9  ;;  %v410_v18 = vmul.f32 %v6075_v1, %v5732_v0 }
  0x3a   : > { %763 = vst [vmem:[#allocation2 + $0x68] sm:$0x2] %v5981_v2  ;;  %v824_v14 = vrot.slane %v6280_v4, 4  ;;  %v6300_v19 = vsel %vm6234_vm12, %v819_v63, %v6255_v55  ;;  %vm478_vm15 = vcmp.gt.f32.partialorder %v6273_v42, 0.0  ;;  %v411_v22 = vmul.f32 %v6075_v1, %v5733_v6  ;;  %v5798_v6 = vld [vmem:[%s6058_s15 + $0x48] sm:$0xff]  }
  0x3b   : > { %764 = vst [vmem:[#allocation2 + $0x74] sm:$0x2] %v5981_v2  ;;  %v552_v17 = vmul.f32 1.442695, %v510_v12  ;;  %v554_v20 = vmul.f32 1.442695, %v511_v13  ;;  %v636_v24 = vsel %vm476_vm13, %v6165_v60, %v4300_v16  ;;  %v6309_v25 = vadd.f32 %v6081_v5, %v410_v18 }
  0x3c   : > { %765 = vst [vmem:[#allocation2 + $0x80] sm:$0x2] %v5981_v2  ;;  %v5886_v23 = vpop.eup %5885  ;;  %v5737_v29 = vunpack.c.h.bf16 %v5796_v58  ;;  %v412_v31 = vmul.f32 %v6075_v1, %v5736_v8  ;;  %v671_v32 = vsel %vm6141_vm2, %v636_v24, %v6165_v60  ;;  %v6317_v34 = vadd.f32 %v6081_v5, %v411_v22 }
  0x3d   : > { %766 = vst [vmem:[#allocation2 + $0x8c] sm:$0x2] %v5981_v2  ;;  %v4301_v33 = vadd.f32 -1.0, %v5886_v23  ;;  %5887 = vpow2.f32 %v552_v17  ;;  %v703_v35 = vpack.c.bf16 %v671_v32, %v671_v32  ;;  %vm479_vm0 = vcmp.gt.f32.partialorder %v6276_v50, 0.0 }
  0x3e   : > { %767 = vst [vmem:[#allocation2 + $0x98] sm:$0x2] %v5981_v2  ;;  %5889 = vpow2.f32 %v554_v20  ;;  %v512_v36 = vmin.f32 %v6309_v25, 0.0  ;;  %v827_v27 = vrot.slane %v6293_v15, 4  ;;  %v513_v38 = vmin.f32 %v6317_v34, 0.0 }
  0x3f   : > { %768 = vst [vmem:[#allocation2 + $0xa4] sm:$0x2] %v5981_v2  ;;  %v637_v60 = vsel %vm477_vm14, %v6182_v7, %v4301_v33  ;;  %v6329_v39 = vadd.f32 %v6081_v5, %v412_v31  ;;  %v6333_v28 = vrot.slane %v703_v35, 7  ;;  %v413_v44 = vmul.f32 %v6075_v1, %v5737_v29 }
  0x40   : > { %769 = vst [vmem:[#allocation2 + $0xb0] sm:$0x2] %v5981_v2  ;;  %v672_v41 = vsel %vm6141_vm2, %v637_v60, %v6182_v7  ;;  %v556_v43 = vmul.f32 1.442695, %v512_v36  ;;  %v826_v30 = vsel %vm6234_vm12, %v824_v14, %v6293_v15  ;;  %v558_v52 = vmul.f32 1.442695, %v513_v38 }
  0x41   : > { %770 = vst [vmem:[#allocation2 + $0xbc] sm:$0x2] %v5981_v2  ;;  %v704_v51 = vpack.c.bf16 %v672_v41, %v672_v41  ;;  %v514_v53 = vmin.f32 %v6329_v39, 0.0  ;;  %vm480_vm1 = vcmp.gt.f32.partialorder %v6309_v25, 0.0  ;;  %v6347_v7 = vadd.f32 %v6081_v5, %v413_v44 }
  0x42   : > { %771 = vst [vmem:[#allocation2 + $0xc8] sm:$0x2] %v5981_v2  ;;  %5891 = vpow2.f32 %v556_v43  ;;  %v5740_v54 = vunpack.c.l.bf16 %v5797_v40  ;;  %v5741_v58 = vunpack.c.h.bf16 %v5797_v40  ;;  %vm481_vm3 = vcmp.gt.f32.partialorder %v6317_v34, 0.0 }
  0x43   : > { %772 = vst [vmem:[#allocation2 + $0xd4] sm:$0x2] %v5981_v2  ;;  %v5888_v56 = vpop.eup %5887  ;;  %v829_v2 = vrot.slane %v6333_v28, 4  ;;  %5893 = vpow2.f32 %v558_v52  ;;  %v560_v57 = vmul.f32 1.442695, %v514_v53  ;;  %v515_v63 = vmin.f32 %v6347_v7, 0.0 }
  0x44   : > { %936 = vst [vmem:[#allocation2 + $0x18] sm:$0xe] %v6197_v21  ;;  %v5890_v61 = vpop.eup %5889  ;;  %v6353_v21 = vrot.slane %v704_v51, 7  ;;  %v4302_v62 = vadd.f32 -1.0, %v5888_v56  ;;  %v414_v0 = vmul.f32 %v6075_v1, %v5740_v54  ;;  %vm482_vm4 = vcmp.gt.f32.partialorder %v6329_v39, 0.0 }
  0x45   : > { %937 = vst [vmem:[#allocation2 + $0x1c] sm:$0xf] %v6268_v59  ;;  %v4303_v59 = vadd.f32 -1.0, %v5890_v61  ;;  %5895 = vpow2.f32 %v560_v57  ;;  %vm483_vm5 = vcmp.gt.f32.partialorder %v6347_v7, 0.0  ;;  %v5744_v12 = vunpack.c.l.bf16 %v5798_v6 }
  0x46   : > { %938 = vst [vmem:[#allocation2 + $0x20] sm:$0x1] %v812_v48  ;;  %v638_v26 = vsel %vm478_vm15, %v6273_v42, %v4302_v62  ;;  %v562_v48 = vmul.f32 1.442695, %v515_v63  ;;  %v6367_v8 = vadd.f32 %v6081_v5, %v414_v0  ;;  %v5745_v13 = vunpack.c.h.bf16 %v5798_v6 }
  0x47   : > { %939 = vst [vmem:[#allocation2 + $0x24] sm:$0xe] %v6223_v37  ;;  %v415_v37 = vmul.f32 %v6075_v1, %v5741_v58  ;;  %v673_v9 = vsel %vm6141_vm2, %v638_v26, %v6273_v42  ;;  %v831_v16 = vsel %vm6234_vm12, %v829_v2, %v6353_v21  ;;  %v5799_v2 = vld [vmem:[%s6058_s15 + $0x50] sm:$0xff]  }
  0x48   : > { %940 = vst [vmem:[#allocation2 + $0x28] sm:$0xf] %v6286_v10  ;;  %v639_v10 = vsel %vm479_vm0, %v6276_v50, %v4303_v59  ;;  %v5892_v14 = vpop.eup %5891  ;;  %v705_v18 = vpack.c.bf16 %v673_v9, %v673_v9  ;;  %5897 = vpow2.f32 %v562_v48  ;;  %v516_v22 = vmin.f32 %v6367_v8, 0.0 }
  0x49   : > { %941 = vst [vmem:[#allocation2 + $0x2c] sm:$0x1] %v817_v3  ;;  %v674_v49 = vsel %vm6141_vm2, %v639_v10, %v6276_v50  ;;  %v5894_v42 = vpop.eup %5893  ;;  %v832_v3 = vrot.slane %v6353_v21, 4  ;;  %v4304_v20 = vadd.f32 -1.0, %v5892_v14  ;;  %v6391_v24 = vadd.f32 %v6081_v5, %v415_v37  ;;  %v5800_v21 = vld [vmem:[%s6058_s15 + $0x58] sm:$0xff]  }
  0x4a   : > { %942 = vst [vmem:[#allocation2 + $0x30] sm:$0xe] %v6238_v46  ;;  %v706_v17 = vpack.c.bf16 %v674_v49, %v674_v49  ;;  %v833_v46 = vrot.slane %v705_v18, 7  ;;  %v4305_v23 = vadd.f32 -1.0, %v5894_v42  ;;  %v416_v50 = vmul.f32 %v6075_v1, %v5744_v12 }
  0x4b   : > { %943 = vst [vmem:[#allocation2 + $0x34] sm:$0xf] %v6300_v19  ;;  %v5896_v29 = vpop.eup %5895  ;;  %v640_v31 = vsel %vm480_vm1, %v6309_v25, %v4304_v20  ;;  %v564_v32 = vmul.f32 1.442695, %v516_v22  ;;  %v417_v33 = vmul.f32 %v6075_v1, %v5745_v13  ;;  %v517_v15 = vmin.f32 %v6391_v24, 0.0 }
  0x4c   : > { %944 = vst [vmem:[#allocation2 + $0x38] sm:$0x1] %v822_v11  ;;  %v835_v19 = vrot.slane %v706_v17, 7  ;;  %v834_v55 = vrot.slane %v833_v46, 4  ;;  %v675_v11 = vsel %vm6141_vm2, %v640_v31, %v6309_v25  ;;  %v641_v35 = vsel %vm481_vm3, %v6317_v34, %v4305_v23  ;;  %v5801_v23 = vld [vmem:[%s6058_s15 + $0x60] sm:$0xff]  }
  0x4d   : > { %945 = vst [vmem:[#allocation2 + $0x3c] sm:$0xe] %v6280_v4  ;;  %v4306_v36 = vadd.f32 -1.0, %v5896_v29  ;;  %v707_v60 = vpack.c.bf16 %v675_v11, %v675_v11  ;;  %v676_v38 = vsel %vm6141_vm2, %v641_v35, %v6317_v34  ;;  %5899 = vpow2.f32 %v564_v32 }
  0x4e   : > { %946 = vst [vmem:[#allocation2 + $0x40] sm:$0xf] %v826_v30  ;;  %v837_v4 = vrot.slane %v835_v19, 4  ;;  %v5898_v40 = vpop.eup %5897  ;;  %v836_v25 = vsel %vm6234_vm12, %v834_v55, %v835_v19  ;;  %v708_v41 = vpack.c.bf16 %v676_v38, %v676_v38  ;;  %v566_v52 = vmul.f32 1.442695, %v517_v15 }
  0x4f   : > { %947 = vst [vmem:[#allocation2 + $0x44] sm:$0x1] %v827_v27  ;;  %v642_v43 = vsel %vm482_vm4, %v6329_v39, %v4306_v36  ;;  %v838_v27 = vrot.slane %v707_v60, 7  ;;  %v4307_v44 = vadd.f32 -1.0, %v5898_v40  ;;  %v6424_v53 = vadd.f32 %v6081_v5, %v417_v33 }
  0x50   : > { %948 = vst [vmem:[#allocation2 + $0x48] sm:$0xe] %v6333_v28  ;;  %v677_v34 = vsel %vm6141_vm2, %v642_v43, %v6329_v39  ;;  %v6421_v28 = vadd.f32 %v6081_v5, %v416_v50  ;;  %v840_v30 = vrot.slane %v708_v41, 7  ;;  %vm484_vm6 = vcmp.gt.f32.partialorder %v6367_v8, 0.0 }
  0x51   : > { %949 = vst [vmem:[#allocation2 + $0x4c] sm:$0xf] %v831_v16  ;;  %v709_v51 = vpack.c.bf16 %v677_v34, %v677_v34  ;;  %v839_v54 = vrot.slane %v838_v27, 4  ;;  %v643_v56 = vsel %vm483_vm5, %v6347_v7, %v4307_v44  ;;  %5901 = vpow2.f32 %v566_v52 }
  0x52   : > { %950 = vst [vmem:[#allocation2 + $0x50] sm:$0x1] %v832_v3  ;;  %v518_v39 = vmin.f32 %v6421_v28, 0.0  ;;  %v842_v57 = vrot.slane %v840_v30, 4  ;;  %v678_v61 = vsel %vm6141_vm2, %v643_v56, %v6347_v7  ;;  %vm485_vm7 = vcmp.gt.f32.partialorder %v6391_v24, 0.0 }
  0x53   : > { %951 = vst [vmem:[#allocation2 + $0x54] sm:$0xe] %v833_v46  ;;  %v843_v58 = vrot.slane %v709_v51, 7  ;;  %v5900_v62 = vpop.eup %5899  ;;  %v841_v63 = vsel %vm6234_vm12, %v839_v54, %v840_v30  ;;  %v710_v0 = vpack.c.bf16 %v678_v61, %v678_v61  ;;  %v519_v48 = vmin.f32 %v6424_v53, 0.0 }
  0x54   : > { %952 = vst [vmem:[#allocation2 + $0x58] sm:$0xf] %v836_v25  ;;  %v568_v6 = vmul.f32 1.442695, %v518_v39  ;;  %v4308_v26 = vadd.f32 -1.0, %v5900_v62  ;;  %v5748_v37 = vunpack.c.l.bf16 %v5799_v2  ;;  %v5749_v7 = vunpack.c.h.bf16 %v5799_v2  ;;  %v5802_v39 = vld [vmem:[%s6058_s15 + $0x68] sm:$0xff]  }
  0x55   : > { %953 = vst [vmem:[#allocation2 + $0x5c] sm:$0x1] %v837_v4  ;;  %v844_v59 = vrot.slane %v843_v58, 4  ;;  %v845_v9 = vrot.slane %v710_v0, 7  ;;  %v5752_v10 = vunpack.c.l.bf16 %v5800_v21  ;;  %v570_v13 = vmul.f32 1.442695, %v519_v48 }
  0x56   : > { %954 = vst [vmem:[#allocation2 + $0x60] sm:$0xe] %v838_v27  ;;  %5903 = vpow2.f32 %v568_v6  ;;  %v644_v12 = vsel %vm484_vm6, %v6367_v8, %v4308_v26  ;;  %v418_v14 = vmul.f32 %v6075_v1, %v5748_v37  ;;  %v5753_v16 = vunpack.c.h.bf16 %v5800_v21 }
  0x57   : > { %955 = vst [vmem:[#allocation2 + $0x64] sm:$0xf] %v841_v63  ;;  %v846_v18 = vsel %vm6234_vm12, %v844_v59, %v845_v9  ;;  %v847_v49 = vrot.slane %v845_v9, 4  ;;  %v679_v42 = vsel %vm6141_vm2, %v644_v12, %v6367_v8  ;;  %v419_v3 = vmul.f32 %v6075_v1, %v5749_v7  ;;  %v5902_v17 = vpop.eup %5901  ;;  %v5803_v59 = vld [vmem:[%s6058_s15 + $0x70] sm:$0xff]  }
  0x58   : > { %956 = vst [vmem:[#allocation2 + $0x68] sm:$0x1] %v842_v57  ;;  %v711_v20 = vpack.c.bf16 %v679_v42, %v679_v42  ;;  %5905 = vpow2.f32 %v570_v13  ;;  %v6451_v22 = vadd.f32 %v6081_v5, %v418_v14  ;;  %v420_v46 = vmul.f32 %v6075_v1, %v5752_v10 }
  0x59   : > { %957 = vst [vmem:[#allocation2 + $0x6c] sm:$0xe] %v843_v58  ;;  %v4309_v50 = vadd.f32 -1.0, %v5902_v17  ;;  %vm486_vm8 = vcmp.gt.f32.partialorder %v6421_v28, 0.0  ;;  %v6457_v29 = vadd.f32 %v6081_v5, %v419_v3  ;;  %v421_v8 = vmul.f32 %v6075_v1, %v5753_v16 }
  0x5a   : > { %958 = vst [vmem:[#allocation2 + $0x70] sm:$0xf] %v846_v18  ;;  %v848_v19 = vrot.slane %v711_v20, 7  ;;  %vm487_vm9 = vcmp.gt.f32.partialorder %v6424_v53, 0.0  ;;  %v520_v31 = vmin.f32 %v6451_v22, 0.0  ;;  %v6463_v32 = vadd.f32 %v6081_v5, %v420_v46 }
  0x5b   : > { %959 = vst [vmem:[#allocation2 + $0x74] sm:$0x1] %v847_v49  ;;  %v645_v55 = vsel %vm485_vm7, %v6391_v24, %v4309_v50  ;;  %v521_v11 = vmin.f32 %v6457_v29, 0.0  ;;  %v6470_v35 = vadd.f32 %v6081_v5, %v421_v8  ;;  %v5756_v36 = vunpack.c.l.bf16 %v5801_v23 }
  0x5c   : > { %v5904_v33 = vpop.eup %5903  ;;  %960 = vst [vmem:[#allocation2 + $0x78] sm:$0xe] %v848_v19  ;;  %v680_v4 = vsel %vm6141_vm2, %v645_v55, %v6391_v24  ;;  %vm488_vm10 = vcmp.gt.f32.partialorder %v6451_v22, 0.0  ;;  %v572_v38 = vmul.f32 1.442695, %v520_v31  ;;  %v849_v40 = vrot.slane %v848_v19, 4 }
  0x5d   : > { %v4310_v60 = vadd.f32 -1.0, %v5904_v33  ;;  %v712_v25 = vpack.c.bf16 %v680_v4, %v680_v4  ;;  %v574_v41 = vmul.f32 1.442695, %v521_v11  ;;  %v522_v43 = vmin.f32 %v6463_v32, 0.0 }
  0x5e   : > { %v5906_v15 = vpop.eup %5905  ;;  %5907 = vpow2.f32 %v572_v38  ;;  %vm489_vm11 = vcmp.gt.f32.partialorder %v6457_v29, 0.0  ;;  %v523_v24 = vmin.f32 %v6470_v35, 0.0  ;;  %v5757_v56 = vunpack.c.h.bf16 %v5801_v23 }
  0x5f   : > { %v646_v27 = vsel %vm486_vm8, %v6421_v28, %v4310_v60  ;;  %v850_v34 = vrot.slane %v712_v25, 7  ;;  %v4311_v30 = vadd.f32 -1.0, %v5906_v15  ;;  %5909 = vpow2.f32 %v574_v41 }
  0x60   : > { %v681_v44 = vsel %vm6141_vm2, %v646_v27, %v6421_v28  ;;  %v576_v52 = vmul.f32 1.442695, %v522_v43  ;;  %v578_v54 = vmul.f32 1.442695, %v523_v24  ;;  %v422_v61 = vmul.f32 %v6075_v1, %v5756_v36 }
  0x61   : > { %v713_v51 = vpack.c.bf16 %v681_v44, %v681_v44  ;;  %v851_v2 = vsel %vm6234_vm12, %v849_v40, %v850_v34  ;;  %v852_v57 = vrot.slane %v850_v34, 4  ;;  %v647_v58 = vsel %vm487_vm9, %v6424_v53, %v4311_v30 }
  0x62   : > { %961 = vst [vmem:[#allocation2 + $0x7c] sm:$0xf] %v851_v2  ;;  %v682_v21 = vsel %vm6141_vm2, %v647_v58, %v6424_v53  ;;  %5911 = vpow2.f32 %v576_v52  ;;  %v423_v62 = vmul.f32 %v6075_v1, %v5757_v56  ;;  %v6497_v0 = vadd.f32 %v6081_v5, %v422_v61 }
  0x63   : > { %v853_v28 = vrot.slane %v713_v51, 7  ;;  %962 = vst [vmem:[#allocation2 + $0x80] sm:$0x1] %v852_v57  ;;  %v714_v63 = vpack.c.bf16 %v682_v21, %v682_v21  ;;  %5913 = vpow2.f32 %v578_v54  ;;  %v5760_v6 = vunpack.c.l.bf16 %v5802_v39 }
  0x64   : > { %v5908_v26 = vpop.eup %5907  ;;  %vm490_vm13 = vcmp.gt.f32.partialorder %v6463_v32, 0.0  ;;  %vm491_vm14 = vcmp.gt.f32.partialorder %v6470_v35, 0.0  ;;  %v6503_v53 = vadd.f32 %v6081_v5, %v423_v62  ;;  %v524_v10 = vmin.f32 %v6497_v0, 0.0 }
  0x65   : > { %v854_v48 = vrot.slane %v853_v28, 4  ;;  %963 = vst [vmem:[#allocation2 + $0x84] sm:$0xe] %v853_v28  ;;  %v5910_v37 = vpop.eup %5909  ;;  %v855_v9 = vrot.slane %v714_v63, 7  ;;  %v4312_v7 = vadd.f32 -1.0, %v5908_v26  ;;  %v5761_v12 = vunpack.c.h.bf16 %v5802_v39  ;;  %v5804_v39 = vld [vmem:[%s6058_s15 + $0x78] sm:$0xff]  }
  0x66   : > { %v4313_v13 = vadd.f32 -1.0, %v5910_v37  ;;  %v525_v14 = vmin.f32 %v6503_v53, 0.0  ;;  %v424_v16 = vmul.f32 %v6075_v1, %v5760_v6  ;;  %v5764_v18 = vunpack.c.l.bf16 %v5803_v59 }
  0x67   : > { %v856_v49 = vsel %vm6234_vm12, %v854_v48, %v855_v9  ;;  %v857_v42 = vrot.slane %v855_v9, 4  ;;  %v648_v3 = vsel %vm488_vm10, %v6451_v22, %v4312_v7  ;;  %v580_v17 = vmul.f32 1.442695, %v524_v10 }
  0x68   : > { %v5912_v20 = vpop.eup %5911  ;;  %964 = vst [vmem:[#allocation2 + $0x88] sm:$0xf] %v856_v49  ;;  %v683_v46 = vsel %vm6141_vm2, %v648_v3, %v6451_v22  ;;  %v649_v23 = vsel %vm489_vm11, %v6457_v29, %v4313_v13  ;;  %v582_v50 = vmul.f32 1.442695, %v525_v14  ;;  %v6520_v8 = vadd.f32 %v6081_v5, %v424_v16 }
  0x69   : > { %v5914_v19 = vpop.eup %5913  ;;  %965 = vst [vmem:[#allocation2 + $0x8c] sm:$0x1] %v857_v42  ;;  %v715_v31 = vpack.c.bf16 %v683_v46, %v683_v46  ;;  %v684_v33 = vsel %vm6141_vm2, %v649_v23, %v6457_v29  ;;  %v4314_v55 = vadd.f32 -1.0, %v5912_v20  ;;  %5915 = vpow2.f32 %v580_v17 }
  0x6a   : > { %v716_v11 = vpack.c.bf16 %v684_v33, %v684_v33  ;;  %v4315_v36 = vadd.f32 -1.0, %v5914_v19  ;;  %vm492_vm15 = vcmp.gt.f32.partialorder %v6497_v0, 0.0  ;;  %5917 = vpow2.f32 %v582_v50  ;;  %v5931_v33 = vld [vmem:[%s8134_s4] ss:$0 sm:$0xff] }
  0x6b   : > { %v858_v22 = vrot.slane %v715_v31, 7  ;;  %v650_v4 = vsel %vm490_vm13, %v6463_v32, %v4314_v55  ;;  %v526_v60 = vmin.f32 %v6520_v8, 0.0  ;;  %v425_v38 = vmul.f32 %v6075_v1, %v5761_v12 }
  0x6c   : > { %v860_v40 = vrot.slane %v716_v11, 7  ;;  %v685_v29 = vsel %vm6141_vm2, %v650_v4, %v6463_v32  ;;  %v651_v25 = vsel %vm491_vm14, %v6470_v35, %v4315_v36  ;;  %v5765_v41 = vunpack.c.h.bf16 %v5803_v59 }
  0x6d   : > { %v859_v43 = vrot.slane %v858_v22, 4  ;;  %966 = vst [vmem:[#allocation2 + $0x90] sm:$0xe] %v858_v22  ;;  %v717_v15 = vpack.c.bf16 %v685_v29, %v685_v29  ;;  %v686_v27 = vsel %vm6141_vm2, %v651_v25, %v6470_v35  ;;  %v584_v24 = vmul.f32 1.442695, %v526_v60 }
  0x6e   : > { %v862_v34 = vrot.slane %v860_v40, 4  ;;  %v718_v44 = vpack.c.bf16 %v686_v27, %v686_v27  ;;  %v6541_v30 = vadd.f32 %v6081_v5, %v425_v38  ;;  %v426_v32 = vmul.f32 %v6075_v1, %v5764_v18 }
  0x6f   : > { %v5916_v51 = vpop.eup %5915  ;;  %v861_v52 = vsel %vm6234_vm12, %v859_v43, %v860_v40  ;;  %v863_v54 = vrot.slane %v717_v15, 7  ;;  %5919 = vpow2.f32 %v584_v24  ;;  %v427_v56 = vmul.f32 %v6075_v1, %v5765_v41 }
  0x70   : > { %v5918_v2 = vpop.eup %5917  ;;  %967 = vst [vmem:[#allocation2 + $0x94] sm:$0xf] %v861_v52  ;;  %v865_v35 = vrot.slane %v718_v44, 7  ;;  %v4316_v57 = vadd.f32 -1.0, %v5916_v51  ;;  %vm493_vm0 = vcmp.gt.f32.partialorder %v6503_v53, 0.0  ;;  %v527_v58 = vmin.f32 %v6541_v30, 0.0 }
  0x71   : > { %968 = vst [vmem:[#allocation2 + $0x98] sm:$0x1] %v862_v34  ;;  %v864_v61 = vrot.slane %v863_v54, 4  ;;  %v4317_v28 = vadd.f32 -1.0, %v5918_v2  ;;  %v6551_v21 = vadd.f32 %v6081_v5, %v426_v32  ;;  %v6554_v62 = vadd.f32 %v6081_v5, %v427_v56 }
  0x72   : > { %969 = vst [vmem:[#allocation2 + $0x9c] sm:$0xe] %v863_v54  ;;  %v867_v63 = vrot.slane %v865_v35, 4  ;;  %v652_v6 = vsel %vm492_vm15, %v6497_v0, %v4316_v57  ;;  %v586_v59 = vmul.f32 1.442695, %v527_v58  ;;  %v5768_v26 = vunpack.c.l.bf16 %v5804_v39 }
  0x73   : > { %v866_v48 = vsel %vm6234_vm12, %v864_v61, %v865_v35  ;;  %v687_v37 = vsel %vm6141_vm2, %v652_v6, %v6497_v0  ;;  %v653_v9 = vsel %vm493_vm0, %v6503_v53, %v4317_v28  ;;  %v528_v12 = vmin.f32 %v6551_v21, 0.0 }
  0x74   : > { %970 = vst [vmem:[#allocation2 + $0xa0] sm:$0xf] %v866_v48  ;;  %v719_v7 = vpack.c.bf16 %v687_v37, %v687_v37  ;;  %v688_v10 = vsel %vm6141_vm2, %v653_v9, %v6503_v53  ;;  %5921 = vpow2.f32 %v586_v59  ;;  %vm494_vm1 = vcmp.gt.f32.partialorder %v6520_v8, 0.0 }
  0x75   : > { %v5920_v13 = vpop.eup %5919  ;;  %971 = vst [vmem:[#allocation2 + $0xa4] sm:$0x1] %v867_v63  ;;  %v720_v14 = vpack.c.bf16 %v688_v10, %v688_v10  ;;  %v529_v16 = vmin.f32 %v6554_v62, 0.0  ;;  %v5769_v18 = vunpack.c.h.bf16 %v5804_v39  ;;  %v588_v42 = vmul.f32 1.442695, %v528_v12 }
  0x76   : > { %v868_v0 = vrot.slane %v719_v7, 7  ;;  %v4318_v49 = vadd.f32 -1.0, %v5920_v13  ;;  %v428_v3 = vmul.f32 %v6075_v1, %v5768_v26  ;;  %vm495_vm3 = vcmp.gt.f32.partialorder %v6541_v30, 0.0 }
  0x77   : > { %v870_v17 = vrot.slane %v720_v14, 7  ;;  %v590_v20 = vmul.f32 1.442695, %v529_v16  ;;  %v429_v53 = vmul.f32 %v6075_v1, %v5769_v18  ;;  %5923 = vpow2.f32 %v588_v42 }
  0x78   : > { %v869_v46 = vrot.slane %v868_v0, 4  ;;  %972 = vst [vmem:[#allocation2 + $0xa8] sm:$0xe] %v868_v0  ;;  %v654_v23 = vsel %vm494_vm1, %v6520_v8, %v4318_v49  ;;  %v464_v50 = vadd.f32 %v6081_v5, %v428_v3  ;;  %vm496_vm4 = vcmp.gt.f32.partialorder %v6551_v21, 0.0 }
  0x79   : > { %v872_v19 = vrot.slane %v870_v17, 4  ;;  %v689_v31 = vsel %vm6141_vm2, %v654_v23, %v6520_v8  ;;  %5925 = vpow2.f32 %v590_v20  ;;  %v465_v55 = vadd.f32 %v5931_v33, %v429_v53 }
  0x7a   : > { %v5922_v11 = vpop.eup %5921  ;;  %v871_v1 = vsel %vm6234_vm12, %v869_v46, %v870_v17  ;;  %v721_v36 = vpack.c.bf16 %v689_v31, %v689_v31  ;;  %v530_v22 = vmin.f32 %v464_v50, 0.0  ;;  %vm497_vm5 = vcmp.gt.f32.partialorder %v6554_v62, 0.0 }
  0x7b   : > { %973 = vst [vmem:[#allocation2 + $0xac] sm:$0xf] %v871_v1  ;;  %v4319_v5 = vadd.f32 -1.0, %v5922_v11  ;;  %v531_v4 = vmin.f32 %v465_v55, 0.0  ;;  %vm498_vm6 = vcmp.gt.f32.partialorder %v464_v50, 0.0  ;;  %vm499_vm7 = vcmp.gt.f32.partialorder %v465_v55, 0.0 }
  0x7c   : > { %974 = vst [vmem:[#allocation2 + $0xb0] sm:$0x1] %v872_v19  ;;  %v873_v60 = vrot.slane %v721_v36, 7  ;;  %v592_v8 = vmul.f32 1.442695, %v530_v22 }
  0x7d   : > { %v655_v38 = vsel %vm495_vm3, %v6541_v30, %v4319_v5  ;;  %v594_v40 = vmul.f32 1.442695, %v531_v4  ;;  %v5924_v29 = vpop.eup %5923 }
  0x7e   : > { %975 = vst [vmem:[#allocation2 + $0xb4] sm:$0xe] %v873_v60  ;;  %v690_v25 = vsel %vm6141_vm2, %v655_v38, %v6541_v30  ;;  %5927 = vpow2.f32 %v592_v8  ;;  %v874_v43 = vrot.slane %v873_v60, 4  ;;  %v4320_v27 = vadd.f32 -1.0, %v5924_v29 }
  0x7f   : > { %v5926_v41 = vpop.eup %5925  ;;  %v722_v15 = vpack.c.bf16 %v690_v25, %v690_v25  ;;  %5929 = vpow2.f32 %v594_v40 }
  0x80   : > { %v4321_v24 = vadd.f32 -1.0, %v5926_v41  ;;  %v656_v44 = vsel %vm496_vm4, %v6551_v21, %v4320_v27 }
  0x81   : > { %v875_v34 = vrot.slane %v722_v15, 7  ;;  %v691_v32 = vsel %vm6141_vm2, %v656_v44, %v6551_v21 }
  0x82   : > { %v657_v30 = vsel %vm497_vm5, %v6554_v62, %v4321_v24  ;;  %v723_v54 = vpack.c.bf16 %v691_v32, %v691_v32 }
  0x83   : > { %v876_v51 = vsel %vm6234_vm12, %v874_v43, %v875_v34  ;;  %v877_v52 = vrot.slane %v875_v34, 4  ;;  %v692_v56 = vsel %vm6141_vm2, %v657_v30, %v6554_v62 }
  0x84   : > { %v5928_v39 = vpop.eup %5927  ;;  %976 = vst [vmem:[#allocation2 + $0xb8] sm:$0xf] %v876_v51  ;;  %v724_v2 = vpack.c.bf16 %v692_v56, %v692_v56  ;;  %v878_v57 = vrot.slane %v723_v54, 7 }
  0x85   : > { %v5930_v35 = vpop.eup %5929  ;;  %977 = vst [vmem:[#allocation2 + $0xbc] sm:$0x1] %v877_v52  ;;  %v4322_v58 = vadd.f32 -1.0, %v5928_v39 }
  0x86   : > { %v880_v61 = vrot.slane %v724_v2, 7  ;;  %v4323_v28 = vadd.f32 -1.0, %v5930_v35  ;;  %v879_v21 = vrot.slane %v878_v57, 4  ;;  %978 = vst [vmem:[#allocation2 + $0xc0] sm:$0xe] %v878_v57 }
  0x87   : > { %v658_v63 = vsel %vm498_vm6, %v464_v50, %v4322_v58 }
  0x88   : > { %v882_v6 = vrot.slane %v880_v61, 4  ;;  %v693_v59 = vsel %vm6141_vm2, %v658_v63, %v464_v50  ;;  %v659_v26 = vsel %vm499_vm7, %v465_v55, %v4323_v28  ;;  %v881_v62 = vsel %vm6234_vm12, %v879_v21, %v880_v61 }
  0x89   : > { %v725_v48 = vpack.c.bf16 %v693_v59, %v693_v59  ;;  %v694_v37 = vsel %vm6141_vm2, %v659_v26, %v465_v55  ;;  %979 = vst [vmem:[#allocation2 + $0xc4] sm:$0xf] %v881_v62 }
  0x8a   : > { %v726_v9 = vpack.c.bf16 %v694_v37, %v694_v37  ;;  %980 = vst [vmem:[#allocation2 + $0xc8] sm:$0x1] %v882_v6 }
  0x8b   : > { %v883_v7 = vrot.slane %v725_v48, 7 }
  0x8c   : > { %v885_v10 = vrot.slane %v726_v9, 7 }
  0x8d   : > { %v884_v12 = vrot.slane %v883_v7, 4  ;;  %981 = vst [vmem:[#allocation2 + $0xcc] sm:$0xe] %v883_v7 }
  0x8e   : > { %v887_v13 = vrot.slane %v885_v10, 4 }
  0x8f   : > { %v886_v14 = vsel %vm6234_vm12, %v884_v12, %v885_v10 }
  0x90   : > { %982 = vst [vmem:[#allocation2 + $0xd0] sm:$0xf] %v886_v14 }
  0x91   : > { %983 = vst [vmem:[#allocation2 + $0xd4] sm:$0x1] %v887_v13 }
  0x92 PF: > { %v5553_v47 = vld [vmem:[%s8131_s1 + $0x178] sm:$0xff]  ;;  %s5497_s17 = smul.u32 48, %s5963_s24  ;;  %v5552_v45 = vld [vmem:[%s8131_s1 + $0x170] sm:$0xff]  ;;  %v5551_v42 = vld [vmem:[%s8131_s1 + $0x168] sm:$0xff]  ;;  %vm1140_vm2 = vsmask.f32 3328 }
  0x93   : > { %v5569_v16 = vld [vmem:[%s8131_s1 + $0x1f8] sm:$0xff]  ;;  %1688 = vmatpush.bf16.msra.mxu0 %v5553_v47  ;;  %5808 = vmatpush.bf16.msra.mxu1 %v5553_v47  ;;  %v5568_v0 = vld [vmem:[%s8131_s1 + $0x1f0] sm:$0xff]  ;;  %v5567_v17 = vld [vmem:[%s8131_s1 + $0x1e8] sm:$0xff]  ;;  %vm1141_vm12 = vsmask.f32 7440  ;;  %vm2234_vm9 = vcmask 1042432  }
  0x94   : > { %v5577_v18 = vld [vmem:[%s8131_s1 + $0x238] sm:$0xff]  ;;  %1746 = vmatpush.bf16.msra.mxu2 %v5569_v16  ;;  %v5576_v49 = vld [vmem:[%s8131_s1 + $0x230] sm:$0xff]  ;;  %s6630_s14 = scalar_lea.vmem [#allocation2], %s5497_s17  ;;  %v5575_v20 = vld [vmem:[%s8131_s1 + $0x228] sm:$0xff]  ;;  %vm2235_vm10 = vcmask 1046532   ;;  %vm3524_vm0 = vcmask 1041408  }
  0x95   : > { %1775 = vmatpush.bf16.msra.mxu3 %v5577_v18  ;;  %v5550_v22 = vld [vmem:[%s8131_s1 + $0x160] sm:$0xff]  ;;  %v5549_v44 = vld [vmem:[%s8131_s1 + $0x158] sm:$0xff]  ;;  %vm6694_vm8 = vmor %vm1140_vm2, %vm1141_vm12  ;;  %vm2815_vm13 = vsmask.f32 2304  ;;  %vm2816_vm14 = vsmask.f32 6416 }
  0x96   : > { %v5566_v38 = vld [vmem:[%s8131_s1 + $0x1e0] sm:$0xff]  ;;  %v5565_v52 = vld [vmem:[%s8131_s1 + $0x1d8] sm:$0xff]  ;;  %v5548_v10 = vld [vmem:[%s8131_s1 + $0x150] sm:$0xff]  ;;  %vm3525_vm1 = vcmask 1045508   ;;  %vm4159_vm4 = vcmask 1040384  }
  0x97   : > { %1689 = vmatpush.bf16.msra.mxu0 %v5552_v45  ;;  %5809 = vmatpush.bf16.msra.mxu1 %v5552_v45  ;;  %v5574_v40 = vld [vmem:[%s8131_s1 + $0x220] sm:$0xff]  ;;  %v5573_v54 = vld [vmem:[%s8131_s1 + $0x218] sm:$0xff]  ;;  %v5564_v16 = vld [vmem:[%s8131_s1 + $0x1d0] sm:$0xff] }
  0x98   : > { %v988_v3 = vld [vmem:[%s6630_s14] sm:$0xf]  ;;  %1747 = vmatpush.bf16.msra.mxu2 %v5568_v0  ;;  %v6640_v53 = vld [vmem:[%s6630_s14 + $0x4] sm:$0xf]  ;;  %v6643_v50 = vld [vmem:[%s6630_s14 + $0x8] sm:$0x1] }
  0x99   : > { %1776 = vmatpush.bf16.msra.mxu3 %v5576_v49  ;;  %v1144_v46 = vshrl.u32 %v988_v3, 16  ;;  %v1147_v23 = vshll.u32 %v988_v3, 16  ;;  %v1153_v19 = vshll.u32 %v6640_v53, 16  ;;  %v1157_v31 = vshrl.u32 %v6640_v53, 16  ;;  %v992_v33 = vld [vmem:[%s6630_s14 + $0x18] sm:$0xf]  ;;  %vm7133_vm11 = vmor %vm2234_vm9, %vm2235_vm10 }
  0x9a   : > { %v6649_v1 = vld [vmem:[%s6630_s14 + $0x1c] sm:$0xf]  ;;  %v1192_v36 = vshrl.u32 %v992_v33, 16  ;;  %v6657_v8 = vld [vmem:[%s6630_s14 + $0x20] sm:$0x1]  ;;  %v1195_v43 = vshll.u32 %v992_v33, 16  ;;  %vm7357_vm15 = vmor %vm2815_vm13, %vm2816_vm14 }
  0x9b   : > { %v1146_v55 = vrot.slane %v1144_v46, 4  ;;  %v1149_v11 = vrot.slane %v1147_v23, 5  ;;  %1690 = vmatpush.bf16.msra.mxu0 %v5551_v42  ;;  %5810 = vmatpush.bf16.msra.mxu1 %v5551_v42  ;;  %v6654_v5 = vrot.slane %v1153_v19, 5  ;;  %v1159_v4 = vrot.slane %v1157_v31, 4  ;;  %v994_v2 = vld [vmem:[%s6630_s14 + $0x24] sm:$0xf]  ;;  %vm7740_vm3 = vmor %vm3524_vm0, %vm3525_vm1 }
  0x9c   : > { %v2827_v60 = vrot.slane %v1157_v31, 5  ;;  %1748 = vmatpush.bf16.msra.mxu2 %v5567_v17  ;;  %v2828_v25 = vrot.slane %v1153_v19, 6  ;;  %v1194_v41 = vrot.slane %v1192_v36, 4  ;;  %v1163_v27 = vshll.u32 %v6643_v50, 16  ;;  %v6687_v58 = vld [vmem:[%s6630_s14 + $0x28] sm:$0xf] }
  0x9d   : > { %1777 = vmatpush.bf16.msra.mxu3 %v5575_v20  ;;  %v1150_v29 = vor.u32 %v1149_v11, %v1146_v55  ;;  %v1160_v15 = vor.u32 %v1159_v4, %v6654_v5  ;;  %v1201_v24 = vshll.u32 %v6649_v1, 16  ;;  %v1205_v34 = vshrl.u32 %v6649_v1, 16  ;;  %v6690_v61 = vld [vmem:[%s6630_s14 + $0x2c] sm:$0x1]  ;;  %v5572_v18 = vld [vmem:[%s8131_s1 + $0x210] sm:$0xff]  ;;  %v5589_v21 = vld [vmem:[%s8131_s1 + $0x298] sm:$0xff] }
  0x9e   : > { %v6672_v32 = vor.u32 %v2828_v25, %v2827_v60  ;;  %v1197_v30 = vrot.slane %v1195_v43, 5  ;;  %v1211_v51 = vshll.u32 %v6657_v8, 16  ;;  %v1216_v28 = vshrl.u32 %v994_v2, 16  ;;  %v990_v7 = vld [vmem:[%s6630_s14 + $0xc] sm:$0xf] }
  0x9f   : > { %1691 = vmatpush.bf16.msra.mxu0 %v5550_v22  ;;  %5811 = vmatpush.bf16.msra.mxu1 %v5550_v22  ;;  %v1203_v56 = vrot.slane %v1201_v24, 5  ;;  %v1207_v39 = vrot.slane %v1205_v34, 4  ;;  %v1151_v35 = vrot.slane %v1150_v29, 4  ;;  %v1161_v63 = vrot.slane %v1160_v15, 4  ;;  %v6717_v49 = vld [vmem:[%s6630_s14 + $0x10] sm:$0xf] }
  0xa0   : > { %1749 = vmatpush.bf16.msra.mxu2 %v5566_v38  ;;  %v1198_v57 = vor.u32 %v1197_v30, %v1194_v41  ;;  %v1165_v6 = vrot.slane %v1163_v27, 5  ;;  %v1219_v26 = vshll.u32 %v994_v2, 16  ;;  %v1213_v48 = vrot.slane %v1211_v51, 5  ;;  %v5547_v33 = vld [vmem:[%s8131_s1 + $0x148] sm:$0xff]  ;;  %v6740_v15 = vld [vmem:[%s6630_s14 + $0x34] sm:$0xf] }
  0xa1   : > { %1778 = vmatpush.bf16.msra.mxu3 %v5574_v40  ;;  %v1208_v59 = vor.u32 %v1207_v39, %v1203_v56  ;;  %v1218_v37 = vrot.slane %v1216_v28, 4  ;;  %v1225_v9 = vshll.u32 %v6687_v58, 16  ;;  %v1229_v14 = vshrl.u32 %v6687_v58, 16  ;;  %v5563_v60 = vld [vmem:[%s8131_s1 + $0x1c8] sm:$0xff]  ;;  %v996_v40 = vld [vmem:[%s6630_s14 + $0x30] sm:$0xf] }
  0xa2   : > { %v1199_v62 = vrot.slane %v1198_v57, 4  ;;  %v1221_v13 = vrot.slane %v1219_v26, 5  ;;  %v1235_v47 = vshll.u32 %v6690_v61, 16  ;;  %v1156_v45 = vsel %vm6694_vm8, %v1151_v35, %v6654_v5  ;;  %v5571_v38 = vld [vmem:[%s8131_s1 + $0x208] sm:$0xff]  ;;  %v5561_v57 = vld [vmem:[%s8131_s1 + $0x1b8] sm:$0xff]  ;;  %v5562_v26 = vld [vmem:[%s8131_s1 + $0x1c0] sm:$0xff] }
  0xa3   : > { %1692 = vmatpush.bf16.msra.mxu0 %v5549_v44  ;;  %5812 = vmatpush.bf16.msra.mxu1 %v5549_v44  ;;  %v1209_v12 = vrot.slane %v1208_v59, 4  ;;  %v1227_v0 = vrot.slane %v1225_v9, 5  ;;  %v1166_v42 = vsel %vm6694_vm8, %v1161_v63, %v1165_v6  ;;  %v1231_v17 = vrot.slane %v1229_v14, 4  ;;  %v5585_v28 = vld [vmem:[%s8131_s1 + $0x278] sm:$0xff]  ;;  %v6758_v63 = vld [vmem:[%s6630_s14 + $0x14] sm:$0x1] }
  0xa4   : > { %1750 = vmatpush.bf16.msra.mxu2 %v5565_v52  ;;  %v1222_v3 = vor.u32 %v1221_v13, %v1218_v37  ;;  %v1168_v20 = vshrl.u32 %v990_v7, 16  ;;  %v1204_v46 = vsel %vm6694_vm8, %v1199_v62, %v1203_v56  ;;  %v1237_v19 = vrot.slane %v1235_v47, 5  ;;  %v5546_v52 = vld [vmem:[%s8131_s1 + $0x140] sm:$0xff] }
  0xa5   : > { %1779 = vmatpush.bf16.msra.mxu3 %v5573_v54  ;;  %v1214_v23 = vsel %vm6694_vm8, %v1209_v12, %v1213_v48  ;;  %v1171_v31 = vshll.u32 %v990_v7, 16  ;;  %v1232_v11 = vor.u32 %v1231_v17, %v1227_v0  ;;  %v1177_v36 = vshll.u32 %v6717_v49, 16  ;;  %v5570_v62 = vld [vmem:[%s8131_s1 + $0x200] sm:$0xff] }
  0xa6   : > { %v1223_v55 = vrot.slane %v1222_v3, 4  ;;  %v1181_v22 = vshrl.u32 %v6717_v49, 16  ;;  %v1335_v5 = vunpack.c.l.b16 %v1156_v45  ;;  %v1336_v4 = vunpack.c.l.b16 %v1166_v42  ;;  %v5521_v42 = vld [vmem:[%s8131_s1 + $0x78] sm:$0xff] }
  0xa7   : > { %1693 = vmatpush.bf16.msra.mxu0 %v5548_v10  ;;  %5813 = vmatpush.bf16.msra.mxu1 %v5548_v10  ;;  %v1339_v29 = vunpack.c.l.b16 %v1204_v46  ;;  %v1340_v25 = vunpack.c.l.b16 %v1214_v23  ;;  %v1233_v41 = vrot.slane %v1232_v11, 4  ;;  %v1170_v43 = vrot.slane %v1168_v20, 4  ;;  %v6782_v3 = vld [vmem:[%s6630_s14 + $0x38] sm:$0x1]  ;;  %v5560_v46 = vld [vmem:[%s8131_s1 + $0x1b0] sm:$0xff] }
  0xa8   : > { %1751 = vmatpush.bf16.msra.mxu2 %v5564_v16  ;;  %v1228_v27 = vsel %vm6694_vm8, %v1223_v55, %v1227_v0  ;;  %v1173_v44 = vrot.slane %v1171_v31, 5  ;;  %v6744_v30 = vrot.slane %v1177_v36, 5  ;;  %v2850_v51 = vrot.slane %v1181_v22, 5  ;;  %v5529_v20 = vld [vmem:[%s8131_s1 + $0xb8] sm:$0xff]  ;;  %v5584_v23 = vld [vmem:[%s8131_s1 + $0x270] sm:$0xff] }
  0xa9   : > { %1780 = vmatpush.bf16.msra.mxu3 %v5572_v18  ;;  %v1238_v54 = vsel %vm6694_vm8, %v1233_v41, %v1237_v19  ;;  %v1183_v56 = vrot.slane %v1181_v22, 4  ;;  %v2851_v39 = vrot.slane %v1177_v36, 6  ;;  %v1240_v2 = vshrl.u32 %v996_v40, 16 }
  0xaa   : > { %v1343_v35 = vpack.c.b16 %v1336_v4, %v1335_v5  ;;  %v1243_v6 = vshll.u32 %v996_v40, 16  ;;  %v1249_v59 = vshll.u32 %v6740_v15, 16  ;;  %v1341_v48 = vunpack.c.l.b16 %v1228_v27  ;;  %v5520_v5 = vld [vmem:[%s8131_s1 + $0x70] sm:$0xff]  ;;  %v998_v40 = vld [vmem:[%s6630_s14 + $0x3c] sm:$0xf] }
  0xab   : > { %1694 = vmatpush.bf16.msra.mxu0 %v5547_v33  ;;  %5814 = vmatpush.bf16.msra.mxu1 %v5547_v33  ;;  %v1342_v37 = vunpack.c.l.b16 %v1238_v54  ;;  %v6767_v7 = vor.u32 %v2851_v39, %v2850_v51  ;;  %v1253_v10 = vshrl.u32 %v6740_v15, 16  ;;  %v6770_v12 = vpack.c.b16 %v1340_v25, %v1339_v29  ;;  %v5528_v4 = vld [vmem:[%s8131_s1 + $0xb0] sm:$0xff]  ;;  %v5519_v51 = vld [vmem:[%s8131_s1 + $0x68] sm:$0xff]  ;;  %v5558_v54 = vld [vmem:[%s8131_s1 + $0x1a0] sm:$0xff] }
  0xac   : > { %1752 = vmatpush.bf16.msra.mxu2 %v5563_v60  ;;  %v1242_v13 = vrot.slane %v1240_v2, 4  ;;  %v1245_v47 = vrot.slane %v1243_v6, 5  ;;  %v6774_v16 = vrot.slane %v1249_v59, 5  ;;  %v1174_v18 = vor.u32 %v1173_v44, %v1170_v43  ;;  %v5559_v60 = vld [vmem:[%s8131_s1 + $0x1a8] sm:$0xff]  ;;  %v6816_v43 = vld [vmem:[%s6630_s14 + $0x40] sm:$0xf] }
  0xad   : > { %1781 = vmatpush.bf16.msra.mxu3 %v5571_v38  ;;  %v1184_v45 = vor.u32 %v1183_v56, %v6744_v30  ;;  %v1187_v0 = vshll.u32 %v6758_v63, 16  ;;  %v1255_v17 = vrot.slane %v1253_v10, 4  ;;  %v6795_v19 = vpack.c.b16 %v1342_v37, %v1341_v48  ;;  %v5583_v38 = vld [vmem:[%s8131_s1 + $0x268] sm:$0xff]  ;;  %v5557_v48 = vld [vmem:[%s8131_s1 + $0x198] sm:$0xff] }
  0xae   : > { %v1246_v31 = vor.u32 %v1245_v47, %v1242_v13  ;;  %v1259_v55 = vshll.u32 %v6782_v3, 16  ;;  %v1175_v11 = vrot.slane %v1174_v18, 4  ;;  %v1264_v56 = vshrl.u32 %v998_v40, 16  ;;  %v5581_v37 = vld [vmem:[%s8131_s1 + $0x258] sm:$0xff] }
  0xaf   : > { %1695 = vmatpush.bf16.msra.mxu0 %v5546_v52  ;;  %5815 = vmatpush.bf16.msra.mxu1 %v5546_v52  ;;  %v1256_v33 = vor.u32 %v1255_v17, %v6774_v16  ;;  %v1185_v36 = vrot.slane %v1184_v45, 4  ;;  %v1189_v22 = vrot.slane %v1187_v0, 5  ;;  %v5527_v52 = vld [vmem:[%s8131_s1 + $0xa8] sm:$0xff]  ;;  %v1267_v39 = vshll.u32 %v998_v40, 16  ;;  %v6858_v17 = vld [vmem:[%s6630_s14 + $0x44] sm:$0x1] }
  0xb0   : > { %1753 = vmatpush.bf16.msra.mxu2 %v5562_v26  ;;  %v1247_v29 = vrot.slane %v1246_v31, 4  ;;  %v1261_v41 = vrot.slane %v1259_v55, 5  ;;  %v1180_v27 = vsel %vm6694_vm8, %v1175_v11, %v6744_v30  ;;  %v5582_v30 = vld [vmem:[%s8131_s1 + $0x260] sm:$0xff]  ;;  %v8142_v2 = vshll.u32 %v6816_v43, 16  ;;  %v5517_v11 = vld [vmem:[%s8131_s1 + $0x58] sm:$0xff]  ;;  %v5516_v40 = vld [vmem:[%s8131_s1 + $0x50] sm:$0xff] }
  0xb1   : > { %1782 = vmatpush.bf16.msra.mxu3 %v5570_v62  ;;  %v1257_v25 = vrot.slane %v1256_v33, 4  ;;  %v1190_v44 = vsel %vm6694_vm8, %v1185_v36, %v1189_v22  ;;  %v5518_v62 = vld [vmem:[%s8131_s1 + $0x60] sm:$0xff]  ;;  %v1266_v13 = vrot.slane %v1264_v56, 4  ;;  %v1269_v47 = vrot.slane %v1267_v39, 5  ;;  %v5555_v22 = vld [vmem:[%s8131_s1 + $0x188] sm:$0xff] }
  0xb2   : > { %1696 = vmatmul.bf16.vlgmr.msra.gmra.mxu0 %v1343_v35  ;;  %1706 = vmatmul.bf16.vlgmr.msra.gmra.mxu1 %v6770_v12  ;;  %v8143_v35 = vshrl.u32 %v6816_v43, 16  ;;  %v1252_v6 = vsel %vm6694_vm8, %v1247_v29, %v6774_v16  ;;  %v1275_v45 = vrot.slane %v8142_v2, 5  ;;  %v1283_v55 = vshll.u32 %v6858_v17, 16  ;;  %v5526_v36 = vld [vmem:[%s8131_s1 + $0xa0] sm:$0xff]  ;;  %v5525_v29 = vld [vmem:[%s8131_s1 + $0x98] sm:$0xff] }
  0xb3   : > { %1717 = vmatpush.bf16.msrb.mxu1 %v5561_v57  ;;  %1804 = vmatpush.bf16.msrb.mxu0 %v5585_v28  ;;  %v1337_v57 = vunpack.c.l.b16 %v1180_v27  ;;  %v1338_v28 = vunpack.c.l.b16 %v1190_v44  ;;  %v1262_v26 = vsel %vm6694_vm8, %v1257_v25, %v1261_v41  ;;  %v1351_v16 = vunpack.c.l.b16 %v1252_v6  ;;  %v1000_v25 = vld [vmem:[%s6630_s14 + $0x48] sm:$0xf]  ;;  %v6893_v41 = vld [vmem:[%s6630_s14 + $0x4c] sm:$0xf]  ;;  %v5554_v27 = vld [vmem:[%s8131_s1 + $0x180] sm:$0xff] }
  0xb4   : > { %2102 = vmatpush.bf16.msrb.mxu2 %v5521_v42  ;;  %1783 = vmatmul.bf16.vlgmr.msra.gmra.mxu3 %v6795_v19  ;;  %v1352_v18 = vunpack.c.l.b16 %v1262_v26  ;;  %v1279_v0 = vrot.slane %v8143_v35, 4  ;;  %v1270_v31 = vor.u32 %v1269_v47, %v1266_v13  ;;  %v5578_v44 = vld [vmem:[%s8131_s1 + $0x240] sm:$0xff]  ;;  %v1288_v56 = vshrl.u32 %v1000_v25, 16  ;;  %v5524_v6 = vld [vmem:[%s8131_s1 + $0x90] sm:$0xff] }
  0xb5   : > { %2131 = vmatpush.bf16.msrb.mxu3 %v5529_v20  ;;  %1754 = vmatmul.bf16.vlgmr.msra.gmra.mxu2 %v6770_v12  ;;  %v6855_v42 = vpack.c.b16 %v1338_v28, %v1337_v57  ;;  %v5556_v20 = vld [vmem:[%s8131_s1 + $0x190] sm:$0xff]  ;;  %v1291_v39 = vshll.u32 %v1000_v25, 16  ;;  %v8141_v57 = vshll.u32 %v6893_v41, 16  ;;  %v8140_v28 = vshrl.u32 %v6893_v41, 16 }
  0xb6   : > { %v1280_v33 = vor.u32 %v1279_v0, %v1275_v45  ;;  %v1290_v13 = vrot.slane %v1288_v56, 4  ;;  %v5593_v56 = vld [vmem:[%s8131_s1 + $0x2b8] sm:$0xff] }
  0xb7   : > { %1718 = vmatpush.bf16.msrb.mxu1 %v5560_v46  ;;  %1805 = vmatpush.bf16.msrb.mxu0 %v5584_v23  ;;  %v5580_v46 = vld [vmem:[%s8131_s1 + $0x250] sm:$0xff]  ;;  %v6866_v23 = vpack.c.b16 %v1352_v18, %v1351_v16  ;;  %v1293_v47 = vrot.slane %v1291_v39, 5  ;;  %v1299_v16 = vrot.slane %v8141_v57, 5  ;;  %v1303_v18 = vrot.slane %v8140_v28, 4  ;;  %v5507_v39 = vld [vmem:[%s8131_s1 + $0x8] sm:$0xff] }
  0xb8   : > { %2103 = vmatpush.bf16.msrb.mxu2 %v5520_v5  ;;  %v5579_v5 = vld [vmem:[%s8131_s1 + $0x248] sm:$0xff] }
  0xb9   : > { %2132 = vmatpush.bf16.msrb.mxu3 %v5528_v4  ;;  %v1271_v4 = vrot.slane %v1270_v31, 4  ;;  %v5511_v31 = vld [vmem:[%s8131_s1 + $0x28] sm:$0xff] }
  0xbb   : > { %1719 = vmatpush.bf16.msrb.mxu1 %v5559_v60  ;;  %1806 = vmatpush.bf16.msrb.mxu0 %v5583_v38  ;;  %v1281_v60 = vrot.slane %v1280_v33, 4  ;;  %v1285_v38 = vrot.slane %v1283_v55, 5  ;;  %v1294_v33 = vor.u32 %v1293_v47, %v1290_v13  ;;  %v1304_v55 = vor.u32 %v1303_v18, %v1299_v16  ;;  %v5506_v18 = vld [vmem:[%s8131_s1] sm:$0xff] }
  0xbc   : > { %2104 = vmatpush.bf16.msrb.mxu2 %v5519_v51  ;;  %v5513_v51 = vld [vmem:[%s8131_s1 + $0x38] sm:$0xff] }
  0xbd   : > { %2133 = vmatpush.bf16.msrb.mxu3 %v5527_v52  ;;  %v1276_v52 = vsel %vm6694_vm8, %v1271_v4, %v1275_v45  ;;  %v6927_v45 = vld [vmem:[%s6630_s14 + $0x50] sm:$0x1]  ;;  %v1305_v4 = vrot.slane %v1304_v55, 4  ;;  %v5530_v55 = vld [vmem:[%s8131_s1 + $0xc0] sm:$0xff] }
  0xbe   : > { %v1355_v26 = vunpack.c.l.b16 %v1276_v52  ;;  %v5508_v52 = vld [vmem:[%s8131_s1 + $0x10] sm:$0xff] }
  0xbf   : > { %1720 = vmatpush.bf16.msrb.mxu1 %v5558_v54  ;;  %1807 = vmatpush.bf16.msrb.mxu0 %v5582_v30  ;;  %v1286_v54 = vsel %vm6694_vm8, %v1281_v60, %v1285_v38  ;;  %v5537_v30 = vld [vmem:[%s8131_s1 + $0xf8] sm:$0xff]  ;;  %v5510_v38 = vld [vmem:[%s8131_s1 + $0x20] sm:$0xff] }
  0xc0   : > { %2105 = vmatpush.bf16.msrb.mxu2 %v5518_v62  ;;  %v1356_v62 = vunpack.c.l.b16 %v1286_v54 }
  0xc1   : > { %2134 = vmatpush.bf16.msrb.mxu3 %v5526_v36  ;;  %v5535_v36 = vld [vmem:[%s8131_s1 + $0xe8] sm:$0xff] }
  0xc2   : > { %1701 = vmatmul.bf16.gmra.mxu0 %v6855_v42  ;;  %1711 = vmatmul.bf16.gmra.mxu1 %v6795_v19  ;;  %v1357_v0 = vpack.c.b16 %v1356_v62, %v1355_v26  ;;  %v1002_v26 = vld [vmem:[%s6630_s14 + $0x54] sm:$0xf]  ;;  %v6982_v62 = vld [vmem:[%s6630_s14 + $0x58] sm:$0xf] }
  0xc3   : > { %1721 = vmatpush.bf16.msrb.mxu1 %v5557_v48  ;;  %1808 = vmatpush.bf16.msrb.mxu0 %v5581_v37  ;;  %v5512_v48 = vld [vmem:[%s8131_s1 + $0x30] sm:$0xff]  ;;  %v1315_v13 = vshll.u32 %v1002_v26, 16  ;;  %v8139_v47 = vshll.u32 %v6982_v62, 16 }
  0xc4   : > { %1788 = vmatmul.bf16.gmra.mxu3 %v6866_v23  ;;  %2106 = vmatpush.bf16.msrb.mxu2 %v5517_v11  ;;  %v5536_v37 = vld [vmem:[%s8131_s1 + $0xf0] sm:$0xff]  ;;  %v1307_v11 = vshll.u32 %v6927_v45, 16 }
  0xc5   : > { %1759 = vmatmul.bf16.gmra.mxu2 %v6795_v19  ;;  %2135 = vmatpush.bf16.msrb.mxu3 %v5525_v29 }
  0xc6   : > { %v1309_v60 = vrot.slane %v1307_v11, 5  ;;  %v7006_v11 = vld [vmem:[%s6630_s14 + $0x5c] sm:$0x1] }
  0xc7   : > { %1722 = vmatpush.bf16.msrb.mxu1 %v5556_v20  ;;  %1809 = vmatpush.bf16.msrb.mxu0 %v5580_v46  ;;  %v5515_v20 = vld [vmem:[%s8131_s1 + $0x48] sm:$0xff] }
  0xc8   : > { %2107 = vmatpush.bf16.msrb.mxu2 %v5516_v40  ;;  %v5523_v46 = vld [vmem:[%s8131_s1 + $0x88] sm:$0xff]  ;;  %v5534_v40 = vld [vmem:[%s8131_s1 + $0xe0] sm:$0xff]  ;;  %v1310_v25 = vsel %vm6694_vm8, %v1305_v4, %v1309_v60  ;;  %v7013_v4 = vld [vmem:[%s6630_s14 + $0x18] sm:$0xff] }
  0xc9   : > { %2136 = vmatpush.bf16.msrb.mxu3 %v5524_v6  ;;  %v5532_v6 = vld [vmem:[%s8131_s1 + $0xd0] sm:$0xff]  ;;  %v5545_v60 = vld [vmem:[%s8131_s1 + $0x138] sm:$0xff] }
  0xcb   : > { %1723 = vmatpush.bf16.msrb.mxu1 %v5555_v22  ;;  %1810 = vmatpush.bf16.msrb.mxu0 %v5579_v5  ;;  %v5522_v22 = vld [vmem:[%s8131_s1 + $0x80] sm:$0xff]  ;;  %v1295_v5 = vrot.slane %v1294_v33, 4 }
  0xcc   : > { %2108 = vmatpush.bf16.msrb.mxu2 %v5515_v20 }
  0xcd   : > { %2137 = vmatpush.bf16.msrb.mxu3 %v5523_v46  ;;  %v1300_v29 = vsel %vm6694_vm8, %v1295_v5, %v1299_v16  ;;  %v8138_v16 = vshrl.u32 %v6982_v62, 16  ;;  %v1317_v46 = vrot.slane %v1315_v13, 5  ;;  %v7010_v5 = vld [vmem:[%s6630_s14 + $0xc] sm:$0xff]  ;;  %v5597_v13 = vld [vmem:[%s8131_s1 + $0x2d8] sm:$0xff] }
  0xcf   : > { %1724 = vmatpush.bf16.msrb.mxu1 %v5554_v27  ;;  %1811 = vmatpush.bf16.msrb.mxu0 %v5578_v44  ;;  %v5509_v27 = vld [vmem:[%s8131_s1 + $0x18] sm:$0xff]  ;;  %v1359_v44 = vunpack.c.l.b16 %v1300_v29  ;;  %v1327_v33 = vrot.slane %v8138_v16, 4 }
  0xd1   : > { %2138 = vmatpush.bf16.msrb.mxu3 %v5522_v22  ;;  %v1331_v22 = vshll.u32 %v7006_v11, 16 }
  0xd2   : > { %1725 = vmatmul.bf16.vlgmr.msrb.gmra.mxu1 %v6855_v42  ;;  %1812 = vmatmul.bf16.vlgmr.msrb.gmra.mxu0 %v6866_v23  ;;  %v5514_v42 = vld [vmem:[%s8131_s1 + $0x40] sm:$0xff] }
  0xd3   : > { %2073 = vmatpush.bf16.msra.mxu1 %v5513_v51  ;;  %2160 = vmatpush.bf16.msra.mxu0 %v5537_v30  ;;  %v1360_v51 = vunpack.c.l.b16 %v1310_v25  ;;  %v5533_v30 = vld [vmem:[%s8131_s1 + $0xd8] sm:$0xff] }
  0xd4   : > { %1793 = vmatmul.bf16.gmra.mxu3 %v1357_v0  ;;  %2109 = vmatpush.bf16.msrb.mxu2 %v5514_v42 }
  0xd5   : > { %1764 = vmatmul.bf16.gmra.mxu2 %v6866_v23  ;;  %v1361_v54 = vpack.c.b16 %v1360_v51, %v1359_v44  ;;  %v5590_v44 = vld [vmem:[%s8131_s1 + $0x2a0] sm:$0xff]  ;;  %v5599_v51 = vld [vmem:[%s8131_s1 + $0x2e8] sm:$0xff] }
  0xd7   : > { %2074 = vmatpush.bf16.msra.mxu1 %v5512_v48  ;;  %2161 = vmatpush.bf16.msra.mxu0 %v5536_v37  ;;  %v5601_v48 = vld [vmem:[%s8131_s1 + $0x2f8] sm:$0xff]  ;;  %v1312_v37 = vshrl.u32 %v1002_v26, 16  ;;  %v5543_v26 = vld [vmem:[%s8131_s1 + $0x128] sm:$0xff] }
  0xd8   : > { %2654 = vmatpush.bf16.msra.mxu2 %v5593_v56  ;;  %2683 = vmatpush.bf16.msra.mxu3 %v5601_v48  ;;  %v5598_v48 = vld [vmem:[%s8131_s1 + $0x2e0] sm:$0xff] }
  0xd9   : > { %v1314_v20 = vrot.slane %v1312_v37, 4  ;;  %v5588_v37 = vld [vmem:[%s8131_s1 + $0x290] sm:$0xff] }
  0xdb   : > { %2075 = vmatpush.bf16.msra.mxu1 %v5511_v31  ;;  %2162 = vmatpush.bf16.msra.mxu0 %v5535_v36  ;;  %v1323_v31 = vrot.slane %v8139_v47, 5  ;;  %v1318_v36 = vor.u32 %v1317_v46, %v1314_v20  ;;  %v5498_v20 = vld [vmem:[%s6630_s14] sm:$0xff]  ;;  %v7075_v46 = vld [vmem:[%s6630_s14 + $0x30] sm:$0xff] }
  0xdd   : > { %v1328_v42 = vor.u32 %v1327_v33, %v1323_v31  ;;  %v1319_v29 = vrot.slane %v1318_v36, 4  ;;  %v5595_v33 = vld [vmem:[%s8131_s1 + $0x2c8] sm:$0xff] }
  0xde   : > { %v5607_v36 = vld [vmem:[%s8131_s1 + $0x328] sm:$0xff] }
  0xdf   : > { %2076 = vmatpush.bf16.msra.mxu1 %v5510_v38  ;;  %2163 = vmatpush.bf16.msra.mxu0 %v5534_v40  ;;  %v5591_v38 = vld [vmem:[%s8131_s1 + $0x2a8] sm:$0xff]  ;;  %v5600_v40 = vld [vmem:[%s8131_s1 + $0x2f0] sm:$0xff]  ;;  %v1329_v25 = vrot.slane %v1328_v42, 4  ;;  %v5586_v42 = vld [vmem:[%s8131_s1 + $0x280] sm:$0xff] }
  0xe0   : > { %2684 = vmatpush.bf16.msra.mxu3 %v5600_v40  ;;  %v7105_v40 = vld [vmem:[%s6630_s14 + $0x3c] sm:$0xff] }
  0xe2   : > { %1730 = vmatmul.bf16.gmra.mxu1 %v6770_v12  ;;  %1817 = vmatmul.bf16.gmra.mxu0 %v1357_v0  ;;  %v5592_v12 = vld [vmem:[%s8131_s1 + $0x2b0] sm:$0xff] }
  0xe3   : > { %2077 = vmatpush.bf16.msra.mxu1 %v5509_v27  ;;  %2164 = vmatpush.bf16.msra.mxu0 %v5533_v30  ;;  %v1333_v27 = vrot.slane %v1331_v22, 5  ;;  %v5594_v22 = vld [vmem:[%s8131_s1 + $0x2c0] sm:$0xff] }
  0xe4   : > { %1798 = vmatmul.bf16.gmra.mxu3 %v1361_v54  ;;  %2655 = vmatpush.bf16.msra.mxu2 %v5592_v12  ;;  %v5609_v12 = vld [vmem:[%s8131_s1 + $0x338] sm:$0xff] }
  0xe5   : > { %1769 = vmatmul.bf16.gmra.mxu2 %v1357_v0  ;;  %v5531_v0 = vld [vmem:[%s8131_s1 + $0xc8] sm:$0xff]  ;;  %2685 = vmatpush.bf16.msra.mxu3 %v5599_v51  ;;  %v7121_v51 = vld [vmem:[%s6630_s14] sm:$0xe] }
  0xe7   : > { %2078 = vmatpush.bf16.msra.mxu1 %v5508_v52  ;;  %2165 = vmatpush.bf16.msra.mxu0 %v5532_v6  ;;  %v1324_v52 = vsel %vm6694_vm8, %v1319_v29, %v1323_v31  ;;  %v7041_v6 = vld [vmem:[%s6630_s14 + $0x24] sm:$0xff]  ;;  %v5605_v29 = vld [vmem:[%s8131_s1 + $0x318] sm:$0xff] }
  0xe8   : > { %2656 = vmatpush.bf16.msra.mxu2 %v5591_v38  ;;  %v1363_v30 = vunpack.c.l.b16 %v1324_v52  ;;  %v5587_v31 = vld [vmem:[%s8131_s1 + $0x288] sm:$0xff]  ;;  %v5606_v38 = vld [vmem:[%s8131_s1 + $0x320] sm:$0xff] }
  0xe9   : > { %2686 = vmatpush.bf16.msra.mxu3 %v5598_v48  ;;  %v7124_v52 = vld [vmem:[%s6630_s14 + $0xc] sm:$0xe] }
  0xeb   : > { %2079 = vmatpush.bf16.msra.mxu1 %v5507_v39  ;;  %2166 = vmatpush.bf16.msra.mxu0 %v5531_v0  ;;  %v5596_v0 = vld [vmem:[%s8131_s1 + $0x2d0] sm:$0xff] }
  0xec   : > { %2657 = vmatpush.bf16.msra.mxu2 %v5590_v44  ;;  %v5625_v44 = vld [vmem:[%s8131_s1 + $0x3b8] sm:$0xff] }
  0xed   : > { %2687 = vmatpush.bf16.msra.mxu3 %v5597_v13 }
  0xef   : > { %2080 = vmatpush.bf16.msra.mxu1 %v5506_v18  ;;  %2167 = vmatpush.bf16.msra.mxu0 %v5530_v55  ;;  %v5608_v18 = vld [vmem:[%s8131_s1 + $0x330] sm:$0xff]  ;;  %v5541_v55 = vld [vmem:[%s8131_s1 + $0x118] sm:$0xff] }
  0xf0   : > { %2658 = vmatpush.bf16.msra.mxu2 %v5589_v21  ;;  %v5603_v21 = vld [vmem:[%s8131_s1 + $0x308] sm:$0xff] }
  0xf1   : > { %2688 = vmatpush.bf16.msra.mxu3 %v5596_v0 }
  0xf2   : > { %1735 = vmatmul.bf16.gmra.mxu1 %v6795_v19  ;;  %1822 = vmatmul.bf16.gmra.mxu0 %v1361_v54  ;;  %v5544_v19 = vld [vmem:[%s8131_s1 + $0x130] sm:$0xff]  ;;  %v1334_v54 = vsel %vm6694_vm8, %v1329_v25, %v1333_v27  ;;  %v2239_v25 = vrot.slane %v6640_v53, 5  ;;  %v2246_v27 = vrot.slane %v6717_v49, 5  ;;  %v2242_v53 = vrot.slane %v6643_v50, 5 }
  0xf3   : > { %2189 = vmatpush.bf16.msrb.mxu1 %v5545_v60  ;;  %v1364_v56 = vunpack.c.l.b16 %v1334_v54  ;;  %2712 = vmatpush.bf16.msrb.mxu0 %v5609_v12  ;;  %v5540_v60 = vld [vmem:[%s8131_s1 + $0x110] sm:$0xff]  ;;  %v2249_v49 = vrot.slane %v6758_v63, 5  ;;  %v5538_v63 = vld [vmem:[%s8131_s1 + $0x100] sm:$0xff]  ;;  %v7589_v54 = vld [vmem:[%s6630_s14 + $0x38] sm:$0x3] }
  0xf4   : > { %2139 = vmatmul.bf16.vlgmr.msrb.gmra.mxu3 %v7013_v4  ;;  %2659 = vmatpush.bf16.msra.mxu2 %v5588_v37  ;;  %v2248_v50 = vrot.slane %v2246_v27, 4 }
  0xf5   : > { %2110 = vmatmul.bf16.vlgmr.msrb.gmra.mxu2 %v7010_v5  ;;  %v1365_v39 = vpack.c.b16 %v1364_v56, %v1363_v30  ;;  %2689 = vmatpush.bf16.msra.mxu3 %v5595_v33  ;;  %v4759_v30 = vrot.slane %v7121_v51, 9  ;;  %v2241_v56 = vrot.slane %v2239_v25, 4 }
  0xf6   : > { %v2250_v37 = vsel %vm7133_vm11, %v2248_v50, %v2249_v49 }
  0xf7   : > { %2190 = vmatpush.bf16.msrb.mxu1 %v5544_v19  ;;  %2713 = vmatpush.bf16.msrb.mxu0 %v5608_v18  ;;  %v5539_v19 = vld [vmem:[%s8131_s1 + $0x108] sm:$0xff]  ;;  %v2240_v12 = vsel %vm7133_vm11, %v4759_v30, %v2239_v25  ;;  %v2243_v48 = vsel %vm7133_vm11, %v2241_v56, %v2242_v53  ;;  %v2256_v25 = vrot.slane %v6657_v8, 5 }
  0xf8   : > { %2660 = vmatpush.bf16.msra.mxu2 %v5587_v31  ;;  %v2301_v13 = vunpack.c.l.b16 %v2240_v12  ;;  %v2302_v18 = vunpack.c.l.b16 %v2243_v48  ;;  %v5602_v31 = vld [vmem:[%s8131_s1 + $0x300] sm:$0xff]  ;;  %v7191_v56 = vld [vmem:[%s6630_s14 + $0x48] sm:$0xff] }
  0xf9   : > { %2690 = vmatpush.bf16.msra.mxu3 %v5594_v22  ;;  %v2253_v22 = vrot.slane %v6649_v1, 5 }
  0xfb   : > { %2191 = vmatpush.bf16.msrb.mxu1 %v5543_v26  ;;  %2714 = vmatpush.bf16.msrb.mxu0 %v5607_v36  ;;  %v5624_v26 = vld [vmem:[%s8131_s1 + $0x3b0] sm:$0xff]  ;;  %v2309_v36 = vpack.c.b16 %v2302_v18, %v2301_v13  ;;  %v2260_v18 = vrot.slane %v6687_v58, 5  ;;  %v2296_v58 = vrot.slane %v6982_v62, 5 }
  0xfc   : > { %2661 = vmatpush.bf16.msra.mxu2 %v5586_v42 }
  0xff   : > { %2715 = vmatpush.bf16.msrb.mxu0 %v5606_v38 }
 0x100   : > { %2770 = vmatpush.bf16.msrb.mxu2 %v5625_v44 }
 0x102   : > { %1740 = vmatmul.bf16.gmra.mxu1 %v6866_v23  ;;  %1827 = vmatmul.bf16.gmra.mxu0 %v1365_v39  ;;  %v5542_v23 = vld [vmem:[%s8131_s1 + $0x120] sm:$0xff]  ;;  %v4760_v39 = vrot.slane %v7124_v52, 9 }
 0x103   : > { %2192 = vmatpush.bf16.msrb.mxu1 %v5542_v23  ;;  %2716 = vmatpush.bf16.msrb.mxu0 %v5605_v29  ;;  %v2255_v29 = vrot.slane %v2253_v22, 4 }
 0x104   : > { %2144 = vmatmul.bf16.gmra.mxu3 %v7041_v6  ;;  %2771 = vmatpush.bf16.msrb.mxu2 %v5624_v26  ;;  %v2247_v23 = vsel %vm7133_vm11, %v4760_v39, %v2246_v27  ;;  %v5633_v27 = vld [vmem:[%s8131_s1 + $0x3f8] sm:$0xff]  ;;  %v5616_v26 = vld [vmem:[%s8131_s1 + $0x370] sm:$0xff] }
 0x105   : > { %2115 = vmatmul.bf16.gmra.mxu2 %v7013_v4  ;;  %v2303_v0 = vunpack.c.l.b16 %v2247_v23  ;;  %3355 = vmatpush.bf16.msrb.mxu3 %v5633_v27  ;;  %v2257_v30 = vsel %vm7133_vm11, %v2255_v29, %v2256_v25 }
 0x106   : > { %v2306_v50 = vunpack.c.l.b16 %v2257_v30 }
 0x107   : > { %2193 = vmatpush.bf16.msrb.mxu1 %v5541_v55 }
 0x10b   : > { %2194 = vmatpush.bf16.msrb.mxu1 %v5540_v60  ;;  %v7167_v60 = vld [vmem:[%s6630_s14 + $0x18] sm:$0xe] }
 0x10c   : > { %v4761_v38 = vrot.slane %v7167_v60, 9 }
 0x10e   : > { %v2254_v8 = vsel %vm7133_vm11, %v4761_v38, %v2253_v22  ;;  %v5631_v22 = vld [vmem:[%s8131_s1 + $0x3e8] sm:$0xff]  ;;  %v5621_v38 = vld [vmem:[%s8131_s1 + $0x398] sm:$0xff] }
 0x10f   : > { %2195 = vmatpush.bf16.msrb.mxu1 %v5539_v19  ;;  %v5623_v19 = vld [vmem:[%s8131_s1 + $0x3a8] sm:$0xff]  ;;  %v2305_v39 = vunpack.c.l.b16 %v2254_v8 }
 0x110   : > { %2772 = vmatpush.bf16.msrb.mxu2 %v5623_v19 }
 0x111   : > { %v2311_v13 = vpack.c.b16 %v2306_v50, %v2305_v39  ;;  %v5620_v39 = vld [vmem:[%s8131_s1 + $0x390] sm:$0xff]  ;;  %v5630_v50 = vld [vmem:[%s8131_s1 + $0x3e0] sm:$0xff] }
 0x112   : > { %2081 = vmatmul.bf16.vlgmr.msra.gmra.mxu1 %v5498_v20  ;;  %2168 = vmatmul.bf16.vlgmr.msra.gmra.mxu0 %v7041_v6  ;;  %v2304_v20 = vunpack.c.l.b16 %v2250_v37 }
 0x113   : > { %2196 = vmatpush.bf16.msrb.mxu1 %v5538_v63  ;;  %v5632_v63 = vld [vmem:[%s8131_s1 + $0x3f0] sm:$0xff] }
 0x114   : > { %2149 = vmatmul.bf16.gmra.mxu3 %v7075_v46  ;;  %v2310_v42 = vpack.c.b16 %v2304_v20, %v2303_v0  ;;  %v7214_v0 = vld [vmem:[%s6630_s14 + $0x24] sm:$0xe] }
 0x115   : > { %2120 = vmatmul.bf16.gmra.mxu2 %v7041_v6  ;;  %3356 = vmatpush.bf16.msrb.mxu3 %v5632_v63  ;;  %v4762_v20 = vrot.slane %v7214_v0, 9  ;;  %v5614_v63 = vld [vmem:[%s8131_s1 + $0x360] sm:$0xff] }
 0x119   : > { %3357 = vmatpush.bf16.msrb.mxu3 %v5631_v22 }
 0x11d   : > { %3358 = vmatpush.bf16.msrb.mxu3 %v5630_v50 }
 0x122   : > { %2086 = vmatmul.bf16.gmra.mxu1 %v7010_v5  ;;  %2173 = vmatmul.bf16.gmra.mxu0 %v7075_v46  ;;  %v5604_v5 = vld [vmem:[%s8131_s1 + $0x310] sm:$0xff] }
 0x123   : > { %2717 = vmatpush.bf16.msrb.mxu0 %v5604_v5 }
 0x124   : > { %2154 = vmatmul.bf16.gmra.mxu3 %v7105_v40 }
 0x125   : > { %2125 = vmatmul.bf16.gmra.mxu2 %v7075_v46 }
 0x127   : > { %2718 = vmatpush.bf16.msrb.mxu0 %v5603_v21  ;;  %v5622_v21 = vld [vmem:[%s8131_s1 + $0x3a0] sm:$0xff] }
 0x128   : > { %2773 = vmatpush.bf16.msrb.mxu2 %v5622_v21 }
 0x12b   : > { %2719 = vmatpush.bf16.msrb.mxu0 %v5602_v31  ;;  %v2262_v31 = vrot.slane %v2260_v18, 4 }
 0x12c   : > { %2774 = vmatpush.bf16.msrb.mxu2 %v5621_v38 }
 0x12f   : > { %v7159_v33 = vpop.f32.mrf.mxu0  ;;  %v7161_v55 = vpop.f32.mrf.mxu1 }
 0x130   : > { %2775 = vmatpush.bf16.msrb.mxu2 %v5620_v39  ;;  %v5629_v39 = vld [vmem:[%s8131_s1 + $0x3d8] sm:$0xff] }
 0x131   : > { %3359 = vmatpush.bf16.msrb.mxu3 %v5629_v39  ;;  %v7304_v39 = vld [vmem:[%s6630_s14 + $0x8] sm:$0x3] }
 0x132   : > { %2091 = vmatmul.bf16.gmra.mxu1 %v7013_v4  ;;  %2178 = vmatmul.bf16.gmra.mxu0 %v7105_v40  ;;  %v5617_v4 = vld [vmem:[%s8131_s1 + $0x378] sm:$0xff] }
 0x133   : > { %2741 = vmatpush.bf16.msra.mxu1 %v5617_v4  ;;  %v2261_v4 = vsel %vm7133_vm11, %v4762_v20, %v2260_v18 }
 0x134   : > { %2691 = vmatmul.bf16.vlgmr.msra.gmra.mxu3 %v2310_v42  ;;  %v2307_v8 = vunpack.c.l.b16 %v2261_v4 }
 0x135   : > { %2662 = vmatmul.bf16.vlgmr.msra.gmra.mxu2 %v2309_v36  ;;  %v2263_v36 = vrot.slane %v6690_v61, 5  ;;  %v5641_v61 = vld [vmem:[%s8131_s1 + $0x438] sm:$0xff] }
 0x136   : > { %3384 = vmatpush.bf16.msra.mxu0 %v5641_v61  ;;  %v2269_v61 = vrot.slane %v6740_v15, 5  ;;  %v5658_v15 = vld [vmem:[%s8131_s1 + $0x4c0] sm:$0xff] }
 0x137   : > { %v7180_v44 = vpop.f32.mrf.mxu0  ;;  %v7182_v53 = vpop.f32.mrf.mxu1  ;;  %2742 = vmatpush.bf16.msra.mxu1 %v5616_v26  ;;  %v2264_v19 = vsel %vm7133_vm11, %v2262_v31, %v2263_v36  ;;  %v5640_v26 = vld [vmem:[%s8131_s1 + $0x430] sm:$0xff] }
 0x138   : > { %v1755_v49 = vpop.f32.mrf.mxu2  ;;  %v7184_v5 = vpop.f32.mrf.mxu3  ;;  %v2308_v30 = vunpack.c.l.b16 %v2264_v19  ;;  %v5618_v19 = vld [vmem:[%s8131_s1 + $0x380] sm:$0xff] }
 0x13a   : > { %v7259_v22 = vpack.c.b16 %v2308_v30, %v2307_v8  ;;  %3385 = vmatpush.bf16.msra.mxu0 %v5640_v26  ;;  %v2272_v30 = vrot.slane %v6782_v3, 5 }
 0x13f   : > { %v7202_v12 = vpop.f32.mrf.mxu0  ;;  %v7204_v48 = vpop.f32.mrf.mxu1 }
 0x140   : > { %v7206_v23 = vpop.f32.mrf.mxu2  ;;  %v7208_v37 = vpop.f32.mrf.mxu3 }
 0x142   : > { %2096 = vmatmul.bf16.gmra.mxu1 %v7041_v6  ;;  %2183 = vmatmul.bf16.gmra.mxu0 %v7191_v56  ;;  %v5615_v6 = vld [vmem:[%s8131_s1 + $0x368] sm:$0xff] }
 0x143   : > { %2743 = vmatpush.bf16.msra.mxu1 %v5615_v6  ;;  %v5619_v6 = vld [vmem:[%s8131_s1 + $0x388] sm:$0xff] }
 0x144   : > { %2696 = vmatmul.bf16.gmra.mxu3 %v2311_v13  ;;  %2776 = vmatpush.bf16.msrb.mxu2 %v5619_v6 }
 0x145   : > { %2667 = vmatmul.bf16.gmra.mxu2 %v2310_v42 }
 0x147   : > { %v7227_v29 = vpop.f32.mrf.mxu0  ;;  %v7229_v42 = vpop.f32.mrf.mxu1  ;;  %2744 = vmatpush.bf16.msra.mxu1 %v5614_v63 }
 0x148   : > { %v7234_v25 = vpop.f32.mrf.mxu2  ;;  %v7236_v27 = vpop.f32.mrf.mxu3  ;;  %2777 = vmatpush.bf16.msrb.mxu2 %v5618_v19 }
 0x14f   : > { %v1726_v21 = vpop.f32.mrf.mxu1  ;;  %v1813_v18 = vpop.f32.mrf.mxu0 }
 0x150   : > { %v1727_v20 = vadd.f32 %v1726_v21, %v7159_v33  ;;  %v7255_v31 = vpop.f32.mrf.mxu2  ;;  %v7257_v36 = vpop.f32.mrf.mxu3  ;;  %v7267_v33 = vld [vmem:[%s6630_s14 + $0x30] sm:$0xe] }
 0x152   : > { %v1756_v38 = vadd.f32 %v1755_v49, %v1727_v20  ;;  %2197 = vmatmul.bf16.vlgmr.msrb.gmra.mxu1 %v7075_v46  ;;  %2720 = vmatmul.bf16.vlgmr.msrb.gmra.mxu0 %v2311_v13  ;;  %v4763_v49 = vrot.slane %v7267_v33, 9  ;;  %v2271_v46 = vrot.slane %v2269_v61, 4  ;;  %v2822_v20 = vshll.u32 %v7121_v51, 16 }
 0x154   : > { %v1785_v4 = vadd.f32 %v7184_v5, %v1756_v38  ;;  %2701 = vmatmul.bf16.gmra.mxu3 %v7259_v22  ;;  %v5613_v5 = vld [vmem:[%s8131_s1 + $0x358] sm:$0xff]  ;;  %v2270_v38 = vsel %vm7133_vm11, %v4763_v49, %v2269_v61  ;;  %v5612_v49 = vld [vmem:[%s8131_s1 + $0x350] sm:$0xff] }
 0x155   : > { %2672 = vmatmul.bf16.gmra.mxu2 %v2311_v13  ;;  %v5639_v13 = vld [vmem:[%s8131_s1 + $0x428] sm:$0xff]  ;;  %2745 = vmatpush.bf16.msra.mxu1 %v5613_v5 }
 0x156   : > { %v7274_v8 = vadd.f32 %v1813_v18, %v1785_v4  ;;  %v2819_v18 = vshrl.u32 %v7121_v51, 16  ;;  %3386 = vmatpush.bf16.msra.mxu0 %v5639_v13  ;;  %v2273_v4 = vsel %vm7133_vm11, %v2271_v46, %v2272_v30  ;;  %v2317_v13 = vunpack.c.l.b16 %v2270_v38  ;;  %v5638_v51 = vld [vmem:[%s8131_s1 + $0x420] sm:$0xff] }
 0x157   : > { %v1728_v50 = vpop.f32.mrf.mxu1  ;;  %v1815_v63 = vpop.f32.mrf.mxu0  ;;  %v2833_v46 = vshrl.u32 %v7304_v39, 16  ;;  %v2842_v38 = vshrl.u32 %v7124_v52, 16 }
 0x158   : > { %v1729_v26 = vadd.f32 %v1728_v50, %v7180_v44  ;;  %v7288_v21 = vpop.f32.mrf.mxu2  ;;  %v7290_v3 = vpop.f32.mrf.mxu3  ;;  %v5628_v44 = vld [vmem:[%s8131_s1 + $0x3d0] sm:$0xff]  ;;  %v2821_v5 = vrot.slane %v2819_v18, 5  ;;  %v2318_v50 = vunpack.c.l.b16 %v2273_v4  ;;  %v5627_v18 = vld [vmem:[%s8131_s1 + $0x3c8] sm:$0xff]  ;;  %v2845_v4 = vshll.u32 %v7124_v52, 16  ;;  %v5626_v52 = vld [vmem:[%s8131_s1 + $0x3c0] sm:$0xff] }
 0x159   : > { %3360 = vmatpush.bf16.msrb.mxu3 %v5628_v44  ;;  %2746 = vmatpush.bf16.msra.mxu1 %v5612_v49 }
 0x15a   : > { %v1758_v6 = vadd.f32 %v7206_v23, %v1729_v26  ;;  %v2824_v23 = vrot.slane %v2822_v20, 6  ;;  %3387 = vmatpush.bf16.msra.mxu0 %v5638_v51  ;;  %v7326_v44 = vpack.c.b16 %v2318_v50, %v2317_v13  ;;  %v2844_v50 = vrot.slane %v2842_v38, 5 }
 0x15c   : > { %v1787_v19 = vadd.f32 %v7208_v37, %v1758_v6  ;;  %v2836_v37 = vshll.u32 %v7304_v39, 16 }
 0x15d   : > { %3361 = vmatpush.bf16.msrb.mxu3 %v5627_v18  ;;  %v2847_v18 = vrot.slane %v2845_v4, 6 }
 0x15e   : > { %v7309_v61 = vadd.f32 %v1815_v63, %v1787_v19  ;;  %v5637_v19 = vld [vmem:[%s8131_s1 + $0x418] sm:$0xff]  ;;  %v2838_v49 = vrot.slane %v2836_v37, 6 }
 0x15f   : > { %v1731_v30 = vpop.f32.mrf.mxu1  ;;  %v1818_v26 = vpop.f32.mrf.mxu0  ;;  %3388 = vmatpush.bf16.msra.mxu0 %v5637_v19 }
 0x160   : > { %v1732_v6 = vadd.f32 %v1731_v30, %v7202_v12  ;;  %v7320_v20 = vpop.f32.mrf.mxu2  ;;  %v7322_v63 = vpop.f32.mrf.mxu3  ;;  %v2825_v12 = vor.u32 %v2824_v23, %v2821_v5  ;;  %v2835_v30 = vrot.slane %v2833_v46, 5  ;;  %v5657_v23 = vld [vmem:[%s8131_s1 + $0x4b8] sm:$0xff] }
 0x161   : > { %3362 = vmatpush.bf16.msrb.mxu3 %v5626_v52  ;;  %3442 = vmatpush.bf16.msra.mxu2 %v5657_v23 }
 0x162   : > { %v1761_v51 = vadd.f32 %v7234_v25, %v1732_v6  ;;  %2202 = vmatmul.bf16.gmra.mxu1 %v7105_v40  ;;  %2725 = vmatmul.bf16.gmra.mxu0 %v7259_v22  ;;  %v5636_v40 = vld [vmem:[%s8131_s1 + $0x410] sm:$0xff]  ;;  %v2831_v25 = vrot.slane %v6672_v32, 4  ;;  %v2826_v46 = vrot.slane %v2825_v12, 4  ;;  %v2839_v37 = vor.u32 %v2838_v49, %v2835_v30  ;;  %v5635_v49 = vld [vmem:[%s8131_s1 + $0x408] sm:$0xff] }
 0x163   : > { %v7353_v6 = vld [vmem:[%s6630_s14 + $0x14] sm:$0x3]  ;;  %3389 = vmatpush.bf16.msra.mxu0 %v5636_v40  ;;  %v2854_v30 = vrot.slane %v6767_v7, 4  ;;  %v2848_v40 = vor.u32 %v2847_v18, %v2844_v50  ;;  %v5610_v50 = vld [vmem:[%s8131_s1 + $0x340] sm:$0xff] }
 0x164   : > { %v1790_v13 = vadd.f32 %v7236_v27, %v1761_v51  ;;  %2706 = vmatmul.bf16.gmra.mxu3 %v7326_v44  ;;  %v5611_v27 = vld [vmem:[%s8131_s1 + $0x348] sm:$0xff]  ;;  %v2856_v19 = vshrl.u32 %v7353_v6, 16  ;;  %v2859_v51 = vshll.u32 %v7353_v6, 16 }
 0x165   : > { %2677 = vmatmul.bf16.gmra.mxu2 %v7259_v22  ;;  %2747 = vmatpush.bf16.msra.mxu1 %v5611_v27  ;;  %v2849_v27 = vrot.slane %v2848_v40, 4 }
 0x166   : > { %v7344_v5 = vadd.f32 %v1818_v26, %v1790_v13  ;;  %v2858_v16 = vrot.slane %v2856_v19, 5  ;;  %v2861_v47 = vrot.slane %v2859_v51, 6  ;;  %v5691_v26 = vld [vmem:[%s8131_s1 + $0x5c8] sm:$0xff] }
 0x167   : > { %v1733_v38 = vpop.f32.mrf.mxu1  ;;  %v1820_v4 = vpop.f32.mrf.mxu0  ;;  %3390 = vmatpush.bf16.msra.mxu0 %v5635_v49 }
 0x168   : > { %v1734_v13 = vadd.f32 %v1733_v38, %v7227_v29  ;;  %v7364_v52 = vpop.f32.mrf.mxu2  ;;  %v7366_v12 = vpop.f32.mrf.mxu3  ;;  %v2830_v29 = vsel %vm7357_vm15, %v2826_v46, %v6672_v32  ;;  %v2840_v38 = vsel %vm7357_vm15, %v2831_v25, %v2839_v37  ;;  %v2862_v23 = vor.u32 %v2861_v47, %v2858_v16 }
 0x169   : > { %v3002_v2 = vunpack.c.l.b16 %v2830_v29  ;;  %v3003_v35 = vunpack.c.l.b16 %v2840_v38  ;;  %v2853_v32 = vsel %vm7357_vm15, %v2849_v27, %v6767_v7  ;;  %v2278_v37 = vrot.slane %v6816_v43, 5  ;;  %2748 = vmatpush.bf16.msra.mxu1 %v5610_v50 }
 0x16a   : > { %v1763_v28 = vadd.f32 %v7255_v31, %v1734_v13  ;;  %v5634_v31 = vld [vmem:[%s8131_s1 + $0x400] sm:$0xff]  ;;  %v2863_v47 = vsel %vm7357_vm15, %v2854_v30, %v2862_v23 }
 0x16b   : > { %v3005_v18 = vunpack.c.l.b16 %v2863_v47  ;;  %3391 = vmatpush.bf16.msra.mxu0 %v5634_v31  ;;  %v3010_v13 = vpack.c.b16 %v3003_v35, %v3002_v2  ;;  %v2280_v40 = vrot.slane %v2278_v37, 4  ;;  %v5665_v2 = vld [vmem:[%s8131_s1 + $0x4f8] sm:$0xff] }
 0x16c   : > { %v1792_v57 = vadd.f32 %v7257_v36, %v1763_v28  ;;  %v5656_v28 = vld [vmem:[%s8131_s1 + $0x4b0] sm:$0xff]  ;;  %v3004_v36 = vunpack.c.l.b16 %v2853_v32  ;;  %v5649_v35 = vld [vmem:[%s8131_s1 + $0x478] sm:$0xff]  ;;  %3471 = vmatpush.bf16.msra.mxu3 %v5665_v2 }
 0x16d   : > { %3443 = vmatpush.bf16.msra.mxu2 %v5656_v28  ;;  %3413 = vmatpush.bf16.msrb.mxu1 %v5649_v35 }
 0x16e   : > { %v7390_v16 = vadd.f32 %v1820_v4, %v1792_v57  ;;  %v7402_v57 = vld [vmem:[%s6630_s14 + $0x3c] sm:$0xe]  ;;  %v7404_v4 = vpack.c.b16 %v3005_v18, %v3004_v36  ;;  %v2865_v36 = vshrl.u32 %v7167_v60, 16  ;;  %v2868_v18 = vshll.u32 %v7167_v60, 16  ;;  %v5654_v60 = vld [vmem:[%s8131_s1 + $0x4a0] sm:$0xff] }
 0x16f   : > { %v1736_v25 = vpop.f32.mrf.mxu1  ;;  %v1823_v46 = vpop.f32.mrf.mxu0  ;;  %v4764_v49 = vrot.slane %v7402_v57, 9 }
 0x170   : > { %v1737_v19 = vadd.f32 %v1736_v25, %v7161_v55  ;;  %v7397_v7 = vpop.f32.mrf.mxu2  ;;  %v7399_v51 = vpop.f32.mrf.mxu3  ;;  %v2281_v55 = vrot.slane %v6858_v17, 5 }
 0x172   : > { %v1766_v30 = vadd.f32 %v7288_v21, %v1737_v19  ;;  %2207 = vmatmul.bf16.gmra.mxu1 %v7191_v56  ;;  %2730 = vmatmul.bf16.gmra.mxu0 %v7326_v44  ;;  %v5655_v56 = vld [vmem:[%s8131_s1 + $0x4a8] sm:$0xff]  ;;  %v2282_v27 = vsel %vm7133_vm11, %v2280_v40, %v2281_v55  ;;  %v2870_v40 = vrot.slane %v2868_v18, 6  ;;  %v2873_v55 = vrot.slane %v1205_v34, 5 }
 0x173   : > { %3444 = vmatpush.bf16.msra.mxu2 %v5655_v56  ;;  %v2322_v28 = vunpack.c.l.b16 %v2282_v27  ;;  %v2874_v56 = vrot.slane %v1201_v24, 6  ;;  %v2287_v34 = vrot.slane %v6893_v41, 5  ;;  %v5663_v18 = vld [vmem:[%s8131_s1 + $0x4e8] sm:$0xff] }
 0x174   : > { %v1795_v29 = vadd.f32 %v7290_v3, %v1766_v30  ;;  %3363 = vmatmul.bf16.vlgmr.msrb.gmra.mxu3 %v3010_v13  ;;  %v2279_v3 = vsel %vm7133_vm11, %v4764_v49, %v2278_v37  ;;  %v7439_v37 = vld [vmem:[%s6630_s14 + $0x20] sm:$0x3]  ;;  %v5664_v13 = vld [vmem:[%s8131_s1 + $0x4f0] sm:$0xff]  ;;  %v2867_v49 = vrot.slane %v2865_v36, 5  ;;  %v2290_v36 = vrot.slane %v6927_v45, 5 }
 0x175   : > { %2778 = vmatmul.bf16.vlgmr.msrb.gmra.mxu2 %v7326_v44  ;;  %v2321_v47 = vunpack.c.l.b16 %v2279_v3  ;;  %3472 = vmatpush.bf16.msra.mxu3 %v5664_v13 }
 0x176   : > { %v7413_v38 = vadd.f32 %v1823_v46, %v1795_v29  ;;  %v5505_v46 = vld [vmem:[%s6630_s14 + $0x54] sm:$0xff]  ;;  %v2871_v27 = vor.u32 %v2870_v40, %v2867_v49 }
 0x177   : > { %v1738_v17 = vpop.f32.mrf.mxu1  ;;  %v1825_v21 = vpop.f32.mrf.mxu0  ;;  %v7443_v19 = vpack.c.b16 %v2322_v28, %v2321_v47  ;;  %3445 = vmatpush.bf16.msra.mxu2 %v5654_v60  ;;  %v2289_v28 = vrot.slane %v2287_v34, 4  ;;  %v5673_v60 = vld [vmem:[%s8131_s1 + $0x538] sm:$0xff] }
 0x178   : > { %v1739_v23 = vadd.f32 %v1738_v17, %v7182_v53  ;;  %v7429_v50 = vpop.f32.mrf.mxu2  ;;  %v7431_v31 = vpop.f32.mrf.mxu3  ;;  %v2879_v17 = vshrl.u32 %v7439_v37, 16  ;;  %3944 = vmatpush.bf16.msrb.mxu0 %v5673_v60 }
 0x179   : > { %3473 = vmatpush.bf16.msra.mxu3 %v5663_v18 }
 0x17a   : > { %v1768_v32 = vadd.f32 %v7320_v20, %v1739_v23  ;;  %v5648_v20 = vld [vmem:[%s8131_s1 + $0x470] sm:$0xff]  ;;  %v2881_v1 = vrot.slane %v2879_v17, 5  ;;  %v2888_v17 = vshrl.u32 %v7214_v0, 16 }
 0x17b   : > { %3414 = vmatpush.bf16.msrb.mxu1 %v5648_v20  ;;  %v2872_v20 = vrot.slane %v2871_v27, 4 }
 0x17c   : > { %v1797_v25 = vadd.f32 %v7322_v63, %v1768_v32  ;;  %v2875_v32 = vor.u32 %v2874_v56, %v2873_v55  ;;  %v2291_v56 = vsel %vm7133_vm11, %v2289_v28, %v2290_v36 }
 0x17e   : > { %v7441_v53 = vadd.f32 %v1825_v21, %v1797_v25  ;;  %v2882_v21 = vshll.u32 %v7439_v37, 16  ;;  %v5653_v25 = vld [vmem:[%s8131_s1 + $0x498] sm:$0xff]  ;;  %v2877_v49 = vrot.slane %v2875_v32, 4 }
 0x17f   : > { %v1741_v63 = vpop.f32.mrf.mxu1  ;;  %v1828_v30 = vpop.f32.mrf.mxu0  ;;  %3446 = vmatpush.bf16.msra.mxu2 %v5653_v25 }
 0x180   : > { %v1742_v29 = vadd.f32 %v1741_v63, %v7204_v48  ;;  %v7457_v2 = vpop.f32.mrf.mxu2  ;;  %v7459_v35 = vpop.f32.mrf.mxu3  ;;  %v7469_v48 = vld [vmem:[%s6630_s14 + $0x48] sm:$0xe]  ;;  %v2884_v24 = vrot.slane %v2882_v21, 6  ;;  %v2891_v21 = vshll.u32 %v7214_v0, 16  ;;  %v5662_v0 = vld [vmem:[%s8131_s1 + $0x4e0] sm:$0xff] }
 0x181   : > { %3474 = vmatpush.bf16.msra.mxu3 %v5662_v0 }
 0x182   : > { %v1771_v3 = vadd.f32 %v7364_v52, %v1742_v29  ;;  %2212 = vmatmul.bf16.gmra.mxu1 %v5505_v46  ;;  %2735 = vmatmul.bf16.gmra.mxu0 %v7443_v19  ;;  %v4765_v52 = vrot.slane %v7469_v48, 9  ;;  %v2885_v40 = vor.u32 %v2884_v24, %v2881_v1  ;;  %v7511_v1 = vld [vmem:[%s6630_s14 + $0x2c] sm:$0x3]  ;;  %v2893_v25 = vrot.slane %v2891_v21, 6 }
 0x184   : > { %v1800_v23 = vadd.f32 %v7366_v12, %v1771_v3  ;;  %3368 = vmatmul.bf16.gmra.mxu3 %v7404_v4  ;;  %v5647_v12 = vld [vmem:[%s8131_s1 + $0x468] sm:$0xff]  ;;  %v2288_v29 = vsel %vm7133_vm11, %v4765_v52, %v2287_v34  ;;  %v2886_v27 = vsel %vm7357_vm15, %v2877_v49, %v2885_v40  ;;  %v5652_v34 = vld [vmem:[%s8131_s1 + $0x490] sm:$0xff]  ;;  %v2902_v49 = vshrl.u32 %v7511_v1, 16 }
 0x185   : > { %2783 = vmatmul.bf16.gmra.mxu2 %v7443_v19  ;;  %3415 = vmatpush.bf16.msrb.mxu1 %v5647_v12  ;;  %v5672_v52 = vld [vmem:[%s8131_s1 + $0x530] sm:$0xff]  ;;  %v3007_v18 = vunpack.c.l.b16 %v2886_v27  ;;  %v2890_v12 = vrot.slane %v2888_v17, 5  ;;  %v2905_v40 = vshll.u32 %v7511_v1, 16  ;;  %v2298_v27 = vrot.slane %v2296_v58, 4 }
 0x186   : > { %v7474_v47 = vadd.f32 %v1828_v30, %v1800_v23  ;;  %v2325_v23 = vunpack.c.l.b16 %v2288_v29  ;;  %3447 = vmatpush.bf16.msra.mxu2 %v5652_v34  ;;  %3945 = vmatpush.bf16.msrb.mxu0 %v5672_v52  ;;  %v7547_v29 = vld [vmem:[%s6630_s14 + $0x54] sm:$0xe]  ;;  %v2904_v21 = vrot.slane %v2902_v49, 5  ;;  %v5671_v34 = vld [vmem:[%s8131_s1 + $0x528] sm:$0xff]  ;;  %v2914_v49 = vshll.u32 %v7267_v33, 16 }
 0x187   : > { %v1743_v46 = vpop.f32.mrf.mxu1  ;;  %v1830_v13 = vpop.f32.mrf.mxu0 }
 0x188   : > { %v1744_v45 = vadd.f32 %v1743_v46, %v7229_v42  ;;  %v7491_v63 = vpop.f32.mrf.mxu2  ;;  %v7493_v30 = vpop.f32.mrf.mxu3  ;;  %v2876_v42 = vsel %vm7357_vm15, %v2872_v20, %v2875_v32  ;;  %v2896_v46 = vrot.slane %v1229_v14, 5  ;;  %v5651_v14 = vld [vmem:[%s8131_s1 + $0x488] sm:$0xff] }
 0x189   : > { %v3006_v32 = vunpack.c.l.b16 %v2876_v42 }
 0x18a   : > { %v1773_v55 = vadd.f32 %v7397_v7, %v1744_v45  ;;  %v2326_v7 = vunpack.c.l.b16 %v2291_v56  ;;  %v2897_v45 = vrot.slane %v1225_v9, 6  ;;  %v2894_v56 = vor.u32 %v2893_v25, %v2890_v12  ;;  %3448 = vmatpush.bf16.msra.mxu2 %v5651_v14  ;;  %3946 = vmatpush.bf16.msrb.mxu0 %v5671_v34 }
 0x18b   : > { %v7544_v9 = vpack.c.b16 %v3007_v18, %v3006_v32  ;;  %v2920_v34 = vrot.slane %v1249_v59, 6 }
 0x18c   : > { %v1802_v3 = vadd.f32 %v7399_v51, %v1773_v55  ;;  %v5646_v51 = vld [vmem:[%s8131_s1 + $0x460] sm:$0xff]  ;;  %v7535_v55 = vpack.c.b16 %v2326_v7, %v2325_v23  ;;  %v2898_v17 = vor.u32 %v2897_v45, %v2896_v46  ;;  %v2299_v23 = vrot.slane %v7006_v11, 5  ;;  %v5645_v7 = vld [vmem:[%s8131_s1 + $0x458] sm:$0xff] }
 0x18d   : > { %3416 = vmatpush.bf16.msrb.mxu1 %v5646_v51  ;;  %v2895_v51 = vrot.slane %v2894_v56, 4  ;;  %v2911_v45 = vshrl.u32 %v7267_v33, 16  ;;  %v5670_v33 = vld [vmem:[%s8131_s1 + $0x520] sm:$0xff] }
 0x18e   : > { %v7513_v24 = vadd.f32 %v1830_v13, %v1802_v3  ;;  %v2907_v3 = vrot.slane %v2905_v40, 6  ;;  %v2300_v46 = vsel %vm7133_vm11, %v2298_v27, %v2299_v23  ;;  %v2919_v27 = vrot.slane %v1253_v10, 5  ;;  %3947 = vmatpush.bf16.msrb.mxu0 %v5670_v33 }
 0x18f   : > { %v2082_v28 = vpop.f32.mrf.mxu1  ;;  %v2169_v36 = vpop.f32.mrf.mxu0 }
 0x190   : > { %v2083_v13 = vadd.f32 %v2082_v28, %v7274_v8  ;;  %v7527_v20 = vpop.f32.mrf.mxu2  ;;  %v7529_v60 = vpop.f32.mrf.mxu3  ;;  %v2908_v18 = vor.u32 %v2907_v3, %v2904_v21  ;;  %v5659_v3 = vld [vmem:[%s8131_s1 + $0x4c8] sm:$0xff] }
 0x191   : > { %3417 = vmatpush.bf16.msrb.mxu1 %v5645_v7 }
 0x192   : > { %v2112_v8 = vadd.f32 %v7429_v50, %v2083_v13  ;;  %2749 = vmatmul.bf16.vlgmr.msra.gmra.mxu1 %v7259_v22  ;;  %3392 = vmatmul.bf16.vlgmr.msra.gmra.mxu0 %v7404_v4  ;;  %v5650_v22 = vld [vmem:[%s8131_s1 + $0x480] sm:$0xff]  ;;  %v4766_v50 = vrot.slane %v7547_v29, 9  ;;  %v5660_v13 = vld [vmem:[%s8131_s1 + $0x4d0] sm:$0xff] }
 0x193   : > { %3449 = vmatpush.bf16.msra.mxu2 %v5650_v22  ;;  %v2913_v22 = vrot.slane %v2911_v45, 5 }
 0x194   : > { %v2141_v42 = vadd.f32 %v7431_v31, %v2112_v8  ;;  %3373 = vmatmul.bf16.gmra.mxu3 %v7544_v9  ;;  %v5661_v31 = vld [vmem:[%s8131_s1 + $0x4d8] sm:$0xff]  ;;  %v2297_v25 = vsel %vm7133_vm11, %v4766_v50, %v2296_v58  ;;  %v2330_v8 = vunpack.c.l.b16 %v2300_v46  ;;  %v2916_v50 = vrot.slane %v2914_v49, 6 }
 0x195   : > { %2788 = vmatmul.bf16.gmra.mxu2 %v7535_v55  ;;  %3475 = vmatpush.bf16.msra.mxu3 %v5661_v31  ;;  %v2329_v14 = vunpack.c.l.b16 %v2297_v25  ;;  %v5689_v25 = vld [vmem:[%s8131_s1 + $0x5b8] sm:$0xff] }
 0x196   : > { %v7555_v4 = vadd.f32 %v2169_v36, %v2141_v42  ;;  %v2900_v36 = vrot.slane %v2898_v17, 4  ;;  %v5644_v42 = vld [vmem:[%s8131_s1 + $0x450] sm:$0xff] }
 0x197   : > { %v2084_v32 = vpop.f32.mrf.mxu1  ;;  %v2171_v0 = vpop.f32.mrf.mxu0  ;;  %3418 = vmatpush.bf16.msrb.mxu1 %v5644_v42  ;;  %4002 = vmatpush.bf16.msrb.mxu2 %v5689_v25  ;;  %v2934_v42 = vshrl.u32 %v7402_v57, 16 }
 0x198   : > { %v2085_v52 = vadd.f32 %v2084_v32, %v7309_v61  ;;  %v7569_v28 = vpop.f32.mrf.mxu2  ;;  %v7571_v11 = vpop.f32.mrf.mxu3  ;;  %v2899_v61 = vsel %vm7357_vm15, %v2895_v51, %v2898_v17  ;;  %v2925_v32 = vshrl.u32 %v7589_v54, 16  ;;  %v2331_v51 = vpack.c.b16 %v2330_v8, %v2329_v14 }
 0x199   : > { %3476 = vmatpush.bf16.msra.mxu3 %v5660_v13  ;;  %v3008_v56 = vunpack.c.l.b16 %v2899_v61 }
 0x19a   : > { %v2114_v12 = vadd.f32 %v7457_v2, %v2085_v52  ;;  %v2909_v2 = vsel %vm7357_vm15, %v2900_v36, %v2908_v18  ;;  %v2921_v36 = vor.u32 %v2920_v34, %v2919_v27  ;;  %v2927_v18 = vrot.slane %v2925_v32, 5 }
 0x19b   : > { %v3009_v21 = vunpack.c.l.b16 %v2909_v2 }
 0x19c   : > { %v2143_v40 = vadd.f32 %v7459_v35, %v2114_v12  ;;  %v2923_v2 = vrot.slane %v2921_v36, 4 }
 0x19d   : > { %3477 = vmatpush.bf16.msra.mxu3 %v5659_v3  ;;  %v7616_v10 = vpack.c.b16 %v3009_v21, %v3008_v56  ;;  %v5668_v56 = vld [vmem:[%s8131_s1 + $0x510] sm:$0xff]  ;;  %v7651_v21 = vld [vmem:[%s6630_s14 + $0x44] sm:$0x3]  ;;  %v2936_v3 = vrot.slane %v2934_v42, 5 }
 0x19e   : > { %v7591_v58 = vadd.f32 %v2171_v0, %v2143_v40  ;;  %v2928_v0 = vshll.u32 %v7589_v54, 16  ;;  %v2948_v32 = vshrl.u32 %v7651_v21, 16 }
 0x19f   : > { %v2087_v35 = vpop.f32.mrf.mxu1  ;;  %v2174_v17 = vpop.f32.mrf.mxu0 }
 0x1a0   : > { %v2088_v23 = vadd.f32 %v2087_v35, %v7344_v5  ;;  %v7605_v31 = vpop.f32.mrf.mxu2  ;;  %v7607_v7 = vpop.f32.mrf.mxu3  ;;  %v2917_v5 = vor.u32 %v2916_v50, %v2913_v22  ;;  %v2930_v12 = vrot.slane %v2928_v0, 6  ;;  %v8154_v50 = vshrl.u32 %v6816_v43, 16 }
 0x1a1   : > { %3478 = vmatpush.bf16.msra.mxu3 %v5658_v15  ;;  %v2951_v0 = vshll.u32 %v7651_v21, 16 }
 0x1a2   : > { %v2117_v52 = vadd.f32 %v7491_v63, %v2088_v23  ;;  %2754 = vmatmul.bf16.gmra.mxu1 %v7326_v44  ;;  %3397 = vmatmul.bf16.gmra.mxu0 %v7544_v9  ;;  %v5643_v44 = vld [vmem:[%s8131_s1 + $0x448] sm:$0xff]  ;;  %v2918_v40 = vrot.slane %v2917_v5, 4  ;;  %v2931_v14 = vor.u32 %v2930_v12, %v2927_v18  ;;  %v8155_v23 = vshll.u32 %v6816_v43, 16  ;;  %v5697_v43 = vld [vmem:[%s8131_s1 + $0x5f8] sm:$0xff] }
 0x1a3   : > { %3419 = vmatpush.bf16.msrb.mxu1 %v5643_v44 }
 0x1a4   : > { %v2146_v59 = vadd.f32 %v7493_v30, %v2117_v52  ;;  %3378 = vmatmul.bf16.gmra.mxu3 %v7616_v10  ;;  %v5669_v30 = vld [vmem:[%s8131_s1 + $0x518] sm:$0xff]  ;;  %v2922_v35 = vsel %vm7357_vm15, %v2918_v40, %v2921_v36  ;;  %v2943_v34 = vrot.slane %v8155_v23, 6  ;;  %v2953_v40 = vrot.slane %v2951_v0, 6 }
 0x1a5   : > { %2793 = vmatmul.bf16.gmra.mxu2 %v2331_v51  ;;  %3948 = vmatpush.bf16.msrb.mxu0 %v5669_v30  ;;  %v3018_v5 = vunpack.c.l.b16 %v2922_v35  ;;  %v5687_v30 = vld [vmem:[%s8131_s1 + $0x5a8] sm:$0xff]  ;;  %v8156_v0 = vshll.u32 %v6893_v41, 16 }
 0x1a6   : > { %v7623_v63 = vadd.f32 %v2174_v17, %v2146_v59  ;;  %v2932_v17 = vsel %vm7357_vm15, %v2923_v2, %v2931_v14  ;;  %v5667_v59 = vld [vmem:[%s8131_s1 + $0x508] sm:$0xff]  ;;  %4031 = vmatpush.bf16.msrb.mxu3 %v5697_v43 }
 0x1a7   : > { %v2089_v46 = vpop.f32.mrf.mxu1  ;;  %v2176_v61 = vpop.f32.mrf.mxu0  ;;  %v3019_v15 = vunpack.c.l.b16 %v2932_v17 }
 0x1a8   : > { %v2090_v13 = vadd.f32 %v2089_v46, %v7390_v16  ;;  %v7635_v45 = vpop.f32.mrf.mxu2  ;;  %v7637_v49 = vpop.f32.mrf.mxu3  ;;  %v2937_v16 = vshll.u32 %v7402_v57, 16  ;;  %v2942_v57 = vrot.slane %v8154_v50, 5  ;;  %v5666_v46 = vld [vmem:[%s8131_s1 + $0x500] sm:$0xff] }
 0x1a9   : > { %3949 = vmatpush.bf16.msrb.mxu0 %v5668_v56 }
 0x1aa   : > { %v2119_v8 = vadd.f32 %v7527_v20, %v2090_v13  ;;  %v5642_v20 = vld [vmem:[%s8131_s1 + $0x440] sm:$0xff]  ;;  %v2939_v22 = vrot.slane %v2937_v16, 6  ;;  %v2950_v13 = vrot.slane %v2948_v32, 5  ;;  %v2960_v32 = vshll.u32 %v7469_v48, 16 }
 0x1ab   : > { %3420 = vmatpush.bf16.msrb.mxu1 %v5642_v20  ;;  %v5680_v20 = vld [vmem:[%s8131_s1 + $0x570] sm:$0xff] }
 0x1ac   : > { %v2148_v33 = vadd.f32 %v7529_v60, %v2119_v8  ;;  %v5688_v60 = vld [vmem:[%s8131_s1 + $0x5b0] sm:$0xff]  ;;  %v2940_v44 = vor.u32 %v2939_v22, %v2936_v3  ;;  %v2954_v56 = vor.u32 %v2953_v40, %v2950_v13  ;;  %v5686_v3 = vld [vmem:[%s8131_s1 + $0x5a0] sm:$0xff]  ;;  %v2962_v43 = vrot.slane %v2960_v32, 6 }
 0x1ad   : > { %4003 = vmatpush.bf16.msrb.mxu2 %v5688_v60  ;;  %3950 = vmatpush.bf16.msrb.mxu0 %v5667_v59  ;;  %v5933_v60 = vld [vmem:[%s6630_s14 + $0x4] sm:$0xf]  ;;  %v3508_v59 = vld [vmem:[%s6630_s14] sm:$0xc] }
 0x1ae   : > { %v7658_v27 = vadd.f32 %v2176_v61, %v2148_v33  ;;  %v2944_v61 = vor.u32 %v2943_v34, %v2942_v57  ;;  %v2941_v14 = vrot.slane %v2940_v44, 4  ;;  %v3529_v23 = vrot.slane %v5933_v60, 6 }
 0x1af   : > { %v2092_v51 = vpop.f32.mrf.mxu1  ;;  %v2179_v52 = vpop.f32.mrf.mxu0  ;;  %v2957_v34 = vshrl.u32 %v7469_v48, 16 }
 0x1b0   : > { %v2093_v36 = vadd.f32 %v2092_v51, %v7413_v38  ;;  %v7671_v18 = vpop.f32.mrf.mxu2  ;;  %v7673_v12 = vpop.f32.mrf.mxu3  ;;  %v5681_v38 = vld [vmem:[%s8131_s1 + $0x578] sm:$0xff]  ;;  %v2946_v8 = vrot.slane %v2944_v61, 4  ;;  %v2966_v51 = vrot.slane %v8156_v0, 6 }
 0x1b1   : > { %3973 = vmatpush.bf16.msra.mxu1 %v5681_v38  ;;  %4004 = vmatpush.bf16.msrb.mxu2 %v5687_v30 }
 0x1b2   : > { %v2122_v25 = vadd.f32 %v7569_v28, %v2093_v36  ;;  %2759 = vmatmul.bf16.gmra.mxu1 %v7443_v19  ;;  %3402 = vmatmul.bf16.gmra.mxu0 %v7616_v10  ;;  %v7690_v28 = vpack.c.b16 %v3019_v15, %v3018_v5  ;;  %v2955_v57 = vsel %vm7357_vm15, %v2946_v8, %v2954_v56  ;;  %v2959_v36 = vrot.slane %v2957_v34, 5  ;;  %v5695_v8 = vld [vmem:[%s8131_s1 + $0x5e8] sm:$0xff] }
 0x1b3   : > { %3951 = vmatpush.bf16.msrb.mxu0 %v5666_v46  ;;  %v3023_v15 = vunpack.c.l.b16 %v2955_v57 }
 0x1b4   : > { %v2151_v19 = vadd.f32 %v7571_v11, %v2122_v25  ;;  %3479 = vmatmul.bf16.vlgmr.msra.gmra.mxu3 %v7690_v28  ;;  %v5696_v11 = vld [vmem:[%s8131_s1 + $0x5f0] sm:$0xff]  ;;  %v8157_v25 = vshrl.u32 %v6893_v41, 16 }
 0x1b5   : > { %3450 = vmatmul.bf16.vlgmr.msra.gmra.mxu2 %v7616_v10  ;;  %4032 = vmatpush.bf16.msrb.mxu3 %v5696_v11  ;;  %v7757_v11 = vld [vmem:[%s8131_s1 + $0x638] sm:$0xff] }
 0x1b6   : > { %v7695_v2 = vadd.f32 %v2179_v52, %v2151_v19  ;;  %3974 = vmatpush.bf16.msra.mxu1 %v5680_v20  ;;  %4005 = vmatpush.bf16.msrb.mxu2 %v5686_v3  ;;  %v7721_v52 = vld [vmem:[%s6630_s14 + $0x50] sm:$0x3]  ;;  %v2965_v38 = vrot.slane %v8157_v25, 5  ;;  %v5247_v19 = vrot.slane %v3508_v59, 10  ;;  %v5678_v59 = vld [vmem:[%s8131_s1 + $0x560] sm:$0xff] }
 0x1b7   : > { %v2094_v42 = vpop.f32.mrf.mxu1  ;;  %v2181_v16 = vpop.f32.mrf.mxu0  ;;  %v2971_v48 = vshrl.u32 %v7721_v52, 16  ;;  %v2974_v30 = vshll.u32 %v7721_v52, 16  ;;  %4060 = vmatpush.bf16.msra.mxu0 %v7757_v11 }
 0x1b8   : > { %v2095_v33 = vadd.f32 %v2094_v42, %v7441_v53  ;;  %v2663_v35 = vpop.f32.mrf.mxu2  ;;  %v2692_v17 = vpop.f32.mrf.mxu3  ;;  %v2945_v53 = vsel %vm7357_vm15, %v2941_v14, %v2944_v61  ;;  %v3531_v14 = vrot.slane %v3529_v23, 4  ;;  %v3530_v3 = vsel %vm7740_vm3, %v5247_v19, %v3529_v23  ;;  %v5694_v23 = vld [vmem:[%s8131_s1 + $0x5e0] sm:$0xff] }
 0x1b9   : > { %v7707_v22 = vadd.f32 %v2692_v17, %v2663_v35  ;;  %v3022_v5 = vunpack.c.l.b16 %v2945_v53  ;;  %v5679_v35 = vld [vmem:[%s8131_s1 + $0x568] sm:$0xff]  ;;  %v5685_v17 = vld [vmem:[%s8131_s1 + $0x598] sm:$0xff]  ;;  %v2973_v20 = vrot.slane %v2971_v48, 5  ;;  %4033 = vmatpush.bf16.msrb.mxu3 %v5695_v8 }
 0x1ba   : > { %v2124_v50 = vadd.f32 %v7605_v31, %v2095_v33  ;;  %3975 = vmatpush.bf16.msra.mxu1 %v5679_v35  ;;  %4006 = vmatpush.bf16.msrb.mxu2 %v5685_v17 }
 0x1bb   : > { %v7736_v41 = vpack.c.b16 %v3023_v15, %v3022_v5  ;;  %v3591_v5 = vunpack.c.l.b16 %v3530_v3 }
 0x1bc   : > { %v2153_v31 = vadd.f32 %v7607_v7, %v2124_v50 }
 0x1bd   : > { %4034 = vmatpush.bf16.msrb.mxu3 %v5694_v23 }
 0x1be   : > { %v7724_v44 = vadd.f32 %v2181_v16, %v2153_v31  ;;  %v2963_v16 = vor.u32 %v2962_v43, %v2959_v36  ;;  %v5684_v36 = vld [vmem:[%s8131_s1 + $0x590] sm:$0xff]  ;;  %3976 = vmatpush.bf16.msra.mxu1 %v5678_v59  ;;  %v3539_v59 = vrot.slane %v7353_v6, 6 }
 0x1bf   : > { %v2097_v46 = vpop.f32.mrf.mxu1  ;;  %v2184_v7 = vpop.f32.mrf.mxu0  ;;  %4007 = vmatpush.bf16.msrb.mxu2 %v5684_v36 }
 0x1c0   : > { %v2098_v61 = vadd.f32 %v2097_v46, %v7474_v47  ;;  %v2665_v13 = vpop.f32.mrf.mxu2  ;;  %v2694_v40 = vpop.f32.mrf.mxu3  ;;  %v3532_v47 = vrot.slane %v7304_v39, 6  ;;  %v2967_v39 = vor.u32 %v2966_v51, %v2965_v38  ;;  %v2964_v57 = vrot.slane %v2963_v16, 4 }
 0x1c1   : > { %v7734_v56 = vadd.f32 %v2694_v40, %v2665_v13  ;;  %v2983_v46 = vshll.u32 %v7547_v29, 16  ;;  %v7798_v40 = vld [vmem:[%s6630_s14 + $0x5c] sm:$0x3] }
 0x1c2   : > { %v2127_v33 = vadd.f32 %v7635_v45, %v2098_v61  ;;  %2764 = vmatmul.bf16.gmra.mxu1 %v7535_v55  ;;  %3407 = vmatmul.bf16.gmra.mxu0 %v7690_v28  ;;  %v2976_v45 = vrot.slane %v2974_v30, 6  ;;  %v3533_v50 = vsel %vm7740_vm3, %v3531_v14, %v3532_v47  ;;  %v2969_v60 = vrot.slane %v2967_v39, 4 }
 0x1c3   : > { %v3592_v15 = vunpack.c.l.b16 %v3533_v50  ;;  %v2968_v38 = vsel %vm7357_vm15, %v2964_v57, %v2967_v39  ;;  %v2980_v30 = vshrl.u32 %v7547_v29, 16  ;;  %v2985_v47 = vrot.slane %v2983_v46, 6 }
 0x1c4   : > { %v2156_v55 = vadd.f32 %v7637_v49, %v2127_v33  ;;  %3484 = vmatmul.bf16.gmra.mxu3 %v7736_v41  ;;  %v2977_v34 = vor.u32 %v2976_v45, %v2973_v20  ;;  %v3026_v19 = vunpack.c.l.b16 %v2968_v38  ;;  %v8161_v33 = vshrl.u32 %v6982_v62, 16 }
 0x1c5   : > { %3455 = vmatmul.bf16.gmra.mxu2 %v7690_v28  ;;  %v3599_v13 = vpack.c.b16 %v3592_v15, %v3591_v5  ;;  %v2982_v8 = vrot.slane %v2980_v30, 5  ;;  %v2994_v29 = vshrl.u32 %v7798_v40, 16  ;;  %v2997_v17 = vshll.u32 %v7798_v40, 16 }
 0x1c6   : > { %v7766_v53 = vadd.f32 %v2184_v7, %v2156_v55  ;;  %v2978_v48 = vsel %vm7357_vm15, %v2969_v60, %v2977_v34  ;;  %v8160_v7 = vshll.u32 %v6982_v62, 16  ;;  %v2988_v35 = vrot.slane %v8161_v33, 5  ;;  %v3509_v60 = vld [vmem:[%s6630_s14 + $0xc] sm:$0xc]  ;;  %v5693_v62 = vld [vmem:[%s8131_s1 + $0x5d8] sm:$0xff] }
 0x1c7   : > { %v2099_v49 = vpop.f32.mrf.mxu1  ;;  %v2186_v32 = vpop.f32.mrf.mxu0  ;;  %v3027_v14 = vunpack.c.l.b16 %v2978_v48  ;;  %v2999_v5 = vrot.slane %v2997_v17, 6  ;;  %v5248_v15 = vrot.slane %v3509_v60, 10  ;;  %4035 = vmatpush.bf16.msrb.mxu3 %v5693_v62  ;;  %v3510_v62 = vld [vmem:[%s6630_s14 + $0x18] sm:$0xc] }
 0x1c8   : > { %v2100_v0 = vadd.f32 %v2099_v49, %v7513_v24  ;;  %v2668_v51 = vpop.f32.mrf.mxu2  ;;  %v2697_v31 = vpop.f32.mrf.mxu3  ;;  %v7784_v24 = vld [vmem:[%s8131_s1 + $0x630] sm:$0xff]  ;;  %v2989_v61 = vrot.slane %v8160_v7, 6 }
 0x1c9   : > { %v7779_v43 = vadd.f32 %v2697_v31, %v2668_v51  ;;  %4061 = vmatpush.bf16.msra.mxu0 %v7784_v24  ;;  %v7819_v49 = vpack.c.b16 %v3027_v14, %v3026_v19  ;;  %v2996_v31 = vrot.slane %v2994_v29, 5  ;;  %v5692_v19 = vld [vmem:[%s8131_s1 + $0x5d0] sm:$0xff] }
 0x1ca   : > { %v2129_v25 = vadd.f32 %v7671_v18, %v2100_v0  ;;  %v2986_v0 = vor.u32 %v2985_v47, %v2982_v8  ;;  %v2990_v51 = vor.u32 %v2989_v61, %v2988_v35  ;;  %v5676_v14 = vld [vmem:[%s8131_s1 + $0x550] sm:$0xff]  ;;  %v5702_v8 = vld [vmem:[%s8131_s1 + $0x620] sm:$0xff] }
 0x1cb   : > { %v3000_v38 = vor.u32 %v2999_v5, %v2996_v31  ;;  %4036 = vmatpush.bf16.msrb.mxu3 %v5692_v19  ;;  %v5249_v31 = vrot.slane %v3510_v62, 10 }
 0x1cc   : > { %v2158_v18 = vadd.f32 %v7673_v12, %v2129_v25  ;;  %v5934_v12 = vld [vmem:[%s6630_s14 + $0x10] sm:$0xf]  ;;  %v2987_v36 = vrot.slane %v2986_v0, 4  ;;  %v2992_v25 = vrot.slane %v2990_v51, 4  ;;  %v5936_v0 = vld [vmem:[%s6630_s14 + $0x28] sm:$0xf] }
 0x1cd   : > { %v3536_v45 = vrot.slane %v5934_v12, 6  ;;  %v5935_v12 = vld [vmem:[%s6630_s14 + $0x1c] sm:$0xf] }
 0x1ce   : > { %v7800_v16 = vadd.f32 %v2186_v32, %v2158_v18  ;;  %v5683_v32 = vld [vmem:[%s8131_s1 + $0x588] sm:$0xff]  ;;  %v2991_v33 = vsel %vm7357_vm15, %v2987_v36, %v2990_v51  ;;  %v3001_v35 = vsel %vm7357_vm15, %v2992_v25, %v3000_v38  ;;  %v3550_v51 = vrot.slane %v5936_v0, 6 }
 0x1cf   : > { %v2198_v39 = vpop.f32.mrf.mxu1  ;;  %v2721_v20 = vpop.f32.mrf.mxu0  ;;  %v3538_v23 = vrot.slane %v3536_v45, 4  ;;  %4008 = vmatpush.bf16.msrb.mxu2 %v5683_v32  ;;  %v3537_v6 = vsel %vm7740_vm3, %v5248_v15, %v3536_v45  ;;  %v3030_v29 = vunpack.c.l.b16 %v2991_v33  ;;  %v3031_v17 = vunpack.c.l.b16 %v3001_v35  ;;  %4037 = vmatpush.bf16.msrb.mxu3 %v5691_v26  ;;  %v3511_v15 = vld [vmem:[%s6630_s14 + $0x24] sm:$0xc]  ;;  %v5699_v35 = vld [vmem:[%s8131_s1 + $0x608] sm:$0xff]  ;;  %v5937_v26 = vld [vmem:[%s6630_s14 + $0x34] sm:$0xf] }
 0x1d0   : > { %v7808_v55 = vadd.f32 %v2198_v39, %v7555_v4  ;;  %v7811_v3 = vadd.f32 %v2721_v20, %v7707_v22  ;;  %v2670_v50 = vpop.f32.mrf.mxu2  ;;  %v2699_v57 = vpop.f32.mrf.mxu3  ;;  %v5677_v4 = vld [vmem:[%s8131_s1 + $0x558] sm:$0xff]  ;;  %v5703_v22 = vld [vmem:[%s8131_s1 + $0x628] sm:$0xff]  ;;  %v3543_v45 = vrot.slane %v5935_v12, 6 }
 0x1d1   : > { %v7817_v34 = vadd.f32 %v2699_v57, %v2670_v50  ;;  %3977 = vmatpush.bf16.msra.mxu1 %v5677_v4  ;;  %4062 = vmatpush.bf16.msra.mxu0 %v5703_v22  ;;  %v3540_v46 = vsel %vm7740_vm3, %v3538_v23, %v3539_v59  ;;  %v3032_v4 = vpack.c.b16 %v3031_v17, %v3030_v29  ;;  %v5250_v23 = vrot.slane %v3511_v15, 10 }
 0x1d2   : > { %3421 = vmatmul.bf16.vlgmr.msrb.gmra.mxu1 %v7544_v9  ;;  %3952 = vmatmul.bf16.vlgmr.msrb.gmra.mxu0 %v3599_v13  ;;  %v5682_v9 = vld [vmem:[%s8131_s1 + $0x580] sm:$0xff]  ;;  %v3594_v47 = vunpack.c.l.b16 %v3540_v46  ;;  %v3545_v5 = vrot.slane %v3543_v45, 4  ;;  %v3552_v59 = vrot.slane %v3550_v51, 4  ;;  %v3544_v38 = vsel %vm7740_vm3, %v5249_v31, %v3543_v45  ;;  %v5700_v46 = vld [vmem:[%s8131_s1 + $0x610] sm:$0xff] }
 0x1d3   : > { %4009 = vmatpush.bf16.msrb.mxu2 %v5682_v9  ;;  %v3553_v9 = vrot.slane %v7511_v1, 6  ;;  %v5674_v1 = vld [vmem:[%s8131_s1 + $0x540] sm:$0xff] }
 0x1d4   : > { %3489 = vmatmul.bf16.gmra.mxu3 %v7819_v49 }
 0x1d5   : > { %3460 = vmatmul.bf16.gmra.mxu2 %v7736_v41  ;;  %3978 = vmatpush.bf16.msra.mxu1 %v5676_v14 }
 0x1d6   : > { %4063 = vmatpush.bf16.msra.mxu0 %v5702_v8 }
 0x1d7   : > { %v2200_v48 = vpop.f32.mrf.mxu1  ;;  %v2723_v30 = vpop.f32.mrf.mxu0  ;;  %5816 = vmatpush.bf16.msra.mxu2 %v7757_v11 }
 0x1d8   : > { %v7842_v7 = vadd.f32 %v2200_v48, %v7591_v58  ;;  %v7845_v61 = vadd.f32 %v2723_v30, %v7734_v56  ;;  %v2673_v18 = vpop.f32.mrf.mxu2  ;;  %v2702_v13 = vpop.f32.mrf.mxu3  ;;  %v3593_v56 = vunpack.c.l.b16 %v3537_v6 }
 0x1d9   : > { %v7857_v58 = vadd.f32 %v2702_v13, %v2673_v18  ;;  %v3595_v13 = vunpack.c.l.b16 %v3544_v38 }
 0x1da   : > { %v7864_v39 = vpack.c.b16 %v3594_v47, %v3593_v56 }
 0x1db   : > { %5817 = vmatpush.bf16.msra.mxu2 %v7784_v24 }
 0x1df   : > { %v2203_v11 = vpop.f32.mrf.mxu1  ;;  %v2726_v20 = vpop.f32.mrf.mxu0  ;;  %5818 = vmatpush.bf16.msra.mxu2 %v5703_v22  ;;  %v5690_v22 = vld [vmem:[%s8131_s1 + $0x5c0] sm:$0xff] }
 0x1e0   : > { %v7871_v50 = vadd.f32 %v2203_v11, %v7623_v63  ;;  %v7874_v57 = vadd.f32 %v2726_v20, %v7779_v43  ;;  %v2675_v24 = vpop.f32.mrf.mxu2  ;;  %v2704_v60 = vpop.f32.mrf.mxu3  ;;  %v5675_v63 = vld [vmem:[%s8131_s1 + $0x548] sm:$0xff]  ;;  %v5701_v43 = vld [vmem:[%s8131_s1 + $0x618] sm:$0xff]  ;;  %4038 = vmatpush.bf16.msrb.mxu3 %v5690_v22 }
 0x1e1   : > { %v7877_v32 = vadd.f32 %v2704_v60, %v2675_v24  ;;  %3979 = vmatpush.bf16.msra.mxu1 %v5675_v63  ;;  %4064 = vmatpush.bf16.msra.mxu0 %v5701_v43  ;;  %v3559_v24 = vrot.slane %v5937_v26, 6  ;;  %v3512_v60 = vld [vmem:[%s6630_s14 + $0x30] sm:$0xc]  ;;  %v5939_v26 = vld [vmem:[%s6630_s14 + $0x4c] sm:$0xf] }
 0x1e2   : > { %3426 = vmatmul.bf16.gmra.mxu1 %v7616_v10  ;;  %3957 = vmatmul.bf16.gmra.mxu0 %v7864_v39  ;;  %v3546_v10 = vrot.slane %v7439_v37, 6 }
 0x1e3   : > { %5819 = vmatpush.bf16.msra.mxu2 %v5702_v8  ;;  %v3561_v62 = vrot.slane %v3559_v24, 4 }
 0x1e4   : > { %3494 = vmatmul.bf16.gmra.mxu3 %v3032_v4  ;;  %v3547_v37 = vsel %vm7740_vm3, %v3545_v5, %v3546_v10  ;;  %v3562_v4 = vrot.slane %v7589_v54, 6 }
 0x1e5   : > { %3465 = vmatmul.bf16.gmra.mxu2 %v7819_v49  ;;  %v3596_v19 = vunpack.c.l.b16 %v3547_v37  ;;  %3980 = vmatpush.bf16.msra.mxu1 %v5674_v1  ;;  %v3513_v37 = vld [vmem:[%s6630_s14 + $0x3c] sm:$0xc] }
 0x1e6   : > { %4065 = vmatpush.bf16.msra.mxu0 %v5700_v46  ;;  %v3563_v5 = vsel %vm7740_vm3, %v3561_v62, %v3562_v4  ;;  %v3580_v62 = vrot.slane %v7721_v52, 6 }
 0x1e7   : > { %v2205_v36 = vpop.f32.mrf.mxu1  ;;  %v2728_v25 = vpop.f32.mrf.mxu0  ;;  %5820 = vmatpush.bf16.msra.mxu2 %v5701_v43  ;;  %v7915_v56 = vpack.c.b16 %v3596_v19, %v3595_v13  ;;  %v3608_v10 = vunpack.c.l.b16 %v3563_v5 }
 0x1e8   : > { %v7900_v48 = vadd.f32 %v2205_v36, %v7658_v27  ;;  %v7903_v49 = vadd.f32 %v2728_v25, %v7817_v34  ;;  %v2678_v30 = vpop.f32.mrf.mxu2  ;;  %v2707_v6 = vpop.f32.mrf.mxu3  ;;  %v3551_v27 = vsel %vm7740_vm3, %v5250_v23, %v3550_v51  ;;  %v3554_v34 = vsel %vm7740_vm3, %v3552_v59, %v3553_v9  ;;  %v5938_v25 = vld [vmem:[%s6630_s14 + $0x40] sm:$0xf] }
 0x1e9   : > { %v2708_v18 = vadd.f32 %v2707_v6, %v2678_v30  ;;  %v3597_v14 = vunpack.c.l.b16 %v3551_v27  ;;  %v3598_v8 = vunpack.c.l.b16 %v3554_v34  ;;  %v3568_v38 = vrot.slane %v5938_v25, 6 }
 0x1ea   : > { %4066 = vmatpush.bf16.msra.mxu0 %v5699_v35  ;;  %v5252_v30 = vrot.slane %v3513_v37, 10  ;;  %v3571_v6 = vrot.slane %v7651_v21, 6  ;;  %v5940_v37 = vld [vmem:[%s6630_s14 + $0x58] sm:$0xf] }
 0x1eb   : > { %5821 = vmatpush.bf16.msra.mxu2 %v5700_v46  ;;  %v7926_v45 = vpack.c.b16 %v3598_v8, %v3597_v14 }
 0x1ec   : > { %v3569_v27 = vsel %vm7740_vm3, %v5252_v30, %v3568_v38  ;;  %v3586_v30 = vrot.slane %v5940_v37, 6 }
 0x1ed   : > { %v3611_v14 = vunpack.c.l.b16 %v3569_v27 }
 0x1ef   : > { %v2208_v47 = vpop.f32.mrf.mxu1  ;;  %v2731_v33 = vpop.f32.mrf.mxu0  ;;  %5822 = vmatpush.bf16.msra.mxu2 %v5699_v35 }
 0x1f0   : > { %v7921_v29 = vadd.f32 %v2208_v47, %v7695_v2  ;;  %v7924_v17 = vadd.f32 %v2731_v33, %v7857_v58  ;;  %v2680_v11 = vpop.f32.mrf.mxu2  ;;  %v2709_v20 = vpop.f32.mrf.mxu3  ;;  %v5698_v2 = vld [vmem:[%s8131_s1 + $0x600] sm:$0xff]  ;;  %v5251_v58 = vrot.slane %v3512_v60, 10 }
 0x1f1   : > { %v2710_v12 = vadd.f32 %v2709_v20, %v2680_v11  ;;  %4067 = vmatpush.bf16.msra.mxu0 %v5698_v2 }
 0x1f2   : > { %3431 = vmatmul.bf16.gmra.mxu1 %v7690_v28  ;;  %3962 = vmatmul.bf16.gmra.mxu0 %v7915_v56  ;;  %v3560_v31 = vsel %vm7740_vm3, %v5251_v58, %v3559_v24  ;;  %v3577_v24 = vrot.slane %v5939_v26, 6 }
 0x1f3   : > { %5823 = vmatpush.bf16.msra.mxu2 %v5698_v2  ;;  %v3607_v54 = vunpack.c.l.b16 %v3560_v31  ;;  %v3514_v2 = vld [vmem:[%s6630_s14 + $0x48] sm:$0xc] }
 0x1f4   : > { %4039 = vmatmul.bf16.vlgmr.msrb.gmra.mxu3 %v7926_v45  ;;  %v3579_v58 = vrot.slane %v3577_v24, 4 }
 0x1f5   : > { %4010 = vmatmul.bf16.vlgmr.msrb.gmra.mxu2 %v7915_v56  ;;  %v7953_v36 = vpack.c.b16 %v3608_v10, %v3607_v54 }
 0x1f6   : > { %v3581_v5 = vsel %vm7740_vm3, %v3579_v58, %v3580_v62 }
 0x1f7   : > { %v2210_v28 = vpop.f32.mrf.mxu1  ;;  %v2733_v63 = vpop.f32.mrf.mxu0  ;;  %v3616_v10 = vunpack.c.l.b16 %v3581_v5 }
 0x1f8   : > { %v7939_v43 = vadd.f32 %v2210_v28, %v7724_v44  ;;  %v7942_v22 = vadd.f32 %v2733_v63, %v7877_v32  ;;  %v2779_v0 = vpop.f32.mrf.mxu2  ;;  %v3364_v51 = vpop.f32.mrf.mxu3 }
 0x1ff   : > { %v2213_v15 = vpop.f32.mrf.mxu1  ;;  %v2736_v23 = vpop.f32.mrf.mxu0 }
 0x200   : > { %v7949_v44 = vadd.f32 %v2213_v15, %v7766_v53  ;;  %v7951_v59 = vadd.f32 %v2736_v23, %v2708_v18  ;;  %v2781_v32 = vpop.f32.mrf.mxu2  ;;  %v3366_v9 = vpop.f32.mrf.mxu3  ;;  %v3570_v53 = vrot.slane %v3568_v38, 4 }
 0x202   : > { %3436 = vmatmul.bf16.gmra.mxu1 %v7736_v41  ;;  %3967 = vmatmul.bf16.gmra.mxu0 %v7926_v45  ;;  %v3572_v34 = vsel %vm7740_vm3, %v3570_v53, %v3571_v6  ;;  %v3515_v6 = vld [vmem:[%s6630_s14 + $0x54] sm:$0xc] }
 0x203   : > { %v3612_v8 = vunpack.c.l.b16 %v3572_v34 }
 0x204   : > { %4044 = vmatmul.bf16.gmra.mxu3 %v7953_v36 }
 0x205   : > { %4015 = vmatmul.bf16.gmra.mxu2 %v7926_v45  ;;  %v3613_v20 = vpack.c.b16 %v3612_v8, %v3611_v14 }
 0x207   : > { %v2215_v1 = vpop.f32.mrf.mxu1  ;;  %v2738_v46 = vpop.f32.mrf.mxu0 }
 0x208   : > { %v7963_v18 = vadd.f32 %v2215_v1, %v7800_v16  ;;  %v7965_v13 = vadd.f32 %v2738_v46, %v2710_v12  ;;  %v2784_v41 = vpop.f32.mrf.mxu2  ;;  %v3369_v19 = vpop.f32.mrf.mxu3  ;;  %v3589_v1 = vrot.slane %v7798_v40, 6  ;;  %v3588_v46 = vrot.slane %v3586_v30, 4 }
 0x20f   : > { %v2750_v21 = vpop.f32.mrf.mxu1  ;;  %v3393_v47 = vpop.f32.mrf.mxu0 }
 0x210   : > { %v2751_v33 = vadd.f32 %v2750_v21, %v7811_v3  ;;  %v7972_v16 = vadd.f32 %v3393_v47, %v3364_v51  ;;  %v2786_v35 = vpop.f32.mrf.mxu2  ;;  %v3371_v11 = vpop.f32.mrf.mxu3  ;;  %v5253_v3 = vrot.slane %v3514_v2, 10 }
 0x212   : > { %v2780_v12 = vadd.f32 %v2779_v0, %v2751_v33  ;;  %3981 = vmatmul.bf16.vlgmr.msra.gmra.mxu1 %v7864_v39  ;;  %4068 = vmatmul.bf16.vlgmr.msra.gmra.mxu0 %v7953_v36 }
 0x214   : > { %v7979_v60 = vadd.f32 %v2780_v12, %v7808_v55  ;;  %4049 = vmatmul.bf16.gmra.mxu3 %v3613_v20  ;;  %v3578_v55 = vsel %vm7740_vm3, %v5253_v3, %v3577_v24 }
 0x215   : > { %4020 = vmatmul.bf16.gmra.mxu2 %v7953_v36  ;;  %v3615_v52 = vunpack.c.l.b16 %v3578_v55 }
 0x217   : > { %v2752_v4 = vpop.f32.mrf.mxu1  ;;  %v3395_v28 = vpop.f32.mrf.mxu0  ;;  %v3617_v38 = vpack.c.b16 %v3616_v10, %v3615_v52 }
 0x218   : > { %v2753_v63 = vadd.f32 %v2752_v4, %v7845_v61  ;;  %v7984_v39 = vadd.f32 %v3395_v28, %v3366_v9  ;;  %v2789_v0 = vpop.f32.mrf.mxu2  ;;  %v3374_v51 = vpop.f32.mrf.mxu3 }
 0x21a   : > { %v2782_v31 = vadd.f32 %v2781_v32, %v2753_v63 }
 0x21c   : > { %v7991_v54 = vadd.f32 %v2782_v31, %v7842_v7 }
 0x21f   : > { %v2755_v15 = vpop.f32.mrf.mxu1  ;;  %v3398_v61 = vpop.f32.mrf.mxu0 }
 0x220   : > { %v2756_v23 = vadd.f32 %v2755_v15, %v7874_v57  ;;  %v7994_v9 = vadd.f32 %v3398_v61, %v3369_v19  ;;  %v2791_v25 = vpop.f32.mrf.mxu2  ;;  %v3376_v32 = vpop.f32.mrf.mxu3  ;;  %v5254_v57 = vrot.slane %v3515_v6, 10 }
 0x222   : > { %v2785_v53 = vadd.f32 %v2784_v41, %v2756_v23  ;;  %3986 = vmatmul.bf16.gmra.mxu1 %v7915_v56  ;;  %4073 = vmatmul.bf16.gmra.mxu0 %v3613_v20  ;;  %v3587_v21 = vsel %vm7740_vm3, %v5254_v57, %v3586_v30 }
 0x223   : > { %v3619_v40 = vunpack.c.l.b16 %v3587_v21 }
 0x224   : > { %v8000_v7 = vadd.f32 %v2785_v53, %v7871_v50  ;;  %4054 = vmatmul.bf16.gmra.mxu3 %v3617_v38  ;;  %v3590_v50 = vsel %vm7740_vm3, %v3588_v46, %v3589_v1 }
 0x225   : > { %4025 = vmatmul.bf16.gmra.mxu2 %v3613_v20  ;;  %v3620_v33 = vunpack.c.l.b16 %v3590_v50 }
 0x227   : > { %v2757_v19 = vpop.f32.mrf.mxu1  ;;  %v3400_v27 = vpop.f32.mrf.mxu0 }
 0x228   : > { %v2758_v34 = vadd.f32 %v2757_v19, %v7903_v49  ;;  %v8004_v14 = vadd.f32 %v3400_v27, %v3371_v11  ;;  %v2794_v41 = vpop.f32.mrf.mxu2  ;;  %v3379_v8 = vpop.f32.mrf.mxu3 }
 0x22a   : > { %v2787_v56 = vadd.f32 %v2786_v35, %v2758_v34  ;;  %v3621_v35 = vpack.c.b16 %v3620_v33, %v3619_v40 }
 0x22c   : > { %v8011_v47 = vadd.f32 %v2787_v56, %v7900_v48 }
 0x22f   : > { %v2760_v20 = vpop.f32.mrf.mxu1  ;;  %v3403_v12 = vpop.f32.mrf.mxu0 }
 0x230   : > { %v2761_v49 = vadd.f32 %v2760_v20, %v7924_v17  ;;  %v8014_v11 = vadd.f32 %v3403_v12, %v3374_v51  ;;  %v2796_v26 = vpop.f32.mrf.mxu2  ;;  %v3381_v24 = vpop.f32.mrf.mxu3 }
 0x232   : > { %v2790_v2 = vadd.f32 %v2789_v0, %v2761_v49  ;;  %3991 = vmatmul.bf16.gmra.mxu1 %v7926_v45  ;;  %4078 = vmatmul.bf16.gmra.mxu0 %v3617_v38 }
 0x234   : > { %v8018_v42 = vadd.f32 %v2790_v2, %v7921_v29 }
 0x235   : > { %4083 = vmatmul.bf16.vlgmr.msra.gmra.mxu2 %v3621_v35 }
 0x237   : > { %v2762_v48 = vpop.f32.mrf.mxu1  ;;  %v3405_v3 = vpop.f32.mrf.mxu0 }
 0x238   : > { %v2763_v58 = vadd.f32 %v2762_v48, %v7942_v22  ;;  %v8021_v62 = vadd.f32 %v3405_v3, %v3376_v32  ;;  %v3451_v17 = vpop.f32.mrf.mxu2  ;;  %v3480_v4 = vpop.f32.mrf.mxu3 }
 0x23a   : > { %v2792_v28 = vadd.f32 %v2791_v25, %v2763_v58 }
 0x23c   : > { %v8024_v63 = vadd.f32 %v2792_v28, %v7939_v43 }
 0x23f   : > { %v2765_v0 = vpop.f32.mrf.mxu1  ;;  %v3408_v51 = vpop.f32.mrf.mxu0 }
 0x240   : > { %v2766_v45 = vadd.f32 %v2765_v0, %v7951_v59  ;;  %v8027_v31 = vadd.f32 %v3408_v51, %v3379_v8  ;;  %v3453_v29 = vpop.f32.mrf.mxu2  ;;  %v3482_v55 = vpop.f32.mrf.mxu3 }
 0x242   : > { %v2795_v5 = vadd.f32 %v2794_v41, %v2766_v45  ;;  %3996 = vmatmul.bf16.gmra.mxu1 %v7953_v36 }
 0x244   : > { %v8031_v22 = vadd.f32 %v2795_v5, %v7949_v44 }
 0x247   : > { %v2767_v52 = vpop.f32.mrf.mxu1  ;;  %v3410_v10 = vpop.f32.mrf.mxu0 }
 0x248   : > { %v2768_v15 = vadd.f32 %v2767_v52, %v7965_v13  ;;  %v3411_v43 = vadd.f32 %v3410_v10, %v3381_v24  ;;  %v3456_v61 = vpop.f32.mrf.mxu2  ;;  %v3485_v23 = vpop.f32.mrf.mxu3 }
 0x24a   : > { %v2797_v25 = vadd.f32 %v2796_v26, %v2768_v15 }
 0x24c   : > { %v2806_v59 = vadd.f32 %v2797_v25, %v7963_v18 }
 0x24f   : > { %v3422_v32 = vpop.f32.mrf.mxu1  ;;  %v8035_v38 = vpop.f32.mrf.mxu0 }
 0x250   : > { %v3423_v37 = vadd.f32 %v3422_v32, %v7972_v16  ;;  %v3458_v30 = vpop.f32.mrf.mxu2  ;;  %v3487_v53 = vpop.f32.mrf.mxu3 }
 0x252   : > { %v3452_v36 = vadd.f32 %v3451_v17, %v3423_v37 }
 0x254   : > { %v3481_v44 = vadd.f32 %v3480_v4, %v3452_v36 }
 0x256   : > { %v8039_v6 = vadd.f32 %v3481_v44, %v7979_v60 }
 0x257   : > { %v3424_v1 = vpop.f32.mrf.mxu1  ;;  %v8041_v13 = vpop.f32.mrf.mxu0 }
 0x258   : > { %v3425_v57 = vadd.f32 %v3424_v1, %v7984_v39  ;;  %v3461_v46 = vpop.f32.mrf.mxu2  ;;  %v3490_v27 = vpop.f32.mrf.mxu3 }
 0x25a   : > { %v3454_v19 = vadd.f32 %v3453_v29, %v3425_v57 }
 0x25c   : > { %v3483_v18 = vadd.f32 %v3482_v55, %v3454_v19 }
 0x25e   : > { %v8045_v34 = vadd.f32 %v3483_v18, %v7991_v54 }
 0x25f   : > { %v3427_v16 = vpop.f32.mrf.mxu1  ;;  %v8047_v41 = vpop.f32.mrf.mxu0 }
 0x260   : > { %v3428_v8 = vadd.f32 %v3427_v16, %v7994_v9  ;;  %v3463_v56 = vpop.f32.mrf.mxu2  ;;  %v3492_v50 = vpop.f32.mrf.mxu3 }
 0x262   : > { %v3457_v60 = vadd.f32 %v3456_v61, %v3428_v8 }
 0x264   : > { %v3486_v21 = vadd.f32 %v3485_v23, %v3457_v60 }
 0x266   : > { %v8051_v40 = vadd.f32 %v3486_v21, %v8000_v7 }
 0x267   : > { %v3429_v39 = vpop.f32.mrf.mxu1  ;;  %v8053_v33 = vpop.f32.mrf.mxu0 }
 0x268   : > { %v3430_v20 = vadd.f32 %v3429_v39, %v8004_v14  ;;  %v3466_v12 = vpop.f32.mrf.mxu2  ;;  %v3495_v48 = vpop.f32.mrf.mxu3 }
 0x26a   : > { %v3459_v54 = vadd.f32 %v3458_v30, %v3430_v20 }
 0x26c   : > { %v3488_v49 = vadd.f32 %v3487_v53, %v3459_v54 }
 0x26e   : > { %v8057_v26 = vadd.f32 %v3488_v49, %v8011_v47 }
 0x26f   : > { %v3432_v24 = vpop.f32.mrf.mxu1  ;;  %v8059_v9 = vpop.f32.mrf.mxu0 }
 0x270   : > { %v3433_v35 = vadd.f32 %v3432_v24, %v8014_v11  ;;  %v3468_v2 = vpop.f32.mrf.mxu2  ;;  %v3497_v0 = vpop.f32.mrf.mxu3 }
 0x272   : > { %v3462_v7 = vadd.f32 %v3461_v46, %v3433_v35 }
 0x274   : > { %v3491_v3 = vadd.f32 %v3490_v27, %v3462_v7 }
 0x276   : > { %v8063_v58 = vadd.f32 %v3491_v3, %v8018_v42 }
 0x277   : > { %v3434_v17 = vpop.f32.mrf.mxu1  ;;  %v8065_v14 = vpop.f32.mrf.mxu0 }
 0x278   : > { %v3435_v4 = vadd.f32 %v3434_v17, %v8021_v62  ;;  %v4011_v28 = vpop.f32.mrf.mxu2  ;;  %v4040_v10 = vpop.f32.mrf.mxu3 }
 0x27a   : > { %v3464_v47 = vadd.f32 %v3463_v56, %v3435_v4 }
 0x27c   : > { %v3493_v51 = vadd.f32 %v3492_v50, %v3464_v47 }
 0x27e   : > { %v8069_v45 = vadd.f32 %v3493_v51, %v8024_v63 }
 0x27f   : > { %v3437_v11 = vpop.f32.mrf.mxu1  ;;  %v8071_v29 = vpop.f32.mrf.mxu0 }
 0x280   : > { %v3438_v55 = vadd.f32 %v3437_v11, %v8027_v31  ;;  %v4013_v5 = vpop.f32.mrf.mxu2  ;;  %v4042_v30 = vpop.f32.mrf.mxu3 }
 0x282   : > { %v3467_v42 = vadd.f32 %v3466_v12, %v3438_v55 }
 0x284   : > { %v3496_v52 = vadd.f32 %v3495_v48, %v3467_v42 }
 0x286   : > { %v8075_v15 = vadd.f32 %v3496_v52, %v8031_v22 }
 0x287   : > { %v3439_v62 = vpop.f32.mrf.mxu1  ;;  %v8077_v61 = vpop.f32.mrf.mxu0 }
 0x288   : > { %v3440_v23 = vadd.f32 %v3439_v62, %v3411_v43  ;;  %v4016_v25 = vpop.f32.mrf.mxu2  ;;  %v4045_v27 = vpop.f32.mrf.mxu3 }
 0x28a   : > { %v3469_v32 = vadd.f32 %v3468_v2, %v3440_v23 }
 0x28c   : > { %v3498_v63 = vadd.f32 %v3497_v0, %v3469_v32 }
 0x28e   : > { %v8079_v37 = vadd.f32 %v3498_v63, %v2806_v59  ;;  %v8087_v59 = vld [vmem:[%s8132_s2] ss:$0 sm:$0xff] }
 0x28f   : > { %v3982_v36 = vpop.f32.mrf.mxu1  ;;  %v4069_v53 = vpop.f32.mrf.mxu0 }
 0x290   : > { %v3983_v31 = vadd.f32 %v3982_v36, %v8035_v38  ;;  %v4018_v44 = vpop.f32.mrf.mxu2  ;;  %v4047_v54 = vpop.f32.mrf.mxu3 }
 0x292   : > { %v4012_v1 = vadd.f32 %v4011_v28, %v3983_v31 }
 0x294   : > { %v4041_v57 = vadd.f32 %v4040_v10, %v4012_v1 }
 0x296   : > { %v4070_v46 = vadd.f32 %v4069_v53, %v4041_v57 }
 0x297   : > { %v3984_v22 = vpop.f32.mrf.mxu1  ;;  %v4071_v19 = vpop.f32.mrf.mxu0 }
 0x298   : > { %v4089_v18 = vadd.f32 %v4070_v46, %v8039_v6  ;;  %v3985_v43 = vadd.f32 %v3984_v22, %v8041_v13  ;;  %v4021_v8 = vpop.f32.mrf.mxu2  ;;  %v4050_v55 = vpop.f32.mrf.mxu3 }
 0x29a   : > { %v4014_v16 = vadd.f32 %v4013_v5, %v3985_v43  ;;  %v4101_v60 = vadd.f32 %v8087_v59, %v4089_v18 }
 0x29c   : > { %v4043_v56 = vadd.f32 %v4042_v30, %v4014_v16  ;;  %v4138_v12 = vmul.f32 %v4101_v60, %v4101_v60 }
 0x29e   : > { %v4072_v38 = vadd.f32 %v4071_v19, %v4043_v56 }
 0x29f   : > { %v3987_v21 = vpop.f32.mrf.mxu1  ;;  %v4074_v50 = vpop.f32.mrf.mxu0 }
 0x2a0   : > { %v4090_v39 = vadd.f32 %v4072_v38, %v8045_v34  ;;  %v3988_v6 = vadd.f32 %v3987_v21, %v8047_v41  ;;  %v4023_v48 = vpop.f32.mrf.mxu2 }
 0x2a2   : > { %v4102_v13 = vadd.f32 %v8087_v59, %v4090_v39  ;;  %v4017_v20 = vadd.f32 %v4016_v25, %v3988_v6 }
 0x2a4   : > { %v5773_v49 = vpack.c.bf16 %v4102_v13, %v4101_v60  ;;  %v4125_v24 = vadd.f32 %v4102_v13, %v4101_v60  ;;  %v4139_v35 = vmul.f32 %v4102_v13, %v4102_v13  ;;  %v4046_v2 = vadd.f32 %v4045_v27, %v4017_v20 }
 0x2a6   : > { %5774 = vst [vmem:[%s6063_s19] sm:$0xff] %v5773_v49   ;;  %v4146_v7 = vadd.f32 %v4139_v35, %v4138_v12  ;;  %v4075_v3 = vadd.f32 %v4074_v50, %v4046_v2 }
 0x2a7   : > { %v3989_v17 = vpop.f32.mrf.mxu1  ;;  %v4076_v4 = vpop.f32.mrf.mxu0 }
 0x2a8   : > { %v4091_v28 = vadd.f32 %v4075_v3, %v8051_v40  ;;  %v3990_v34 = vadd.f32 %v3989_v17, %v8053_v33  ;;  %v4026_v52 = vpop.f32.mrf.mxu2 }
 0x2aa   : > { %v4103_v41 = vadd.f32 %v8087_v59, %v4091_v28  ;;  %v4019_v47 = vadd.f32 %v4018_v44, %v3990_v34  ;;  %v4052_v44 = vpop.f32.mrf.mxu3 }
 0x2ac   : > { %v4126_v0 = vadd.f32 %v4125_v24, %v4103_v41  ;;  %v4140_v51 = vmul.f32 %v4103_v41, %v4103_v41  ;;  %v4048_v11 = vadd.f32 %v4047_v54, %v4019_v47 }
 0x2ae   : > { %v4147_v5 = vadd.f32 %v4146_v7, %v4140_v51  ;;  %v4077_v42 = vadd.f32 %v4076_v4, %v4048_v11 }
 0x2af   : > { %v3992_v10 = vpop.f32.mrf.mxu1  ;;  %v4079_v25 = vpop.f32.mrf.mxu0 }
 0x2b0   : > { %v4092_v62 = vadd.f32 %v4077_v42, %v8057_v26  ;;  %v3993_v23 = vadd.f32 %v3992_v10, %v8059_v9  ;;  %v4028_v26 = vpop.f32.mrf.mxu2 }
 0x2b2   : > { %v4104_v40 = vadd.f32 %v8087_v59, %v4092_v62  ;;  %v4022_v33 = vadd.f32 %v4021_v8, %v3993_v23  ;;  %v4055_v21 = vpop.f32.mrf.mxu3 }
 0x2b4   : > { %v5778_v32 = vpack.c.bf16 %v4104_v40, %v4103_v41  ;;  %v4127_v63 = vadd.f32 %v4126_v0, %v4104_v40  ;;  %v4141_v30 = vmul.f32 %v4104_v40, %v4104_v40  ;;  %v4051_v36 = vadd.f32 %v4050_v55, %v4022_v33 }
 0x2b6   : > { %5805 = vst [vmem:[%s6063_s19 + $0x8] sm:$0xff] %v5778_v32   ;;  %v4148_v53 = vadd.f32 %v4147_v5, %v4141_v30  ;;  %v4080_v31 = vadd.f32 %v4079_v25, %v4051_v36 }
 0x2b7   : > { %v3994_v1 = vpop.f32.mrf.mxu1  ;;  %v4081_v19 = vpop.f32.mrf.mxu0 }
 0x2b8   : > { %v4093_v57 = vadd.f32 %v4080_v31, %v8063_v58  ;;  %v3995_v46 = vadd.f32 %v3994_v1, %v8065_v14  ;;  %v4084_v50 = vpop.f32.mrf.mxu2 }
 0x2ba   : > { %v4105_v9 = vadd.f32 %v8087_v59, %v4093_v57  ;;  %v4024_v22 = vadd.f32 %v4023_v48, %v3995_v46  ;;  %v4057_v2 = vpop.f32.mrf.mxu3 }
 0x2bc   : > { %v4128_v18 = vadd.f32 %v4127_v63, %v4105_v9  ;;  %v4142_v43 = vmul.f32 %v4105_v9, %v4105_v9  ;;  %v4053_v27 = vadd.f32 %v4052_v44, %v4024_v22 }
 0x2be   : > { %v4149_v16 = vadd.f32 %v4148_v53, %v4142_v43  ;;  %v4082_v8 = vadd.f32 %v4081_v19, %v4053_v27 }
 0x2bf   : > { %v3997_v56 = vpop.f32.mrf.mxu1 }
 0x2c0   : > { %v4094_v38 = vadd.f32 %v4082_v8, %v8069_v45  ;;  %v3998_v60 = vadd.f32 %v3997_v56, %v8071_v29  ;;  %v4086_v17 = vpop.f32.mrf.mxu2 }
 0x2c2   : > { %v4106_v58 = vadd.f32 %v8087_v59, %v4094_v38  ;;  %v4027_v14 = vadd.f32 %v4026_v52, %v3998_v60 }
 0x2c4   : > { %v5783_v39 = vpack.c.bf16 %v4106_v58, %v4105_v9  ;;  %v4129_v6 = vadd.f32 %v4128_v18, %v4106_v58  ;;  %v4143_v13 = vmul.f32 %v4106_v58, %v4106_v58  ;;  %v4056_v20 = vadd.f32 %v4055_v21, %v4027_v14 }
 0x2c6   : > { %5806 = vst [vmem:[%s6063_s19 + $0x10] sm:$0xff] %v5783_v39   ;;  %v4150_v12 = vadd.f32 %v4149_v16, %v4143_v13  ;;  %v4085_v54 = vadd.f32 %v4084_v50, %v4056_v20 }
 0x2c7   : > { %v3999_v49 = vpop.f32.mrf.mxu1 }
 0x2c8   : > { %v4095_v24 = vadd.f32 %v4085_v54, %v8075_v15  ;;  %v4000_v45 = vadd.f32 %v3999_v49, %v8077_v61 }
 0x2ca   : > { %v4107_v29 = vadd.f32 %v8087_v59, %v4095_v24  ;;  %v4029_v35 = vadd.f32 %v4028_v26, %v4000_v45 }
 0x2cc   : > { %v4130_v48 = vadd.f32 %v4129_v6, %v4107_v29  ;;  %v4144_v7 = vmul.f32 %v4107_v29, %v4107_v29  ;;  %v4058_v3 = vadd.f32 %v4057_v2, %v4029_v35 }
 0x2ce   : > { %v4151_v4 = vadd.f32 %v4150_v12, %v4144_v7  ;;  %v4087_v28 = vadd.f32 %v4086_v17, %v4058_v3 }
 0x2d0   : > { %v4096_v34 = vadd.f32 %v4087_v28, %v8079_v37 }
 0x2d2   : > { %v4108_v41 = vadd.f32 %v8087_v59, %v4096_v34 }
 0x2d4   : > { %v5788_v47 = vpack.c.bf16 %v4108_v41, %v4107_v29  ;;  %v4131_v0 = vadd.f32 %v4130_v48, %v4108_v41  ;;  %v4145_v15 = vmul.f32 %v4108_v41, %v4108_v41 }
 0x2d6   : > { %5807 = vst [vmem:[%s6063_s19 + $0x18] sm:$0xff] %v5788_v47   ;;  %v4132_v61 = vrot.slane %v4131_v0, 4  ;;  %v4152_v51 = vadd.f32 %v4151_v4, %v4145_v15 }
 0x2d8   : > { %v4133_v11 = vadd.f32 %v4132_v61, %v4131_v0  ;;  %v4153_v55 = vrot.slane %v4152_v51, 4 }
 0x2da   : > { %v4134_v5 = vrot.slane %v4133_v11, 2  ;;  %v4154_v42 = vadd.f32 %v4153_v55, %v4152_v51 }
 0x2dc   : > { %v4135_v52 = vadd.f32 %v4134_v5, %v4133_v11  ;;  %v4155_v10 = vrot.slane %v4154_v42, 2 }
 0x2de   : > { %v4136_v62 = vrot.slane %v4135_v52, 1  ;;  %v4156_v23 = vadd.f32 %v4155_v10, %v4154_v42 }
 0x2e0   : > { %v4157_v25 = vrot.slane %v4156_v23, 1  ;;  %v4137_v37 = vadd.f32 %v4136_v62, %v4135_v52 }
 0x2e2   : > { %v4158_v40 = vadd.f32 %v4157_v25, %v4156_v23 }
 0x2e4   : > { %v4160_v59 = vsel %vm4159_vm4, %v4137_v37, %v4158_v40 }
 0x2e5   : > { %4161 = vst [vmem:[%s6068_s23] sm:$0x3] %v4160_v59 }
 0x2e6 PF: > { %s18_s28 = sadd.s32 1, %s5979_s28   ;;  %s8162_s24 = smov %s5971_s26 }
 0x2e7   : > { %p15_p9 = scmp.ge.s32.totalorder %s18_s28, 10   ;;  %s8163_s25 = smov %s5975_s27 }
 0x2e8   : > { %s8164_s26 = smov %s8167_s29  ;;  %s8165_s27 = smov %s8171_s30 }
 0x2e9   :  { %17 = sbr.rel (!%p15_p9) target bundleno = 3 (0x3), region = 97 }

</bundles_post_ra>
